<compile_context>
chip_gen: v5e
topology: v5e:2x2
jax: 0.10.0
libtpu: 0.0.40
codegen_flags: <defaults>
</compile_context>

<pallas_src>
import jax
import jax.numpy as jnp
from jax.experimental import pallas as pl
from jax.experimental.pallas import tpu as pltpu


def event_emb_kernel(
    # ---- SMEM per-block scalars (indices + timestamps) ----
    c_sid_ref, c_oid_ref, c_ts_ref,                    # (TB, 1)
    p_sid_ref, p_oid_ref, p_eid_ref, p_ts_ref,         # (TB, L)
    n_sid_ref, n_oid_ref, n_eid_ref, n_ts_ref,         # (TB, L)
    # ---- VMEM-resident tables / TimeEncode params ----
    node_ref,                                          # (num_nodes, 1, H) = nemb + nfeat
    edge_ref,                                          # (num_edges, 1, H)
    freq_ref,                                          # (1, H)
    phase_ref,                                         # (1, H)
    # ---- output ----
    out_ref,                                           # (2, TB, L): [0]=pos_dot, [1]=neg_dot
    # ---- VMEM scratch ----
    c_scr,                                             # (TB, 1, H)
    pos_scr,                                           # (TB, L, H)
    neg_scr,                                           # (TB, L, H)
):
    TB = c_sid_ref.shape[0]
    L = p_sid_ref.shape[1]

    freq = freq_ref[...]                 # (1, H)
    phase = phase_ref[...]               # (1, H)
    cos_phase = jnp.cos(phase)           # TimeEncode(dt=0): the centre event's time emb

    @pl.loop(0, TB)
    def _(b):
        # ---- centre event row: node(s) + node(o) + cos(phase) ----
        c_scr[b, :, :] = (node_ref[c_sid_ref[b, 0]]
                          + node_ref[c_oid_ref[b, 0]]
                          + cos_phase)
        c_t = c_ts_ref[b, 0]

        # ---- pos / neg event rows; inner loop unrolled (L is small & static) ----
        for l in range(L):
            p_temb = jnp.cos((c_t - p_ts_ref[b, l]) * freq + phase)
            pos_scr[b, l:l + 1, :] = (node_ref[p_sid_ref[b, l]]
                                      + node_ref[p_oid_ref[b, l]]
                                      + edge_ref[p_eid_ref[b, l]]
                                      + p_temb)

            n_temb = jnp.cos((c_t - n_ts_ref[b, l]) * freq + phase)
            neg_scr[b, l:l + 1, :] = (node_ref[n_sid_ref[b, l]]
                                      + node_ref[n_oid_ref[b, l]]
                                      + edge_ref[n_eid_ref[b, l]]
                                      + n_temb)

    # ---- vectorized dot products over the hidden dim (XLU lane reduce) ----
    c_emb = c_scr[...]                                       # (TB, 1, H)
    out_ref[0] = jnp.sum(c_emb * pos_scr[...], axis=-1)      # (TB, L)
    out_ref[1] = jnp.sum(c_emb * neg_scr[...], axis=-1)      # (TB, L)


def event_emb_forward(params, c, pos, neg, *, block_b=8):
    nemb_tbl, nfeat_tbl, efeat_tbl, basis_freq, phase = params
    c_sids, c_oids, _c_eids, c_ts = c          # c_eids unused (matches PyTorch forward)
    pos_sids, pos_oids, pos_eids, pos_ts = pos
    neg_sids, neg_oids, neg_eids, neg_ts = neg

    B, L = pos_sids.shape
    H = nemb_tbl.shape[1]
    num_nodes = nemb_tbl.shape[0]
    num_edges = efeat_tbl.shape[0]
    TB = min(block_b, B)
    assert B % TB == 0, "batch must be divisible by the batch block size"

    f32, i32 = jnp.float32, jnp.int32

    # nemb(x) + nfeat(x) always appears summed -> combine the tables once
    # (O(table) work; halves node gathers and node-table HBM/VMEM bytes).
    node_tbl = (nemb_tbl + nfeat_tbl).astype(f32).reshape(num_nodes, 1, H)
    edge_tbl = efeat_tbl.astype(f32).reshape(num_edges, 1, H)

    smem = pltpu.MemorySpace.SMEM
    idx1_spec = pl.BlockSpec((TB, 1), lambda i: (i, 0), memory_space=smem)
    idxL_spec = pl.BlockSpec((TB, L), lambda i: (i, 0), memory_space=smem)
    node_spec = pl.BlockSpec((num_nodes, 1, H), lambda i: (0, 0, 0))   # resident
    edge_spec = pl.BlockSpec((num_edges, 1, H), lambda i: (0, 0, 0))   # resident
    vec_spec = pl.BlockSpec((1, H), lambda i: (0, 0))                  # resident
    out_spec = pl.BlockSpec((2, TB, L), lambda i: (0, i, 0))

    out = pl.pallas_call(
        event_emb_kernel,
        grid=(B // TB,),
        in_specs=[
            idx1_spec, idx1_spec, idx1_spec,                      # c_sids, c_oids, c_ts
            idxL_spec, idxL_spec, idxL_spec, idxL_spec,           # pos ids + ts
            idxL_spec, idxL_spec, idxL_spec, idxL_spec,           # neg ids + ts
            node_spec, edge_spec, vec_spec, vec_spec,             # tables + TimeEncode params
        ],
        out_specs=out_spec,
        out_shape=jax.ShapeDtypeStruct((2, B, L), f32),
        scratch_shapes=[
            pltpu.VMEM((TB, 1, H), f32),
            pltpu.VMEM((TB, L, H), f32),
            pltpu.VMEM((TB, L, H), f32),
        ],
        compiler_params=pltpu.CompilerParams(
            dimension_semantics=("parallel",)),
    )(
        c_sids.astype(i32), c_oids.astype(i32), c_ts.astype(f32),
        pos_sids.astype(i32), pos_oids.astype(i32), pos_eids.astype(i32),
        pos_ts.astype(f32),
        neg_sids.astype(i32), neg_oids.astype(i32), neg_eids.astype(i32),
        neg_ts.astype(f32),
        node_tbl, edge_tbl,
        basis_freq.astype(f32).reshape(1, H), phase.astype(f32).reshape(1, H),
    )
    return out[0], out[1]


def event_emb_reference(params, c, pos, neg):
    """Plain-JAX transcription of the PyTorch forward (use_time=True branch)."""
    nemb_tbl, nfeat_tbl, efeat_tbl, basis_freq, phase = params
    c_sids, c_oids, _c_eids, c_ts = c
    pos_sids, pos_oids, pos_eids, pos_ts = pos
    neg_sids, neg_oids, neg_eids, neg_ts = neg

    def temb(ts):  # TimeEncode.forward
        return jnp.cos(ts[:, :, None] * basis_freq[None, None, :]
                       + phase[None, None, :])

    take = lambda tbl, idx: jnp.take(tbl, idx, axis=0)

    p_ts_all = jnp.concatenate([pos_ts, c_ts], axis=1)
    p_ts_emb = temb(c_ts - p_ts_all)
    n_ts_all = jnp.concatenate([neg_ts, c_ts], axis=1)
    n_ts_emb = temb(c_ts - n_ts_all)

    c_emb = (take(nemb_tbl, c_sids) + take(nemb_tbl, c_oids)
             + take(nfeat_tbl, c_sids) + take(nfeat_tbl, c_oids)
             + p_ts_emb[:, -1:, :])
    pos_emb = (take(nemb_tbl, pos_sids) + take(nemb_tbl, pos_oids)
               + take(nfeat_tbl, pos_sids) + take(nfeat_tbl, pos_oids)
               + take(efeat_tbl, pos_eids) + p_ts_emb[:, :-1, :])
    neg_emb = (take(nemb_tbl, neg_sids) + take(nemb_tbl, neg_oids)
               + take(nfeat_tbl, neg_sids) + take(nfeat_tbl, neg_oids)
               + take(efeat_tbl, neg_eids) + n_ts_emb[:, :-1, :])
    pos_dot = jnp.sum(c_emb * pos_emb, axis=-1)
    neg_dot = jnp.sum(c_emb * neg_emb, axis=-1)
    return pos_dot, neg_dot


if __name__ == "__main__":
    B, L, H = 16, 8, 128           # batch, pos/neg events per centre, hdim (lane-dense)
    NUM_NODES, NUM_EDGES = 64, 256

    key = jax.random.PRNGKey(0)
    ks = jax.random.split(key, 18)
    bound = 1.0 / (H ** 0.5)
    u = lambda k, shape: jax.random.uniform(k, shape, jnp.float32, -bound, bound)
    ri = lambda k, shape, hi: jax.random.randint(k, shape, 1, hi, dtype=jnp.int32)

    # Embedding tables (padding row 0 zeroed, as with padding_idx=0).
    nemb_tbl = u(ks[0], (NUM_NODES, H)).at[0].set(0.0)
    nfeat_tbl = u(ks[1], (NUM_NODES, H)).at[0].set(0.0)
    efeat_tbl = u(ks[2], (NUM_EDGES, H)).at[0].set(0.0)
    basis_freq = u(ks[3], (H,))
    phase = u(ks[4], (H,))
    params = (nemb_tbl, nfeat_tbl, efeat_tbl, basis_freq, phase)

    c = (ri(ks[5], (B, 1), NUM_NODES), ri(ks[6], (B, 1), NUM_NODES),
         ri(ks[7], (B, 1), NUM_EDGES),
         jax.random.uniform(ks[8], (B, 1), jnp.float32, 5.0, 10.0))
    pos = (ri(ks[9], (B, L), NUM_NODES), ri(ks[10], (B, L), NUM_NODES),
           ri(ks[11], (B, L), NUM_EDGES),
           jax.random.uniform(ks[12], (B, L), jnp.float32, 0.0, 5.0))
    neg = (ri(ks[13], (B, L), NUM_NODES), ri(ks[14], (B, L), NUM_NODES),
           ri(ks[15], (B, L), NUM_EDGES),
           jax.random.uniform(ks[16], (B, L), jnp.float32, 0.0, 5.0))

    pos_dot, neg_dot = event_emb_forward(params, c, pos, neg, block_b=8)
    pos_dot, neg_dot = jax.block_until_ready((pos_dot, neg_dot))

    ref_pos, ref_neg = event_emb_reference(params, c, pos, neg)
    assert pos_dot.shape == (B, L) and neg_dot.shape == (B, L)
    assert jnp.allclose(pos_dot, ref_pos, atol=1e-4, rtol=1e-4)
    assert jnp.allclose(neg_dot, ref_neg, atol=1e-4, rtol=1e-4)

    print("KERNEL_OK")
</pallas_src>

<mosaic_0001>
module attributes {stable_mosaic.version = 11 : i64} {
  func.func @event_emb_kernel(%arg0: i32, %arg1: memref<8x1xi32, #tpu.memory_space<smem>>, %arg2: memref<8x1xi32, #tpu.memory_space<smem>>, %arg3: memref<8x1xf32, #tpu.memory_space<smem>>, %arg4: memref<8x8xi32, #tpu.memory_space<smem>>, %arg5: memref<8x8xi32, #tpu.memory_space<smem>>, %arg6: memref<8x8xi32, #tpu.memory_space<smem>>, %arg7: memref<8x8xf32, #tpu.memory_space<smem>>, %arg8: memref<8x8xi32, #tpu.memory_space<smem>>, %arg9: memref<8x8xi32, #tpu.memory_space<smem>>, %arg10: memref<8x8xi32, #tpu.memory_space<smem>>, %arg11: memref<8x8xf32, #tpu.memory_space<smem>>, %arg12: memref<64x1x128xf32, #tpu.memory_space<vmem>>, %arg13: memref<256x1x128xf32, #tpu.memory_space<vmem>>, %arg14: memref<1x128xf32, #tpu.memory_space<vmem>>, %arg15: memref<1x128xf32, #tpu.memory_space<vmem>>, %arg16: memref<2x8x8xf32, #tpu.memory_space<vmem>>, %arg17: memref<8x1x128xf32, #tpu.memory_space<vmem>>, %arg18: memref<8x8x128xf32, #tpu.memory_space<vmem>>, %arg19: memref<8x8x128xf32, #tpu.memory_space<vmem>>) attributes {dimension_semantics = [#tpu.dimension_semantics<parallel>], iteration_bounds = array<i64: 2>, scalar_prefetch = 0 : i64, scratch_operands = 3 : i64, tpu.core_type = #tpu.core_type<tc>, window_params = [{transform_indices = @transform_0, window_bounds = array<i64: 8, 1>}, {transform_indices = @transform_1, window_bounds = array<i64: 8, 1>}, {transform_indices = @transform_2, window_bounds = array<i64: 8, 1>}, {transform_indices = @transform_3, window_bounds = array<i64: 8, 8>}, {transform_indices = @transform_4, window_bounds = array<i64: 8, 8>}, {transform_indices = @transform_5, window_bounds = array<i64: 8, 8>}, {transform_indices = @transform_6, window_bounds = array<i64: 8, 8>}, {transform_indices = @transform_7, window_bounds = array<i64: 8, 8>}, {transform_indices = @transform_8, window_bounds = array<i64: 8, 8>}, {transform_indices = @transform_9, window_bounds = array<i64: 8, 8>}, {transform_indices = @transform_10, window_bounds = array<i64: 8, 8>}, {pipeline_mode = #tpu.pipeline_mode<synchronous>, transform_indices = @transform_11, window_bounds = array<i64: 64, 1, 128>}, {pipeline_mode = #tpu.pipeline_mode<synchronous>, transform_indices = @transform_12, window_bounds = array<i64: 256, 1, 128>}, {pipeline_mode = #tpu.pipeline_mode<synchronous>, transform_indices = @transform_13, window_bounds = array<i64: 1, 128>}, {pipeline_mode = #tpu.pipeline_mode<synchronous>, transform_indices = @transform_14, window_bounds = array<i64: 1, 128>}, {transform_indices = @transform_15, window_bounds = array<i64: 2, 8, 8>}]} {
    %c0 = arith.constant 0 : index
    %c0_0 = arith.constant 0 : index
    %0 = vector.load %arg14[%c0, %c0_0] : memref<1x128xf32, #tpu.memory_space<vmem>>, vector<1x128xf32>
    %c0_1 = arith.constant 0 : index
    %c0_2 = arith.constant 0 : index
    %1 = vector.load %arg15[%c0_1, %c0_2] : memref<1x128xf32, #tpu.memory_space<vmem>>, vector<1x128xf32>
    %2 = math.cos %1 : vector<1x128xf32>
    %c0_i32 = arith.constant 0 : i32
    %c8_i32 = arith.constant 8 : i32
    %3 = arith.addi %c0_i32, %c8_i32 : i32
    %c1_i32 = arith.constant 1 : i32
    scf.for %arg20 = %c0_i32 to %3 step %c1_i32  : i32 {
      %c1_i32_19 = arith.constant 1 : i32
      %19 = arith.muli %arg20, %c1_i32_19 : i32
      %c0_i32_20 = arith.constant 0 : i32
      %20 = arith.addi %c0_i32_20, %19 : i32
      %21 = arith.index_cast %20 : i32 to index
      %c0_21 = arith.constant 0 : index
      %22 = memref.load %arg1[%21, %c0_21] : memref<8x1xi32, #tpu.memory_space<smem>>
      %23 = arith.index_cast %22 : i32 to index
      %c0_22 = arith.constant 0 : index
      %c0_23 = arith.constant 0 : index
      %24 = vector.load %arg12[%23, %c0_22, %c0_23] : memref<64x1x128xf32, #tpu.memory_space<vmem>>, vector<1x1x128xf32>
      %25 = vector.shape_cast %24 : vector<1x1x128xf32> to vector<1x128xf32>
      %26 = arith.index_cast %20 : i32 to index
      %c0_24 = arith.constant 0 : index
      %27 = memref.load %arg2[%26, %c0_24] : memref<8x1xi32, #tpu.memory_space<smem>>
      %28 = arith.index_cast %27 : i32 to index
      %c0_25 = arith.constant 0 : index
      %c0_26 = arith.constant 0 : index
      %29 = vector.load %arg12[%28, %c0_25, %c0_26] : memref<64x1x128xf32, #tpu.memory_space<vmem>>, vector<1x1x128xf32>
      %30 = vector.shape_cast %29 : vector<1x1x128xf32> to vector<1x128xf32>
      %31 = arith.addf %25, %30 : vector<1x128xf32>
      %32 = arith.addf %31, %2 : vector<1x128xf32>
      %33 = arith.index_cast %20 : i32 to index
      %c0_27 = arith.constant 0 : index
      %c0_28 = arith.constant 0 : index
      %34 = vector.load %arg17[%33, %c0_27, %c0_28] : memref<8x1x128xf32, #tpu.memory_space<vmem>>, vector<1x1x128xf32>
      %35 = vector.shape_cast %34 : vector<1x1x128xf32> to vector<1x128xf32>
      %36 = vector.shape_cast %32 : vector<1x128xf32> to vector<1x1x128xf32>
      tpu.vector_store %arg17[%33, %c0_27, %c0_28], %36 {strides = array<i32>} : memref<8x1x128xf32, #tpu.memory_space<vmem>>, vector<1x1x128xf32>,
      %37 = arith.index_cast %20 : i32 to index
      %c0_29 = arith.constant 0 : index
      %38 = memref.load %arg3[%37, %c0_29] : memref<8x1xf32, #tpu.memory_space<smem>>
      %39 = arith.index_cast %20 : i32 to index
      %c0_30 = arith.constant 0 : index
      %40 = memref.load %arg7[%39, %c0_30] : memref<8x8xf32, #tpu.memory_space<smem>>
      %41 = arith.subf %38, %40 : f32
      %42 = vector.broadcast %41 : f32 to vector<1x128xf32>
      %43 = arith.mulf %42, %0 : vector<1x128xf32>
      %44 = arith.addf %43, %1 : vector<1x128xf32>
      %45 = math.cos %44 : vector<1x128xf32>
      %46 = arith.index_cast %20 : i32 to index
      %c0_31 = arith.constant 0 : index
      %47 = memref.load %arg4[%46, %c0_31] : memref<8x8xi32, #tpu.memory_space<smem>>
      %48 = arith.index_cast %47 : i32 to index
      %c0_32 = arith.constant 0 : index
      %c0_33 = arith.constant 0 : index
      %49 = vector.load %arg12[%48, %c0_32, %c0_33] : memref<64x1x128xf32, #tpu.memory_space<vmem>>, vector<1x1x128xf32>
      %50 = vector.shape_cast %49 : vector<1x1x128xf32> to vector<1x128xf32>
      %51 = arith.index_cast %20 : i32 to index
      %c0_34 = arith.constant 0 : index
      %52 = memref.load %arg5[%51, %c0_34] : memref<8x8xi32, #tpu.memory_space<smem>>
      %53 = arith.index_cast %52 : i32 to index
      %c0_35 = arith.constant 0 : index
      %c0_36 = arith.constant 0 : index
      %54 = vector.load %arg12[%53, %c0_35, %c0_36] : memref<64x1x128xf32, #tpu.memory_space<vmem>>, vector<1x1x128xf32>
      %55 = vector.shape_cast %54 : vector<1x1x128xf32> to vector<1x128xf32>
      %56 = arith.addf %50, %55 : vector<1x128xf32>
      %57 = arith.index_cast %20 : i32 to index
      %c0_37 = arith.constant 0 : index
      %58 = memref.load %arg6[%57, %c0_37] : memref<8x8xi32, #tpu.memory_space<smem>>
      %59 = arith.index_cast %58 : i32 to index
      %c0_38 = arith.constant 0 : index
      %c0_39 = arith.constant 0 : index
      %60 = vector.load %arg13[%59, %c0_38, %c0_39] : memref<256x1x128xf32, #tpu.memory_space<vmem>>, vector<1x1x128xf32>
      %61 = vector.shape_cast %60 : vector<1x1x128xf32> to vector<1x128xf32>
      %62 = arith.addf %56, %61 : vector<1x128xf32>
      %63 = arith.addf %62, %45 : vector<1x128xf32>
      %64 = arith.index_cast %20 : i32 to index
      %c0_40 = arith.constant 0 : index
      %c0_41 = arith.constant 0 : index
      %65 = vector.load %arg18[%64, %c0_40, %c0_41] : memref<8x8x128xf32, #tpu.memory_space<vmem>>, vector<1x1x128xf32>
      %66 = vector.shape_cast %65 : vector<1x1x128xf32> to vector<1x128xf32>
      %67 = vector.shape_cast %63 : vector<1x128xf32> to vector<1x1x128xf32>
      tpu.vector_store %arg18[%64, %c0_40, %c0_41], %67 {strides = array<i32>} : memref<8x8x128xf32, #tpu.memory_space<vmem>>, vector<1x1x128xf32>,
      %68 = arith.index_cast %20 : i32 to index
      %c0_42 = arith.constant 0 : index
      %69 = memref.load %arg11[%68, %c0_42] : memref<8x8xf32, #tpu.memory_space<smem>>
      %70 = arith.subf %38, %69 : f32
      %71 = vector.broadcast %70 : f32 to vector<1x128xf32>
      %72 = arith.mulf %71, %0 : vector<1x128xf32>
      %73 = arith.addf %72, %1 : vector<1x128xf32>
      %74 = math.cos %73 : vector<1x128xf32>
      %75 = arith.index_cast %20 : i32 to index
      %c0_43 = arith.constant 0 : index
      %76 = memref.load %arg8[%75, %c0_43] : memref<8x8xi32, #tpu.memory_space<smem>>
      %77 = arith.index_cast %76 : i32 to index
      %c0_44 = arith.constant 0 : index
      %c0_45 = arith.constant 0 : index
      %78 = vector.load %arg12[%77, %c0_44, %c0_45] : memref<64x1x128xf32, #tpu.memory_space<vmem>>, vector<1x1x128xf32>
      %79 = vector.shape_cast %78 : vector<1x1x128xf32> to vector<1x128xf32>
      %80 = arith.index_cast %20 : i32 to index
      %c0_46 = arith.constant 0 : index
      %81 = memref.load %arg9[%80, %c0_46] : memref<8x8xi32, #tpu.memory_space<smem>>
      %82 = arith.index_cast %81 : i32 to index
      %c0_47 = arith.constant 0 : index
      %c0_48 = arith.constant 0 : index
      %83 = vector.load %arg12[%82, %c0_47, %c0_48] : memref<64x1x128xf32, #tpu.memory_space<vmem>>, vector<1x1x128xf32>
      %84 = vector.shape_cast %83 : vector<1x1x128xf32> to vector<1x128xf32>
      %85 = arith.addf %79, %84 : vector<1x128xf32>
      %86 = arith.index_cast %20 : i32 to index
      %c0_49 = arith.constant 0 : index
      %87 = memref.load %arg10[%86, %c0_49] : memref<8x8xi32, #tpu.memory_space<smem>>
      %88 = arith.index_cast %87 : i32 to index
      %c0_50 = arith.constant 0 : index
      %c0_51 = arith.constant 0 : index
      %89 = vector.load %arg13[%88, %c0_50, %c0_51] : memref<256x1x128xf32, #tpu.memory_space<vmem>>, vector<1x1x128xf32>
      %90 = vector.shape_cast %89 : vector<1x1x128xf32> to vector<1x128xf32>
      %91 = arith.addf %85, %90 : vector<1x128xf32>
      %92 = arith.addf %91, %74 : vector<1x128xf32>
      %93 = arith.index_cast %20 : i32 to index
      %c0_52 = arith.constant 0 : index
      %c0_53 = arith.constant 0 : index
      %94 = vector.load %arg19[%93, %c0_52, %c0_53] : memref<8x8x128xf32, #tpu.memory_space<vmem>>, vector<1x1x128xf32>
      %95 = vector.shape_cast %94 : vector<1x1x128xf32> to vector<1x128xf32>
      %96 = vector.shape_cast %92 : vector<1x128xf32> to vector<1x1x128xf32>
      tpu.vector_store %arg19[%93, %c0_52, %c0_53], %96 {strides = array<i32>} : memref<8x8x128xf32, #tpu.memory_space<vmem>>, vector<1x1x128xf32>,
      %97 = arith.index_cast %20 : i32 to index
      %c1_54 = arith.constant 1 : index
      %98 = memref.load %arg7[%97, %c1_54] : memref<8x8xf32, #tpu.memory_space<smem>>
      %99 = arith.subf %38, %98 : f32
      %100 = vector.broadcast %99 : f32 to vector<1x128xf32>
      %101 = arith.mulf %100, %0 : vector<1x128xf32>
      %102 = arith.addf %101, %1 : vector<1x128xf32>
      %103 = math.cos %102 : vector<1x128xf32>
      %104 = arith.index_cast %20 : i32 to index
      %c1_55 = arith.constant 1 : index
      %105 = memref.load %arg4[%104, %c1_55] : memref<8x8xi32, #tpu.memory_space<smem>>
      %106 = arith.index_cast %105 : i32 to index
      %c0_56 = arith.constant 0 : index
      %c0_57 = arith.constant 0 : index
      %107 = vector.load %arg12[%106, %c0_56, %c0_57] : memref<64x1x128xf32, #tpu.memory_space<vmem>>, vector<1x1x128xf32>
      %108 = vector.shape_cast %107 : vector<1x1x128xf32> to vector<1x128xf32>
      %109 = arith.index_cast %20 : i32 to index
      %c1_58 = arith.constant 1 : index
      %110 = memref.load %arg5[%109, %c1_58] : memref<8x8xi32, #tpu.memory_space<smem>>
      %111 = arith.index_cast %110 : i32 to index
      %c0_59 = arith.constant 0 : index
      %c0_60 = arith.constant 0 : index
      %112 = vector.load %arg12[%111, %c0_59, %c0_60] : memref<64x1x128xf32, #tpu.memory_space<vmem>>, vector<1x1x128xf32>
      %113 = vector.shape_cast %112 : vector<1x1x128xf32> to vector<1x128xf32>
      %114 = arith.addf %108, %113 : vector<1x128xf32>
      %115 = arith.index_cast %20 : i32 to index
      %c1_61 = arith.constant 1 : index
      %116 = memref.load %arg6[%115, %c1_61] : memref<8x8xi32, #tpu.memory_space<smem>>
      %117 = arith.index_cast %116 : i32 to index
      %c0_62 = arith.constant 0 : index
      %c0_63 = arith.constant 0 : index
      %118 = vector.load %arg13[%117, %c0_62, %c0_63] : memref<256x1x128xf32, #tpu.memory_space<vmem>>, vector<1x1x128xf32>
      %119 = vector.shape_cast %118 : vector<1x1x128xf32> to vector<1x128xf32>
      %120 = arith.addf %114, %119 : vector<1x128xf32>
      %121 = arith.addf %120, %103 : vector<1x128xf32>
      %122 = arith.index_cast %20 : i32 to index
      %c1_64 = arith.constant 1 : index
      %c0_65 = arith.constant 0 : index
      %123 = vector.load %arg18[%122, %c1_64, %c0_65] : memref<8x8x128xf32, #tpu.memory_space<vmem>>, vector<1x1x128xf32>
      %124 = vector.shape_cast %123 : vector<1x1x128xf32> to vector<1x128xf32>
      %125 = vector.shape_cast %121 : vector<1x128xf32> to vector<1x1x128xf32>
      tpu.vector_store %arg18[%122, %c1_64, %c0_65], %125 {strides = array<i32>} : memref<8x8x128xf32, #tpu.memory_space<vmem>>, vector<1x1x128xf32>,
      %126 = arith.index_cast %20 : i32 to index
      %c1_66 = arith.constant 1 : index
      %127 = memref.load %arg11[%126, %c1_66] : memref<8x8xf32, #tpu.memory_space<smem>>
      %128 = arith.subf %38, %127 : f32
      %129 = vector.broadcast %128 : f32 to vector<1x128xf32>
      %130 = arith.mulf %129, %0 : vector<1x128xf32>
      %131 = arith.addf %130, %1 : vector<1x128xf32>
      %132 = math.cos %131 : vector<1x128xf32>
      %133 = arith.index_cast %20 : i32 to index
      %c1_67 = arith.constant 1 : index
      %134 = memref.load %arg8[%133, %c1_67] : memref<8x8xi32, #tpu.memory_space<smem>>
      %135 = arith.index_cast %134 : i32 to index
      %c0_68 = arith.constant 0 : index
      %c0_69 = arith.constant 0 : index
      %136 = vector.load %arg12[%135, %c0_68, %c0_69] : memref<64x1x128xf32, #tpu.memory_space<vmem>>, vector<1x1x128xf32>
      %137 = vector.shape_cast %136 : vector<1x1x128xf32> to vector<1x128xf32>
      %138 = arith.index_cast %20 : i32 to index
      %c1_70 = arith.constant 1 : index
      %139 = memref.load %arg9[%138, %c1_70] : memref<8x8xi32, #tpu.memory_space<smem>>
      %140 = arith.index_cast %139 : i32 to index
      %c0_71 = arith.constant 0 : index
      %c0_72 = arith.constant 0 : index
      %141 = vector.load %arg12[%140, %c0_71, %c0_72] : memref<64x1x128xf32, #tpu.memory_space<vmem>>, vector<1x1x128xf32>
      %142 = vector.shape_cast %141 : vector<1x1x128xf32> to vector<1x128xf32>
      %143 = arith.addf %137, %142 : vector<1x128xf32>
      %144 = arith.index_cast %20 : i32 to index
      %c1_73 = arith.constant 1 : index
      %145 = memref.load %arg10[%144, %c1_73] : memref<8x8xi32, #tpu.memory_space<smem>>
      %146 = arith.index_cast %145 : i32 to index
      %c0_74 = arith.constant 0 : index
      %c0_75 = arith.constant 0 : index
      %147 = vector.load %arg13[%146, %c0_74, %c0_75] : memref<256x1x128xf32, #tpu.memory_space<vmem>>, vector<1x1x128xf32>
      %148 = vector.shape_cast %147 : vector<1x1x128xf32> to vector<1x128xf32>
      %149 = arith.addf %143, %148 : vector<1x128xf32>
      %150 = arith.addf %149, %132 : vector<1x128xf32>
      %151 = arith.index_cast %20 : i32 to index
      %c1_76 = arith.constant 1 : index
      %c0_77 = arith.constant 0 : index
      %152 = vector.load %arg19[%151, %c1_76, %c0_77] : memref<8x8x128xf32, #tpu.memory_space<vmem>>, vector<1x1x128xf32>
      %153 = vector.shape_cast %152 : vector<1x1x128xf32> to vector<1x128xf32>
      %154 = vector.shape_cast %150 : vector<1x128xf32> to vector<1x1x128xf32>
      tpu.vector_store %arg19[%151, %c1_76, %c0_77], %154 {strides = array<i32>} : memref<8x8x128xf32, #tpu.memory_space<vmem>>, vector<1x1x128xf32>,
      %155 = arith.index_cast %20 : i32 to index
      %c2 = arith.constant 2 : index
      %156 = memref.load %arg7[%155, %c2] : memref<8x8xf32, #tpu.memory_space<smem>>
      %157 = arith.subf %38, %156 : f32
      %158 = vector.broadcast %157 : f32 to vector<1x128xf32>
      %159 = arith.mulf %158, %0 : vector<1x128xf32>
      %160 = arith.addf %159, %1 : vector<1x128xf32>
      %161 = math.cos %160 : vector<1x128xf32>
      %162 = arith.index_cast %20 : i32 to index
      %c2_78 = arith.constant 2 : index
      %163 = memref.load %arg4[%162, %c2_78] : memref<8x8xi32, #tpu.memory_space<smem>>
      %164 = arith.index_cast %163 : i32 to index
      %c0_79 = arith.constant 0 : index
      %c0_80 = arith.constant 0 : index
      %165 = vector.load %arg12[%164, %c0_79, %c0_80] : memref<64x1x128xf32, #tpu.memory_space<vmem>>, vector<1x1x128xf32>
      %166 = vector.shape_cast %165 : vector<1x1x128xf32> to vector<1x128xf32>
      %167 = arith.index_cast %20 : i32 to index
      %c2_81 = arith.constant 2 : index
      %168 = memref.load %arg5[%167, %c2_81] : memref<8x8xi32, #tpu.memory_space<smem>>
      %169 = arith.index_cast %168 : i32 to index
      %c0_82 = arith.constant 0 : index
      %c0_83 = arith.constant 0 : index
      %170 = vector.load %arg12[%169, %c0_82, %c0_83] : memref<64x1x128xf32, #tpu.memory_space<vmem>>, vector<1x1x128xf32>
      %171 = vector.shape_cast %170 : vector<1x1x128xf32> to vector<1x128xf32>
      %172 = arith.addf %166, %171 : vector<1x128xf32>
      %173 = arith.index_cast %20 : i32 to index
      %c2_84 = arith.constant 2 : index
      %174 = memref.load %arg6[%173, %c2_84] : memref<8x8xi32, #tpu.memory_space<smem>>
      %175 = arith.index_cast %174 : i32 to index
      %c0_85 = arith.constant 0 : index
      %c0_86 = arith.constant 0 : index
      %176 = vector.load %arg13[%175, %c0_85, %c0_86] : memref<256x1x128xf32, #tpu.memory_space<vmem>>, vector<1x1x128xf32>
      %177 = vector.shape_cast %176 : vector<1x1x128xf32> to vector<1x128xf32>
      %178 = arith.addf %172, %177 : vector<1x128xf32>
      %179 = arith.addf %178, %161 : vector<1x128xf32>
      %180 = arith.index_cast %20 : i32 to index
      %c2_87 = arith.constant 2 : index
      %c0_88 = arith.constant 0 : index
      %181 = vector.load %arg18[%180, %c2_87, %c0_88] : memref<8x8x128xf32, #tpu.memory_space<vmem>>, vector<1x1x128xf32>
      %182 = vector.shape_cast %181 : vector<1x1x128xf32> to vector<1x128xf32>
      %183 = vector.shape_cast %179 : vector<1x128xf32> to vector<1x1x128xf32>
      tpu.vector_store %arg18[%180, %c2_87, %c0_88], %183 {strides = array<i32>} : memref<8x8x128xf32, #tpu.memory_space<vmem>>, vector<1x1x128xf32>,
      %184 = arith.index_cast %20 : i32 to index
      %c2_89 = arith.constant 2 : index
      %185 = memref.load %arg11[%184, %c2_89] : memref<8x8xf32, #tpu.memory_space<smem>>
      %186 = arith.subf %38, %185 : f32
      %187 = vector.broadcast %186 : f32 to vector<1x128xf32>
      %188 = arith.mulf %187, %0 : vector<1x128xf32>
      %189 = arith.addf %188, %1 : vector<1x128xf32>
      %190 = math.cos %189 : vector<1x128xf32>
      %191 = arith.index_cast %20 : i32 to index
      %c2_90 = arith.constant 2 : index
      %192 = memref.load %arg8[%191, %c2_90] : memref<8x8xi32, #tpu.memory_space<smem>>
      %193 = arith.index_cast %192 : i32 to index
      %c0_91 = arith.constant 0 : index
      %c0_92 = arith.constant 0 : index
      %194 = vector.load %arg12[%193, %c0_91, %c0_92] : memref<64x1x128xf32, #tpu.memory_space<vmem>>, vector<1x1x128xf32>
      %195 = vector.shape_cast %194 : vector<1x1x128xf32> to vector<1x128xf32>
      %196 = arith.index_cast %20 : i32 to index
      %c2_93 = arith.constant 2 : index
      %197 = memref.load %arg9[%196, %c2_93] : memref<8x8xi32, #tpu.memory_space<smem>>
      %198 = arith.index_cast %197 : i32 to index
      %c0_94 = arith.constant 0 : index
      %c0_95 = arith.constant 0 : index
      %199 = vector.load %arg12[%198, %c0_94, %c0_95] : memref<64x1x128xf32, #tpu.memory_space<vmem>>, vector<1x1x128xf32>
      %200 = vector.shape_cast %199 : vector<1x1x128xf32> to vector<1x128xf32>
      %201 = arith.addf %195, %200 : vector<1x128xf32>
      %202 = arith.index_cast %20 : i32 to index
      %c2_96 = arith.constant 2 : index
      %203 = memref.load %arg10[%202, %c2_96] : memref<8x8xi32, #tpu.memory_space<smem>>
      %204 = arith.index_cast %203 : i32 to index
      %c0_97 = arith.constant 0 : index
      %c0_98 = arith.constant 0 : index
      %205 = vector.load %arg13[%204, %c0_97, %c0_98] : memref<256x1x128xf32, #tpu.memory_space<vmem>>, vector<1x1x128xf32>
      %206 = vector.shape_cast %205 : vector<1x1x128xf32> to vector<1x128xf32>
      %207 = arith.addf %201, %206 : vector<1x128xf32>
      %208 = arith.addf %207, %190 : vector<1x128xf32>
      %209 = arith.index_cast %20 : i32 to index
      %c2_99 = arith.constant 2 : index
      %c0_100 = arith.constant 0 : index
      %210 = vector.load %arg19[%209, %c2_99, %c0_100] : memref<8x8x128xf32, #tpu.memory_space<vmem>>, vector<1x1x128xf32>
      %211 = vector.shape_cast %210 : vector<1x1x128xf32> to vector<1x128xf32>
      %212 = vector.shape_cast %208 : vector<1x128xf32> to vector<1x1x128xf32>
      tpu.vector_store %arg19[%209, %c2_99, %c0_100], %212 {strides = array<i32>} : memref<8x8x128xf32, #tpu.memory_space<vmem>>, vector<1x1x128xf32>,
      %213 = arith.index_cast %20 : i32 to index
      %c3 = arith.constant 3 : index
      %214 = memref.load %arg7[%213, %c3] : memref<8x8xf32, #tpu.memory_space<smem>>
      %215 = arith.subf %38, %214 : f32
      %216 = vector.broadcast %215 : f32 to vector<1x128xf32>
      %217 = arith.mulf %216, %0 : vector<1x128xf32>
      %218 = arith.addf %217, %1 : vector<1x128xf32>
      %219 = math.cos %218 : vector<1x128xf32>
      %220 = arith.index_cast %20 : i32 to index
      %c3_101 = arith.constant 3 : index
      %221 = memref.load %arg4[%220, %c3_101] : memref<8x8xi32, #tpu.memory_space<smem>>
      %222 = arith.index_cast %221 : i32 to index
      %c0_102 = arith.constant 0 : index
      %c0_103 = arith.constant 0 : index
      %223 = vector.load %arg12[%222, %c0_102, %c0_103] : memref<64x1x128xf32, #tpu.memory_space<vmem>>, vector<1x1x128xf32>
      %224 = vector.shape_cast %223 : vector<1x1x128xf32> to vector<1x128xf32>
      %225 = arith.index_cast %20 : i32 to index
      %c3_104 = arith.constant 3 : index
      %226 = memref.load %arg5[%225, %c3_104] : memref<8x8xi32, #tpu.memory_space<smem>>
      %227 = arith.index_cast %226 : i32 to index
      %c0_105 = arith.constant 0 : index
      %c0_106 = arith.constant 0 : index
      %228 = vector.load %arg12[%227, %c0_105, %c0_106] : memref<64x1x128xf32, #tpu.memory_space<vmem>>, vector<1x1x128xf32>
      %229 = vector.shape_cast %228 : vector<1x1x128xf32> to vector<1x128xf32>
      %230 = arith.addf %224, %229 : vector<1x128xf32>
      %231 = arith.index_cast %20 : i32 to index
      %c3_107 = arith.constant 3 : index
      %232 = memref.load %arg6[%231, %c3_107] : memref<8x8xi32, #tpu.memory_space<smem>>
      %233 = arith.index_cast %232 : i32 to index
      %c0_108 = arith.constant 0 : index
      %c0_109 = arith.constant 0 : index
      %234 = vector.load %arg13[%233, %c0_108, %c0_109] : memref<256x1x128xf32, #tpu.memory_space<vmem>>, vector<1x1x128xf32>
      %235 = vector.shape_cast %234 : vector<1x1x128xf32> to vector<1x128xf32>
      %236 = arith.addf %230, %235 : vector<1x128xf32>
      %237 = arith.addf %236, %219 : vector<1x128xf32>
      %238 = arith.index_cast %20 : i32 to index
      %c3_110 = arith.constant 3 : index
      %c0_111 = arith.constant 0 : index
      %239 = vector.load %arg18[%238, %c3_110, %c0_111] : memref<8x8x128xf32, #tpu.memory_space<vmem>>, vector<1x1x128xf32>
      %240 = vector.shape_cast %239 : vector<1x1x128xf32> to vector<1x128xf32>
      %241 = vector.shape_cast %237 : vector<1x128xf32> to vector<1x1x128xf32>
      tpu.vector_store %arg18[%238, %c3_110, %c0_111], %241 {strides = array<i32>} : memref<8x8x128xf32, #tpu.memory_space<vmem>>, vector<1x1x128xf32>,
      %242 = arith.index_cast %20 : i32 to index
      %c3_112 = arith.constant 3 : index
      %243 = memref.load %arg11[%242, %c3_112] : memref<8x8xf32, #tpu.memory_space<smem>>
      %244 = arith.subf %38, %243 : f32
      %245 = vector.broadcast %244 : f32 to vector<1x128xf32>
      %246 = arith.mulf %245, %0 : vector<1x128xf32>
      %247 = arith.addf %246, %1 : vector<1x128xf32>
      %248 = math.cos %247 : vector<1x128xf32>
      %249 = arith.index_cast %20 : i32 to index
      %c3_113 = arith.constant 3 : index
      %250 = memref.load %arg8[%249, %c3_113] : memref<8x8xi32, #tpu.memory_space<smem>>
      %251 = arith.index_cast %250 : i32 to index
      %c0_114 = arith.constant 0 : index
      %c0_115 = arith.constant 0 : index
      %252 = vector.load %arg12[%251, %c0_114, %c0_115] : memref<64x1x128xf32, #tpu.memory_space<vmem>>, vector<1x1x128xf32>
      %253 = vector.shape_cast %252 : vector<1x1x128xf32> to vector<1x128xf32>
      %254 = arith.index_cast %20 : i32 to index
      %c3_116 = arith.constant 3 : index
      %255 = memref.load %arg9[%254, %c3_116] : memref<8x8xi32, #tpu.memory_space<smem>>
      %256 = arith.index_cast %255 : i32 to index
      %c0_117 = arith.constant 0 : index
      %c0_118 = arith.constant 0 : index
      %257 = vector.load %arg12[%256, %c0_117, %c0_118] : memref<64x1x128xf32, #tpu.memory_space<vmem>>, vector<1x1x128xf32>
      %258 = vector.shape_cast %257 : vector<1x1x128xf32> to vector<1x128xf32>
      %259 = arith.addf %253, %258 : vector<1x128xf32>
      %260 = arith.index_cast %20 : i32 to index
      %c3_119 = arith.constant 3 : index
      %261 = memref.load %arg10[%260, %c3_119] : memref<8x8xi32, #tpu.memory_space<smem>>
      %262 = arith.index_cast %261 : i32 to index
      %c0_120 = arith.constant 0 : index
      %c0_121 = arith.constant 0 : index
      %263 = vector.load %arg13[%262, %c0_120, %c0_121] : memref<256x1x128xf32, #tpu.memory_space<vmem>>, vector<1x1x128xf32>
      %264 = vector.shape_cast %263 : vector<1x1x128xf32> to vector<1x128xf32>
      %265 = arith.addf %259, %264 : vector<1x128xf32>
      %266 = arith.addf %265, %248 : vector<1x128xf32>
      %267 = arith.index_cast %20 : i32 to index
      %c3_122 = arith.constant 3 : index
      %c0_123 = arith.constant 0 : index
      %268 = vector.load %arg19[%267, %c3_122, %c0_123] : memref<8x8x128xf32, #tpu.memory_space<vmem>>, vector<1x1x128xf32>
      %269 = vector.shape_cast %268 : vector<1x1x128xf32> to vector<1x128xf32>
      %270 = vector.shape_cast %266 : vector<1x128xf32> to vector<1x1x128xf32>
      tpu.vector_store %arg19[%267, %c3_122, %c0_123], %270 {strides = array<i32>} : memref<8x8x128xf32, #tpu.memory_space<vmem>>, vector<1x1x128xf32>,
      %271 = arith.index_cast %20 : i32 to index
      %c4 = arith.constant 4 : index
      %272 = memref.load %arg7[%271, %c4] : memref<8x8xf32, #tpu.memory_space<smem>>
      %273 = arith.subf %38, %272 : f32
      %274 = vector.broadcast %273 : f32 to vector<1x128xf32>
      %275 = arith.mulf %274, %0 : vector<1x128xf32>
      %276 = arith.addf %275, %1 : vector<1x128xf32>
      %277 = math.cos %276 : vector<1x128xf32>
      %278 = arith.index_cast %20 : i32 to index
      %c4_124 = arith.constant 4 : index
      %279 = memref.load %arg4[%278, %c4_124] : memref<8x8xi32, #tpu.memory_space<smem>>
      %280 = arith.index_cast %279 : i32 to index
      %c0_125 = arith.constant 0 : index
      %c0_126 = arith.constant 0 : index
      %281 = vector.load %arg12[%280, %c0_125, %c0_126] : memref<64x1x128xf32, #tpu.memory_space<vmem>>, vector<1x1x128xf32>
      %282 = vector.shape_cast %281 : vector<1x1x128xf32> to vector<1x128xf32>
      %283 = arith.index_cast %20 : i32 to index
      %c4_127 = arith.constant 4 : index
      %284 = memref.load %arg5[%283, %c4_127] : memref<8x8xi32, #tpu.memory_space<smem>>
      %285 = arith.index_cast %284 : i32 to index
      %c0_128 = arith.constant 0 : index
      %c0_129 = arith.constant 0 : index
      %286 = vector.load %arg12[%285, %c0_128, %c0_129] : memref<64x1x128xf32, #tpu.memory_space<vmem>>, vector<1x1x128xf32>
      %287 = vector.shape_cast %286 : vector<1x1x128xf32> to vector<1x128xf32>
      %288 = arith.addf %282, %287 : vector<1x128xf32>
      %289 = arith.index_cast %20 : i32 to index
      %c4_130 = arith.constant 4 : index
      %290 = memref.load %arg6[%289, %c4_130] : memref<8x8xi32, #tpu.memory_space<smem>>
      %291 = arith.index_cast %290 : i32 to index
      %c0_131 = arith.constant 0 : index
      %c0_132 = arith.constant 0 : index
      %292 = vector.load %arg13[%291, %c0_131, %c0_132] : memref<256x1x128xf32, #tpu.memory_space<vmem>>, vector<1x1x128xf32>
      %293 = vector.shape_cast %292 : vector<1x1x128xf32> to vector<1x128xf32>
      %294 = arith.addf %288, %293 : vector<1x128xf32>
      %295 = arith.addf %294, %277 : vector<1x128xf32>
      %296 = arith.index_cast %20 : i32 to index
      %c4_133 = arith.constant 4 : index
      %c0_134 = arith.constant 0 : index
      %297 = vector.load %arg18[%296, %c4_133, %c0_134] : memref<8x8x128xf32, #tpu.memory_space<vmem>>, vector<1x1x128xf32>
      %298 = vector.shape_cast %297 : vector<1x1x128xf32> to vector<1x128xf32>
      %299 = vector.shape_cast %295 : vector<1x128xf32> to vector<1x1x128xf32>
      tpu.vector_store %arg18[%296, %c4_133, %c0_134], %299 {strides = array<i32>} : memref<8x8x128xf32, #tpu.memory_space<vmem>>, vector<1x1x128xf32>,
      %300 = arith.index_cast %20 : i32 to index
      %c4_135 = arith.constant 4 : index
      %301 = memref.load %arg11[%300, %c4_135] : memref<8x8xf32, #tpu.memory_space<smem>>
      %302 = arith.subf %38, %301 : f32
      %303 = vector.broadcast %302 : f32 to vector<1x128xf32>
      %304 = arith.mulf %303, %0 : vector<1x128xf32>
      %305 = arith.addf %304, %1 : vector<1x128xf32>
      %306 = math.cos %305 : vector<1x128xf32>
      %307 = arith.index_cast %20 : i32 to index
      %c4_136 = arith.constant 4 : index
      %308 = memref.load %arg8[%307, %c4_136] : memref<8x8xi32, #tpu.memory_space<smem>>
      %309 = arith.index_cast %308 : i32 to index
      %c0_137 = arith.constant 0 : index
      %c0_138 = arith.constant 0 : index
      %310 = vector.load %arg12[%309, %c0_137, %c0_138] : memref<64x1x128xf32, #tpu.memory_space<vmem>>, vector<1x1x128xf32>
      %311 = vector.shape_cast %310 : vector<1x1x128xf32> to vector<1x128xf32>
      %312 = arith.index_cast %20 : i32 to index
      %c4_139 = arith.constant 4 : index
      %313 = memref.load %arg9[%312, %c4_139] : memref<8x8xi32, #tpu.memory_space<smem>>
      %314 = arith.index_cast %313 : i32 to index
      %c0_140 = arith.constant 0 : index
      %c0_141 = arith.constant 0 : index
      %315 = vector.load %arg12[%314, %c0_140, %c0_141] : memref<64x1x128xf32, #tpu.memory_space<vmem>>, vector<1x1x128xf32>
      %316 = vector.shape_cast %315 : vector<1x1x128xf32> to vector<1x128xf32>
      %317 = arith.addf %311, %316 : vector<1x128xf32>
      %318 = arith.index_cast %20 : i32 to index
      %c4_142 = arith.constant 4 : index
      %319 = memref.load %arg10[%318, %c4_142] : memref<8x8xi32, #tpu.memory_space<smem>>
      %320 = arith.index_cast %319 : i32 to index
      %c0_143 = arith.constant 0 : index
      %c0_144 = arith.constant 0 : index
      %321 = vector.load %arg13[%320, %c0_143, %c0_144] : memref<256x1x128xf32, #tpu.memory_space<vmem>>, vector<1x1x128xf32>
      %322 = vector.shape_cast %321 : vector<1x1x128xf32> to vector<1x128xf32>
      %323 = arith.addf %317, %322 : vector<1x128xf32>
      %324 = arith.addf %323, %306 : vector<1x128xf32>
      %325 = arith.index_cast %20 : i32 to index
      %c4_145 = arith.constant 4 : index
      %c0_146 = arith.constant 0 : index
      %326 = vector.load %arg19[%325, %c4_145, %c0_146] : memref<8x8x128xf32, #tpu.memory_space<vmem>>, vector<1x1x128xf32>
      %327 = vector.shape_cast %326 : vector<1x1x128xf32> to vector<1x128xf32>
      %328 = vector.shape_cast %324 : vector<1x128xf32> to vector<1x1x128xf32>
      tpu.vector_store %arg19[%325, %c4_145, %c0_146], %328 {strides = array<i32>} : memref<8x8x128xf32, #tpu.memory_space<vmem>>, vector<1x1x128xf32>,
      %329 = arith.index_cast %20 : i32 to index
      %c5 = arith.constant 5 : index
      %330 = memref.load %arg7[%329, %c5] : memref<8x8xf32, #tpu.memory_space<smem>>
      %331 = arith.subf %38, %330 : f32
      %332 = vector.broadcast %331 : f32 to vector<1x128xf32>
      %333 = arith.mulf %332, %0 : vector<1x128xf32>
      %334 = arith.addf %333, %1 : vector<1x128xf32>
      %335 = math.cos %334 : vector<1x128xf32>
      %336 = arith.index_cast %20 : i32 to index
      %c5_147 = arith.constant 5 : index
      %337 = memref.load %arg4[%336, %c5_147] : memref<8x8xi32, #tpu.memory_space<smem>>
      %338 = arith.index_cast %337 : i32 to index
      %c0_148 = arith.constant 0 : index
      %c0_149 = arith.constant 0 : index
      %339 = vector.load %arg12[%338, %c0_148, %c0_149] : memref<64x1x128xf32, #tpu.memory_space<vmem>>, vector<1x1x128xf32>
      %340 = vector.shape_cast %339 : vector<1x1x128xf32> to vector<1x128xf32>
      %341 = arith.index_cast %20 : i32 to index
      %c5_150 = arith.constant 5 : index
      %342 = memref.load %arg5[%341, %c5_150] : memref<8x8xi32, #tpu.memory_space<smem>>
      %343 = arith.index_cast %342 : i32 to index
      %c0_151 = arith.constant 0 : index
      %c0_152 = arith.constant 0 : index
      %344 = vector.load %arg12[%343, %c0_151, %c0_152] : memref<64x1x128xf32, #tpu.memory_space<vmem>>, vector<1x1x128xf32>
      %345 = vector.shape_cast %344 : vector<1x1x128xf32> to vector<1x128xf32>
      %346 = arith.addf %340, %345 : vector<1x128xf32>
      %347 = arith.index_cast %20 : i32 to index
      %c5_153 = arith.constant 5 : index
      %348 = memref.load %arg6[%347, %c5_153] : memref<8x8xi32, #tpu.memory_space<smem>>
      %349 = arith.index_cast %348 : i32 to index
      %c0_154 = arith.constant 0 : index
      %c0_155 = arith.constant 0 : index
      %350 = vector.load %arg13[%349, %c0_154, %c0_155] : memref<256x1x128xf32, #tpu.memory_space<vmem>>, vector<1x1x128xf32>
      %351 = vector.shape_cast %350 : vector<1x1x128xf32> to vector<1x128xf32>
      %352 = arith.addf %346, %351 : vector<1x128xf32>
      %353 = arith.addf %352, %335 : vector<1x128xf32>
      %354 = arith.index_cast %20 : i32 to index
      %c5_156 = arith.constant 5 : index
      %c0_157 = arith.constant 0 : index
      %355 = vector.load %arg18[%354, %c5_156, %c0_157] : memref<8x8x128xf32, #tpu.memory_space<vmem>>, vector<1x1x128xf32>
      %356 = vector.shape_cast %355 : vector<1x1x128xf32> to vector<1x128xf32>
      %357 = vector.shape_cast %353 : vector<1x128xf32> to vector<1x1x128xf32>
      tpu.vector_store %arg18[%354, %c5_156, %c0_157], %357 {strides = array<i32>} : memref<8x8x128xf32, #tpu.memory_space<vmem>>, vector<1x1x128xf32>,
      %358 = arith.index_cast %20 : i32 to index
      %c5_158 = arith.constant 5 : index
      %359 = memref.load %arg11[%358, %c5_158] : memref<8x8xf32, #tpu.memory_space<smem>>
      %360 = arith.subf %38, %359 : f32
      %361 = vector.broadcast %360 : f32 to vector<1x128xf32>
      %362 = arith.mulf %361, %0 : vector<1x128xf32>
      %363 = arith.addf %362, %1 : vector<1x128xf32>
      %364 = math.cos %363 : vector<1x128xf32>
      %365 = arith.index_cast %20 : i32 to index
      %c5_159 = arith.constant 5 : index
      %366 = memref.load %arg8[%365, %c5_159] : memref<8x8xi32, #tpu.memory_space<smem>>
      %367 = arith.index_cast %366 : i32 to index
      %c0_160 = arith.constant 0 : index
      %c0_161 = arith.constant 0 : index
      %368 = vector.load %arg12[%367, %c0_160, %c0_161] : memref<64x1x128xf32, #tpu.memory_space<vmem>>, vector<1x1x128xf32>
      %369 = vector.shape_cast %368 : vector<1x1x128xf32> to vector<1x128xf32>
      %370 = arith.index_cast %20 : i32 to index
      %c5_162 = arith.constant 5 : index
      %371 = memref.load %arg9[%370, %c5_162] : memref<8x8xi32, #tpu.memory_space<smem>>
      %372 = arith.index_cast %371 : i32 to index
      %c0_163 = arith.constant 0 : index
      %c0_164 = arith.constant 0 : index
      %373 = vector.load %arg12[%372, %c0_163, %c0_164] : memref<64x1x128xf32, #tpu.memory_space<vmem>>, vector<1x1x128xf32>
      %374 = vector.shape_cast %373 : vector<1x1x128xf32> to vector<1x128xf32>
      %375 = arith.addf %369, %374 : vector<1x128xf32>
      %376 = arith.index_cast %20 : i32 to index
      %c5_165 = arith.constant 5 : index
      %377 = memref.load %arg10[%376, %c5_165] : memref<8x8xi32, #tpu.memory_space<smem>>
      %378 = arith.index_cast %377 : i32 to index
      %c0_166 = arith.constant 0 : index
      %c0_167 = arith.constant 0 : index
      %379 = vector.load %arg13[%378, %c0_166, %c0_167] : memref<256x1x128xf32, #tpu.memory_space<vmem>>, vector<1x1x128xf32>
      %380 = vector.shape_cast %379 : vector<1x1x128xf32> to vector<1x128xf32>
      %381 = arith.addf %375, %380 : vector<1x128xf32>
      %382 = arith.addf %381, %364 : vector<1x128xf32>
      %383 = arith.index_cast %20 : i32 to index
      %c5_168 = arith.constant 5 : index
      %c0_169 = arith.constant 0 : index
      %384 = vector.load %arg19[%383, %c5_168, %c0_169] : memref<8x8x128xf32, #tpu.memory_space<vmem>>, vector<1x1x128xf32>
      %385 = vector.shape_cast %384 : vector<1x1x128xf32> to vector<1x128xf32>
      %386 = vector.shape_cast %382 : vector<1x128xf32> to vector<1x1x128xf32>
      tpu.vector_store %arg19[%383, %c5_168, %c0_169], %386 {strides = array<i32>} : memref<8x8x128xf32, #tpu.memory_space<vmem>>, vector<1x1x128xf32>,
      %387 = arith.index_cast %20 : i32 to index
      %c6 = arith.constant 6 : index
      %388 = memref.load %arg7[%387, %c6] : memref<8x8xf32, #tpu.memory_space<smem>>
      %389 = arith.subf %38, %388 : f32
      %390 = vector.broadcast %389 : f32 to vector<1x128xf32>
      %391 = arith.mulf %390, %0 : vector<1x128xf32>
      %392 = arith.addf %391, %1 : vector<1x128xf32>
      %393 = math.cos %392 : vector<1x128xf32>
      %394 = arith.index_cast %20 : i32 to index
      %c6_170 = arith.constant 6 : index
      %395 = memref.load %arg4[%394, %c6_170] : memref<8x8xi32, #tpu.memory_space<smem>>
      %396 = arith.index_cast %395 : i32 to index
      %c0_171 = arith.constant 0 : index
      %c0_172 = arith.constant 0 : index
      %397 = vector.load %arg12[%396, %c0_171, %c0_172] : memref<64x1x128xf32, #tpu.memory_space<vmem>>, vector<1x1x128xf32>
      %398 = vector.shape_cast %397 : vector<1x1x128xf32> to vector<1x128xf32>
      %399 = arith.index_cast %20 : i32 to index
      %c6_173 = arith.constant 6 : index
      %400 = memref.load %arg5[%399, %c6_173] : memref<8x8xi32, #tpu.memory_space<smem>>
      %401 = arith.index_cast %400 : i32 to index
      %c0_174 = arith.constant 0 : index
      %c0_175 = arith.constant 0 : index
      %402 = vector.load %arg12[%401, %c0_174, %c0_175] : memref<64x1x128xf32, #tpu.memory_space<vmem>>, vector<1x1x128xf32>
      %403 = vector.shape_cast %402 : vector<1x1x128xf32> to vector<1x128xf32>
      %404 = arith.addf %398, %403 : vector<1x128xf32>
      %405 = arith.index_cast %20 : i32 to index
      %c6_176 = arith.constant 6 : index
      %406 = memref.load %arg6[%405, %c6_176] : memref<8x8xi32, #tpu.memory_space<smem>>
      %407 = arith.index_cast %406 : i32 to index
      %c0_177 = arith.constant 0 : index
      %c0_178 = arith.constant 0 : index
      %408 = vector.load %arg13[%407, %c0_177, %c0_178] : memref<256x1x128xf32, #tpu.memory_space<vmem>>, vector<1x1x128xf32>
      %409 = vector.shape_cast %408 : vector<1x1x128xf32> to vector<1x128xf32>
      %410 = arith.addf %404, %409 : vector<1x128xf32>
      %411 = arith.addf %410, %393 : vector<1x128xf32>
      %412 = arith.index_cast %20 : i32 to index
      %c6_179 = arith.constant 6 : index
      %c0_180 = arith.constant 0 : index
      %413 = vector.load %arg18[%412, %c6_179, %c0_180] : memref<8x8x128xf32, #tpu.memory_space<vmem>>, vector<1x1x128xf32>
      %414 = vector.shape_cast %413 : vector<1x1x128xf32> to vector<1x128xf32>
      %415 = vector.shape_cast %411 : vector<1x128xf32> to vector<1x1x128xf32>
      tpu.vector_store %arg18[%412, %c6_179, %c0_180], %415 {strides = array<i32>} : memref<8x8x128xf32, #tpu.memory_space<vmem>>, vector<1x1x128xf32>,
      %416 = arith.index_cast %20 : i32 to index
      %c6_181 = arith.constant 6 : index
      %417 = memref.load %arg11[%416, %c6_181] : memref<8x8xf32, #tpu.memory_space<smem>>
      %418 = arith.subf %38, %417 : f32
      %419 = vector.broadcast %418 : f32 to vector<1x128xf32>
      %420 = arith.mulf %419, %0 : vector<1x128xf32>
      %421 = arith.addf %420, %1 : vector<1x128xf32>
      %422 = math.cos %421 : vector<1x128xf32>
      %423 = arith.index_cast %20 : i32 to index
      %c6_182 = arith.constant 6 : index
      %424 = memref.load %arg8[%423, %c6_182] : memref<8x8xi32, #tpu.memory_space<smem>>
      %425 = arith.index_cast %424 : i32 to index
      %c0_183 = arith.constant 0 : index
      %c0_184 = arith.constant 0 : index
      %426 = vector.load %arg12[%425, %c0_183, %c0_184] : memref<64x1x128xf32, #tpu.memory_space<vmem>>, vector<1x1x128xf32>
      %427 = vector.shape_cast %426 : vector<1x1x128xf32> to vector<1x128xf32>
      %428 = arith.index_cast %20 : i32 to index
      %c6_185 = arith.constant 6 : index
      %429 = memref.load %arg9[%428, %c6_185] : memref<8x8xi32, #tpu.memory_space<smem>>
      %430 = arith.index_cast %429 : i32 to index
      %c0_186 = arith.constant 0 : index
      %c0_187 = arith.constant 0 : index
      %431 = vector.load %arg12[%430, %c0_186, %c0_187] : memref<64x1x128xf32, #tpu.memory_space<vmem>>, vector<1x1x128xf32>
      %432 = vector.shape_cast %431 : vector<1x1x128xf32> to vector<1x128xf32>
      %433 = arith.addf %427, %432 : vector<1x128xf32>
      %434 = arith.index_cast %20 : i32 to index
      %c6_188 = arith.constant 6 : index
      %435 = memref.load %arg10[%434, %c6_188] : memref<8x8xi32, #tpu.memory_space<smem>>
      %436 = arith.index_cast %435 : i32 to index
      %c0_189 = arith.constant 0 : index
      %c0_190 = arith.constant 0 : index
      %437 = vector.load %arg13[%436, %c0_189, %c0_190] : memref<256x1x128xf32, #tpu.memory_space<vmem>>, vector<1x1x128xf32>
      %438 = vector.shape_cast %437 : vector<1x1x128xf32> to vector<1x128xf32>
      %439 = arith.addf %433, %438 : vector<1x128xf32>
      %440 = arith.addf %439, %422 : vector<1x128xf32>
      %441 = arith.index_cast %20 : i32 to index
      %c6_191 = arith.constant 6 : index
      %c0_192 = arith.constant 0 : index
      %442 = vector.load %arg19[%441, %c6_191, %c0_192] : memref<8x8x128xf32, #tpu.memory_space<vmem>>, vector<1x1x128xf32>
      %443 = vector.shape_cast %442 : vector<1x1x128xf32> to vector<1x128xf32>
      %444 = vector.shape_cast %440 : vector<1x128xf32> to vector<1x1x128xf32>
      tpu.vector_store %arg19[%441, %c6_191, %c0_192], %444 {strides = array<i32>} : memref<8x8x128xf32, #tpu.memory_space<vmem>>, vector<1x1x128xf32>,
      %445 = arith.index_cast %20 : i32 to index
      %c7 = arith.constant 7 : index
      %446 = memref.load %arg7[%445, %c7] : memref<8x8xf32, #tpu.memory_space<smem>>
      %447 = arith.subf %38, %446 : f32
      %448 = vector.broadcast %447 : f32 to vector<1x128xf32>
      %449 = arith.mulf %448, %0 : vector<1x128xf32>
      %450 = arith.addf %449, %1 : vector<1x128xf32>
      %451 = math.cos %450 : vector<1x128xf32>
      %452 = arith.index_cast %20 : i32 to index
      %c7_193 = arith.constant 7 : index
      %453 = memref.load %arg4[%452, %c7_193] : memref<8x8xi32, #tpu.memory_space<smem>>
      %454 = arith.index_cast %453 : i32 to index
      %c0_194 = arith.constant 0 : index
      %c0_195 = arith.constant 0 : index
      %455 = vector.load %arg12[%454, %c0_194, %c0_195] : memref<64x1x128xf32, #tpu.memory_space<vmem>>, vector<1x1x128xf32>
      %456 = vector.shape_cast %455 : vector<1x1x128xf32> to vector<1x128xf32>
      %457 = arith.index_cast %20 : i32 to index
      %c7_196 = arith.constant 7 : index
      %458 = memref.load %arg5[%457, %c7_196] : memref<8x8xi32, #tpu.memory_space<smem>>
      %459 = arith.index_cast %458 : i32 to index
      %c0_197 = arith.constant 0 : index
      %c0_198 = arith.constant 0 : index
      %460 = vector.load %arg12[%459, %c0_197, %c0_198] : memref<64x1x128xf32, #tpu.memory_space<vmem>>, vector<1x1x128xf32>
      %461 = vector.shape_cast %460 : vector<1x1x128xf32> to vector<1x128xf32>
      %462 = arith.addf %456, %461 : vector<1x128xf32>
      %463 = arith.index_cast %20 : i32 to index
      %c7_199 = arith.constant 7 : index
      %464 = memref.load %arg6[%463, %c7_199] : memref<8x8xi32, #tpu.memory_space<smem>>
      %465 = arith.index_cast %464 : i32 to index
      %c0_200 = arith.constant 0 : index
      %c0_201 = arith.constant 0 : index
      %466 = vector.load %arg13[%465, %c0_200, %c0_201] : memref<256x1x128xf32, #tpu.memory_space<vmem>>, vector<1x1x128xf32>
      %467 = vector.shape_cast %466 : vector<1x1x128xf32> to vector<1x128xf32>
      %468 = arith.addf %462, %467 : vector<1x128xf32>
      %469 = arith.addf %468, %451 : vector<1x128xf32>
      %470 = arith.index_cast %20 : i32 to index
      %c7_202 = arith.constant 7 : index
      %c0_203 = arith.constant 0 : index
      %471 = vector.load %arg18[%470, %c7_202, %c0_203] : memref<8x8x128xf32, #tpu.memory_space<vmem>>, vector<1x1x128xf32>
      %472 = vector.shape_cast %471 : vector<1x1x128xf32> to vector<1x128xf32>
      %473 = vector.shape_cast %469 : vector<1x128xf32> to vector<1x1x128xf32>
      tpu.vector_store %arg18[%470, %c7_202, %c0_203], %473 {strides = array<i32>} : memref<8x8x128xf32, #tpu.memory_space<vmem>>, vector<1x1x128xf32>,
      %474 = arith.index_cast %20 : i32 to index
      %c7_204 = arith.constant 7 : index
      %475 = memref.load %arg11[%474, %c7_204] : memref<8x8xf32, #tpu.memory_space<smem>>
      %476 = arith.subf %38, %475 : f32
      %477 = vector.broadcast %476 : f32 to vector<1x128xf32>
      %478 = arith.mulf %477, %0 : vector<1x128xf32>
      %479 = arith.addf %478, %1 : vector<1x128xf32>
      %480 = math.cos %479 : vector<1x128xf32>
      %481 = arith.index_cast %20 : i32 to index
      %c7_205 = arith.constant 7 : index
      %482 = memref.load %arg8[%481, %c7_205] : memref<8x8xi32, #tpu.memory_space<smem>>
      %483 = arith.index_cast %482 : i32 to index
      %c0_206 = arith.constant 0 : index
      %c0_207 = arith.constant 0 : index
      %484 = vector.load %arg12[%483, %c0_206, %c0_207] : memref<64x1x128xf32, #tpu.memory_space<vmem>>, vector<1x1x128xf32>
      %485 = vector.shape_cast %484 : vector<1x1x128xf32> to vector<1x128xf32>
      %486 = arith.index_cast %20 : i32 to index
      %c7_208 = arith.constant 7 : index
      %487 = memref.load %arg9[%486, %c7_208] : memref<8x8xi32, #tpu.memory_space<smem>>
      %488 = arith.index_cast %487 : i32 to index
      %c0_209 = arith.constant 0 : index
      %c0_210 = arith.constant 0 : index
      %489 = vector.load %arg12[%488, %c0_209, %c0_210] : memref<64x1x128xf32, #tpu.memory_space<vmem>>, vector<1x1x128xf32>
      %490 = vector.shape_cast %489 : vector<1x1x128xf32> to vector<1x128xf32>
      %491 = arith.addf %485, %490 : vector<1x128xf32>
      %492 = arith.index_cast %20 : i32 to index
      %c7_211 = arith.constant 7 : index
      %493 = memref.load %arg10[%492, %c7_211] : memref<8x8xi32, #tpu.memory_space<smem>>
      %494 = arith.index_cast %493 : i32 to index
      %c0_212 = arith.constant 0 : index
      %c0_213 = arith.constant 0 : index
      %495 = vector.load %arg13[%494, %c0_212, %c0_213] : memref<256x1x128xf32, #tpu.memory_space<vmem>>, vector<1x1x128xf32>
      %496 = vector.shape_cast %495 : vector<1x1x128xf32> to vector<1x128xf32>
      %497 = arith.addf %491, %496 : vector<1x128xf32>
      %498 = arith.addf %497, %480 : vector<1x128xf32>
      %499 = arith.index_cast %20 : i32 to index
      %c7_214 = arith.constant 7 : index
      %c0_215 = arith.constant 0 : index
      %500 = vector.load %arg19[%499, %c7_214, %c0_215] : memref<8x8x128xf32, #tpu.memory_space<vmem>>, vector<1x1x128xf32>
      %501 = vector.shape_cast %500 : vector<1x1x128xf32> to vector<1x128xf32>
      %502 = vector.shape_cast %498 : vector<1x128xf32> to vector<1x1x128xf32>
      tpu.vector_store %arg19[%499, %c7_214, %c0_215], %502 {strides = array<i32>} : memref<8x8x128xf32, #tpu.memory_space<vmem>>, vector<1x1x128xf32>,
    }
    %c8_i32_3 = arith.constant 8 : i32
    %c0_4 = arith.constant 0 : index
    %c0_5 = arith.constant 0 : index
    %c0_6 = arith.constant 0 : index
    %4 = vector.load %arg17[%c0_4, %c0_5, %c0_6] : memref<8x1x128xf32, #tpu.memory_space<vmem>>, vector<8x1x128xf32>
    %c0_7 = arith.constant 0 : index
    %c0_8 = arith.constant 0 : index
    %c0_9 = arith.constant 0 : index
    %5 = vector.load %arg18[%c0_7, %c0_8, %c0_9] : memref<8x8x128xf32, #tpu.memory_space<vmem>>, vector<8x8x128xf32>
    %6 = vector.broadcast %4 : vector<8x1x128xf32> to vector<8x8x128xf32>
    %7 = arith.mulf %6, %5 : vector<8x8x128xf32>
    %cst = arith.constant dense<0.000000e+00> : vector<8x8xf32>
    %8 = vector.multi_reduction <add>, %7, %cst [2] : vector<8x8x128xf32> to vector<8x8xf32>
    %c0_10 = arith.constant 0 : index
    %c0_11 = arith.constant 0 : index
    %c0_12 = arith.constant 0 : index
    %9 = vector.load %arg16[%c0_10, %c0_11, %c0_12] : memref<2x8x8xf32, #tpu.memory_space<vmem>>, vector<1x8x8xf32>
    %10 = vector.shape_cast %9 : vector<1x8x8xf32> to vector<8x8xf32>
    %11 = vector.shape_cast %8 : vector<8x8xf32> to vector<1x8x8xf32>
    tpu.vector_store %arg16[%c0_10, %c0_11, %c0_12], %11 {strides = array<i32>} : memref<2x8x8xf32, #tpu.memory_space<vmem>>, vector<1x8x8xf32>,
    %c0_13 = arith.constant 0 : index
    %c0_14 = arith.constant 0 : index
    %c0_15 = arith.constant 0 : index
    %12 = vector.load %arg19[%c0_13, %c0_14, %c0_15] : memref<8x8x128xf32, #tpu.memory_space<vmem>>, vector<8x8x128xf32>
    %13 = vector.broadcast %4 : vector<8x1x128xf32> to vector<8x8x128xf32>
    %14 = arith.mulf %13, %12 : vector<8x8x128xf32>
    %cst_16 = arith.constant dense<0.000000e+00> : vector<8x8xf32>
    %15 = vector.multi_reduction <add>, %14, %cst_16 [2] : vector<8x8x128xf32> to vector<8x8xf32>
    %c1 = arith.constant 1 : index
    %c0_17 = arith.constant 0 : index
    %c0_18 = arith.constant 0 : index
    %16 = vector.load %arg16[%c1, %c0_17, %c0_18] : memref<2x8x8xf32, #tpu.memory_space<vmem>>, vector<1x8x8xf32>
    %17 = vector.shape_cast %16 : vector<1x8x8xf32> to vector<8x8xf32>
    %18 = vector.shape_cast %15 : vector<8x8xf32> to vector<1x8x8xf32>
    tpu.vector_store %arg16[%c1, %c0_17, %c0_18], %18 {strides = array<i32>} : memref<2x8x8xf32, #tpu.memory_space<vmem>>, vector<1x8x8xf32>,
    return
  }
  func.func @transform_0(%arg0: i32) -> (i32, i32) {
    %c0_i32 = arith.constant 0 : i32
    %c0_i32_0 = arith.constant 0 : i32
    return %arg0, %c0_i32 : i32, i32
  }
  func.func @transform_1(%arg0: i32) -> (i32, i32) {
    %c0_i32 = arith.constant 0 : i32
    %c0_i32_0 = arith.constant 0 : i32
    return %arg0, %c0_i32 : i32, i32
  }
  func.func @transform_2(%arg0: i32) -> (i32, i32) {
    %c0_i32 = arith.constant 0 : i32
    %c0_i32_0 = arith.constant 0 : i32
    return %arg0, %c0_i32 : i32, i32
  }
  func.func @transform_3(%arg0: i32) -> (i32, i32) {
    %c0_i32 = arith.constant 0 : i32
    %c0_i32_0 = arith.constant 0 : i32
    return %arg0, %c0_i32 : i32, i32
  }
  func.func @transform_4(%arg0: i32) -> (i32, i32) {
    %c0_i32 = arith.constant 0 : i32
    %c0_i32_0 = arith.constant 0 : i32
    return %arg0, %c0_i32 : i32, i32
  }
  func.func @transform_5(%arg0: i32) -> (i32, i32) {
    %c0_i32 = arith.constant 0 : i32
    %c0_i32_0 = arith.constant 0 : i32
    return %arg0, %c0_i32 : i32, i32
  }
  func.func @transform_6(%arg0: i32) -> (i32, i32) {
    %c0_i32 = arith.constant 0 : i32
    %c0_i32_0 = arith.constant 0 : i32
    return %arg0, %c0_i32 : i32, i32
  }
  func.func @transform_7(%arg0: i32) -> (i32, i32) {
    %c0_i32 = arith.constant 0 : i32
    %c0_i32_0 = arith.constant 0 : i32
    return %arg0, %c0_i32 : i32, i32
  }
  func.func @transform_8(%arg0: i32) -> (i32, i32) {
    %c0_i32 = arith.constant 0 : i32
    %c0_i32_0 = arith.constant 0 : i32
    return %arg0, %c0_i32 : i32, i32
  }
  func.func @transform_9(%arg0: i32) -> (i32, i32) {
    %c0_i32 = arith.constant 0 : i32
    %c0_i32_0 = arith.constant 0 : i32
    return %arg0, %c0_i32 : i32, i32
  }
  func.func @transform_10(%arg0: i32) -> (i32, i32) {
    %c0_i32 = arith.constant 0 : i32
    %c0_i32_0 = arith.constant 0 : i32
    return %arg0, %c0_i32 : i32, i32
  }
  func.func @transform_11(%arg0: i32) -> (i32, i32, i32) {
    %c0_i32 = arith.constant 0 : i32
    %c0_i32_0 = arith.constant 0 : i32
    %c0_i32_1 = arith.constant 0 : i32
    %c0_i32_2 = arith.constant 0 : i32
    return %c0_i32, %c0_i32_0, %c0_i32_1 : i32, i32, i32
  }
  func.func @transform_12(%arg0: i32) -> (i32, i32, i32) {
    %c0_i32 = arith.constant 0 : i32
    %c0_i32_0 = arith.constant 0 : i32
    %c0_i32_1 = arith.constant 0 : i32
    %c0_i32_2 = arith.constant 0 : i32
    return %c0_i32, %c0_i32_0, %c0_i32_1 : i32, i32, i32
  }
  func.func @transform_13(%arg0: i32) -> (i32, i32) {
    %c0_i32 = arith.constant 0 : i32
    %c0_i32_0 = arith.constant 0 : i32
    %c0_i32_1 = arith.constant 0 : i32
    return %c0_i32, %c0_i32_0 : i32, i32
  }
  func.func @transform_14(%arg0: i32) -> (i32, i32) {
    %c0_i32 = arith.constant 0 : i32
    %c0_i32_0 = arith.constant 0 : i32
    %c0_i32_1 = arith.constant 0 : i32
    return %c0_i32, %c0_i32_0 : i32, i32
  }
  func.func @transform_15(%arg0: i32) -> (i32, i32, i32) {
    %c0_i32 = arith.constant 0 : i32
    %c0_i32_0 = arith.constant 0 : i32
    %c0_i32_1 = arith.constant 0 : i32
    return %c0_i32, %arg0, %c0_i32_0 : i32, i32, i32
  }
}

</mosaic_0001>

<bundles_post_ra>
// kernel: tpu_custom_call.1
= control target key start
LH: loop header
LB: loop body
LE: loop exit
PB: predicated region body
PF: predicated region fallthrough
CT: control target
= control target key end

     0   :  { %s7799_s0 = inlined_call_operand.vmem [shape: s32[16,1], index: 0, kind: input, shape index: {}]   ;;  %s7800_s1 = inlined_call_operand.vmem [shape: s32[16,1], index: 1, kind: input, shape index: {}]   ;;  %s7801_s2 = inlined_call_operand.vmem [shape: f32[16,1], index: 2, kind: input, shape index: {}]   ;;  %s7802_s3 = inlined_call_operand.vmem [shape: s32[16,8], index: 3, kind: input, shape index: {}]   ;;  %s7803_s4 = inlined_call_operand.vmem [shape: s32[16,8], index: 4, kind: input, shape index: {}]   ;;  %s7804_s5 = inlined_call_operand.vmem [shape: s32[16,8], index: 5, kind: input, shape index: {}]   ;;  %s7805_s6 = inlined_call_operand.vmem [shape: f32[16,8], index: 6, kind: input, shape index: {}]   ;;  %s7806_s7 = inlined_call_operand.vmem [shape: s32[16,8], index: 7, kind: input, shape index: {}]   ;;  %s7807_s8 = inlined_call_operand.vmem [shape: s32[16,8], index: 8, kind: input, shape index: {}]   ;;  %s7808_s9 = inlined_call_operand.vmem [shape: s32[16,8], index: 9, kind: input, shape index: {}]   ;;  %s7809_s10 = inlined_call_operand.vmem [shape: f32[16,8], index: 10, kind: input, shape index: {}]   ;;  %s7810_s11 = inlined_call_operand.hbm [shape: f32[64,1,128], index: 11, kind: input, shape index: {}]   ;;  %s7811_s12 = inlined_call_operand.hbm [shape: f32[256,1,128], index: 12, kind: input, shape index: {}]   ;;  %s7812_s13 = inlined_call_operand.vmem [shape: f32[1,128], index: 13, kind: input, shape index: {}]   ;;  %s7813_s14 = inlined_call_operand.vmem [shape: f32[1,128], index: 14, kind: input, shape index: {}]   ;;  %s7814_s15 = inlined_call_operand.vmem [shape: f32[2,16,8], index: 15, kind: output, shape index: {}]  }
   0x1   :  { %7830 = sst [smem:[#allocation38_spill]] %s7799_s0 }
   0x2   :  { %7831 = sst [smem:[#allocation39_spill]] %s7800_s1 }
   0x3   :  { %7832 = sst [smem:[#allocation40_spill]] %s7801_s2 }
   0x4   :  { %7833 = sst [smem:[#allocation41_spill]] %s7802_s3 }
   0x5   :  { %7834 = sst [smem:[#allocation42_spill]] %s7803_s4 }
   0x6   :  { %7835 = sst [smem:[#allocation43_spill]] %s7804_s5 }
   0x7   :  { %7836 = sst [smem:[#allocation44_spill]] %s7805_s6 }
   0x8   :  { %7837 = sst [smem:[#allocation45_spill]] %s7806_s7 }
   0x9   :  { %7838 = sst [smem:[#allocation46_spill]] %s7807_s8 }
   0xa   :  { %7839 = sst [smem:[#allocation47_spill]] %s7808_s9 }
   0xb   :  { %7840 = sst [smem:[#allocation48_spill]] %s7809_s10 }
   0xc   :  { %7841 = sst [smem:[#allocation49_spill]] %s7810_s11 }
   0xd   :  { %7842 = sst [smem:[#allocation50_spill]] %s7811_s12 }
   0xe   :  { %7843 = sst [smem:[#allocation51_spill]] %s7812_s13 }
   0xf   :  { %7844 = sst [smem:[#allocation52_spill]] %s7813_s14 }
  0x10   :  { %7845 = sst [smem:[#allocation53_spill]] %s7814_s15 }
  0x11   :  { %20 = vsyncpa [#allocation7], 0 }
  0x12   :  { %22 = vsyncpa [#allocation7 + $0x1], 0 }
  0x13   :  { %23 = vsyncpa [#allocation9], 0 }
  0x14   :  { %25 = vsyncpa [#allocation9 + $0x1], 0 }
  0x15   :  { %26 = vsyncpa [#allocation12], 0 }
  0x16   :  { %28 = vsyncpa [#allocation12 + $0x1], 0 }
  0x17   :  { %29 = vsyncpa [#allocation15], 0 }
  0x18   :  { %31 = vsyncpa [#allocation15 + $0x1], 0 }
  0x19   :  { %32 = vsyncpa [#allocation18], 0 }
  0x1a   :  { %34 = vsyncpa [#allocation18 + $0x1], 0 }
  0x1b   :  { %35 = vsyncpa [#allocation21], 0 }
  0x1c   :  { %37 = vsyncpa [#allocation21 + $0x1], 0 }
  0x1d   :  { %38 = vsyncpa [#allocation6], 0 }
  0x1e   :  { %39 = vsyncpa [#allocation25], 0  ;;  %s5031_s18 = smov 0   ;;  %s5033_s19 = smov 0  }
  0x1f   :  { %s5035_s20 = smov 0   ;;  %s5037_s21 = smov 0  }
  0x20 LB: > { %s5052_s22 = sadd.s32 1, %s4927_s21   ;;  %s52_s23 = sadd.s32 1, %s4923_s20  ;;  %s4927_s21 = sphi %s5037_s21, %s7914_s21   ;;  %s4923_s20 = sphi %s5035_s20, %s7918_s20   ;;  %s4919_s19 = sphi %s5033_s19, %s7917_s19   ;;  %s4915_s18 = sphi %s5031_s18, %s7916_s18  }
  0x21   : > { %7846 = sst [smem:[#allocation35_spill]] %s5052_s22  ;;  %s49_s24 = ssub.s32 %s4927_s21, %s5052_s22 }
  0x22   : > { %p59_p0 = scmp.ne.s32.totalorder %s4923_s20, %s4919_s19  ;;  %p50_p1 = scmp.eq.s32.totalorder %s49_s24, 0 }
  0x23   : > { %p60_p2 = scmp.eq.s32.totalorder %s4927_s21, 0  ;;  %p4567_p3 = scmp.lt.s32.totalorder %s4927_s21, 2 }
  0x24   : > { %s5062_s25 = scalar_select %p50_p1, %s4923_s20, %s52_s23  }
  0x25   : > { %p61_p4 = por %p60_p2, %p59_p0  ;;  %s7815_s26 = sand.u32 1, %s4923_s20  }
  0x26   : > { %7847 = sst [smem:[#allocation36_spill]] %s5062_s25  ;;  %s5070_s27 = sshll.u32 %s7815_s26, 10 }
  0x27   : > { %s5073_s28 = sshll.u32 %s4927_s21, 3  ;;  %p5075_p5 = pnand %p4567_p3, %p61_p4 }
  0x28   : > { %s5080_s30 = sand.u32 1, %s4927_s21   ;;  %s7849_s1 = sld [smem:[#allocation39_spill]] }
  0x29   : > { %s514_s26 = scalar_lea.smem [#allocation8], %s5070_s27  ;;  %s7822_s25 = scalar_lea.sflag [#allocation9], %s5080_s30 }
  0x2a   : > { %p5090_p7 = pneg %p5075_p5 }
  0x2e   : > { %s518_s23 = scalar_lea.vmem %s7849_s1, %s5073_s28 }
  0x2f   : > { %s520_s24 = sshll.u32 %s518_s23, 4  ;;  %s4643_s23 = scalar_lea.vmem %s7849_s1, 16  ;;  %s521_s24 = int_to_ptr.vmem [resolvable:$true] %s520_s24 }
  0x30   : > { %s4636_s22 = sshra.s32 %s521_s24, 4  ;;  %s4637_s22 = int_to_ptr.vmem [resolvable:$true] %s4636_s22 }
  0x31   : > { %s4638_s15 = scalar_lea.vmem %s4637_s22, 8  ;;  %p4644_p10 = scmp.lt.s32.totalorder %s4637_s22, %s7849_s1 }
  0x32   : > { %p4639_p6 = scmp.ne.s32.totalorder %s4637_s22, %s4638_s15  ;;  %p4645_p11 = scmp.lt.s32.totalorder %s4643_s23, %s4638_s15 }
  0x34   : > { %p4641_p8 = pnand %p5090_p7, %p4639_p6  ;;  %p4646_p12 = por %p4645_p11, %p4644_p10 }
  0x36   : > { %p4642_p9 = pneg %p4641_p8 }
  0x38   : > { %p4647_p13 = pnand %p4646_p12, %p4642_p9 }
  0x3a   : > { %4650 = shalt.err (!%p4647_p13)
}
  0x3b   : > { %4537 = dma.vmem_to_smem (!%p5075_p5), %s521_s24, 128, %s514_s26, %s7822_s25  }
  0x3c   : > { %s7851_s3 = sld [smem:[#allocation41_spill]]  ;;  %s548_s23 = scalar_lea.smem [#allocation11], %s5070_s27 }
  0x3d   : > { %s7852_s5 = sld [smem:[#allocation43_spill]]  ;;  %s7823_s1 = scalar_lea.sflag [#allocation12], %s5080_s30 }
  0x42   : > { %s552_s8 = scalar_lea.vmem %s7851_s3, %s5073_s28  ;;  %s4658_s16 = scalar_lea.vmem %s7851_s3, 16 }
  0x43   : > { %s554_s10 = sshll.u32 %s552_s8, 4  ;;  %s586_s22 = scalar_lea.vmem %s7852_s5, %s5073_s28  ;;  %s555_s10 = int_to_ptr.vmem [resolvable:$true] %s554_s10 }
  0x44   : > { %s4651_s6 = sshra.s32 %s555_s10, 4  ;;  %s4652_s6 = int_to_ptr.vmem [resolvable:$true] %s4651_s6 }
  0x45   : > { %s4653_s4 = scalar_lea.vmem %s4652_s6, 8  ;;  %p4659_p4 = scmp.lt.s32.totalorder %s4652_s6, %s7851_s3 }
  0x46   : > { %p4654_p1 = scmp.ne.s32.totalorder %s4652_s6, %s4653_s4  ;;  %p4660_p6 = scmp.lt.s32.totalorder %s4658_s16, %s4653_s4 }
  0x48   : > { %p4656_p2 = pnand %p4654_p1, %p5090_p7  ;;  %p4661_p8 = por %p4660_p6, %p4659_p4 }
  0x4a   : > { %p4657_p3 = pneg %p4656_p2 }
  0x4c   : > { %p4662_p9 = pnand %p4661_p8, %p4657_p3 }
  0x4e   : > { %4665 = shalt.err (!%p4662_p9)
}
  0x4f   : > { %4543 = dma.vmem_to_smem (!%p5075_p5), %s555_s10, 128, %s548_s23, %s7823_s1  }
  0x50   : > { %s588_s13 = sshll.u32 %s586_s22, 4  ;;  %s582_s15 = scalar_lea.smem [#allocation14], %s5070_s27  ;;  %s589_s13 = int_to_ptr.vmem [resolvable:$true] %s588_s13 }
  0x51   : > { %s7824_s26 = scalar_lea.sflag [#allocation15], %s5080_s30  ;;  %s4666_s24 = sshra.s32 %s589_s13, 4  ;;  %s4667_s24 = int_to_ptr.vmem [resolvable:$true] %s4666_s24 }
  0x52   : > { %s4668_s17 = scalar_lea.vmem %s4667_s24, 8  ;;  %s4673_s16 = scalar_lea.vmem %s7852_s5, 16 }
  0x53   : > { %p4669_p10 = scmp.ne.s32.totalorder %s4667_s24, %s4668_s17  ;;  %p4674_p13 = scmp.lt.s32.totalorder %s4667_s24, %s7852_s5 }
  0x54   : > { %p4675_p1 = scmp.lt.s32.totalorder %s4673_s16, %s4668_s17 }
  0x55   : > { %p4671_p11 = pnand %p4669_p10, %p5090_p7 }
  0x56   : > { %p4676_p2 = por %p4675_p1, %p4674_p13 }
  0x57   : > { %p4672_p12 = pneg %p4671_p11 }
  0x59   : > { %p4677_p3 = pnand %p4676_p2, %p4672_p12 }
  0x5b   : > { %4680 = shalt.err (!%p4677_p3)
}
  0x5c   : > { %4549 = dma.vmem_to_smem (!%p5075_p5), %s589_s13, 128, %s582_s15, %s7824_s26  }
  0x5d   : > { %s7853_s7 = sld [smem:[#allocation45_spill]]  ;;  %s616_s6 = scalar_lea.smem [#allocation17], %s5070_s27 }
  0x5e   : > { %s7854_s9 = sld [smem:[#allocation47_spill]]  ;;  %s7826_s16 = scalar_lea.sflag [#allocation18], %s5080_s30 }
  0x63   : > { %s620_s23 = scalar_lea.vmem %s7853_s7, %s5073_s28  ;;  %s4688_s10 = scalar_lea.vmem %s7853_s7, 16 }
  0x64   : > { %s622_s25 = sshll.u32 %s620_s23, 4  ;;  %s654_s4 = scalar_lea.vmem %s7854_s9, %s5073_s28  ;;  %s623_s25 = int_to_ptr.vmem [resolvable:$true] %s622_s25 }
  0x65   : > { %s4681_s8 = sshra.s32 %s623_s25, 4  ;;  %s4682_s8 = int_to_ptr.vmem [resolvable:$true] %s4681_s8 }
  0x66   : > { %s4683_s1 = scalar_lea.vmem %s4682_s8, 8  ;;  %p4689_p9 = scmp.lt.s32.totalorder %s4682_s8, %s7853_s7 }
  0x67   : > { %p4684_p4 = scmp.ne.s32.totalorder %s4682_s8, %s4683_s1  ;;  %p4690_p10 = scmp.lt.s32.totalorder %s4688_s10, %s4683_s1 }
  0x69   : > { %p4686_p6 = pnand %p4684_p4, %p5090_p7  ;;  %p4691_p11 = por %p4690_p10, %p4689_p9 }
  0x6b   : > { %p4687_p8 = pneg %p4686_p6 }
  0x6d   : > { %p4692_p12 = pnand %p4691_p11, %p4687_p8 }
  0x6f   : > { %4695 = shalt.err (!%p4692_p12)
}
  0x70   : > { %4555 = dma.vmem_to_smem (!%p5075_p5), %s623_s25, 128, %s616_s6, %s7826_s16  }
  0x71   : > { %s656_s24 = sshll.u32 %s654_s4, 4  ;;  %s650_s17 = scalar_lea.smem [#allocation20], %s5070_s27  ;;  %s657_s24 = int_to_ptr.vmem [resolvable:$true] %s656_s24 }
  0x72   : > { %s7825_s13 = scalar_lea.sflag [#allocation21], %s5080_s30  ;;  %s4696_s15 = sshra.s32 %s657_s24, 4  ;;  %s4697_s15 = int_to_ptr.vmem [resolvable:$true] %s4696_s15 }
  0x73   : > { %s4698_s22 = scalar_lea.vmem %s4697_s15, 8  ;;  %s4703_s10 = scalar_lea.vmem %s7854_s9, 16 }
  0x74   : > { %p4699_p13 = scmp.ne.s32.totalorder %s4697_s15, %s4698_s22  ;;  %p4704_p3 = scmp.lt.s32.totalorder %s4697_s15, %s7854_s9 }
  0x75   : > { %p4705_p4 = scmp.lt.s32.totalorder %s4703_s10, %s4698_s22 }
  0x76   : > { %p4701_p1 = pnand %p4699_p13, %p5090_p7 }
  0x77   : > { %p4706_p6 = por %p4705_p4, %p4704_p3 }
  0x78   : > { %p4702_p2 = pneg %p4701_p1 }
  0x7a   : > { %p4707_p8 = pnand %p4706_p6, %p4702_p2 }
  0x7c   : > { %4710 = shalt.err (!%p4707_p8)
}
  0x7d   : > { %4561 = dma.vmem_to_smem (!%p5075_p5), %s657_s24, 128, %s650_s17, %s7825_s13  }
  0x7e   : > { %s5179_s25 = sadd.s32 4294967295, %s4927_s21   ;;  %p65_p9 = scmp.ne.s32.totalorder %s4919_s19, %s4915_s18 }
  0x7f   : > { %p66_p10 = scmp.eq.s32.totalorder %s5179_s25, 0  ;;  %p433_p11 = scmp.eq.s32.totalorder %s5179_s25, 1 }
  0x80   : > { %p4395_p12 = scmp.ge.s32.totalorder %s4927_s21, 1  ;;  %p446_p13 = scmp.lt.s32.totalorder %s4927_s21, 3 }
  0x81   : > { %p5189_p1 = por %p66_p10, %p65_p9  ;;  %p5196_p2 = por %p433_p11, %p59_p0 }
  0x82   : > { %p5200_p3 = pnand %p4395_p12, %p446_p13  ;;  %s7858_s11 = sld [smem:[#allocation49_spill]] }
  0x83   : > { %s4933_s17 = smov [#allocation23]   ;;  %s7859_s12 = sld [smem:[#allocation50_spill]] }
  0x84   : > { %p4524_p4 = pneg %p5200_p3  ;;  %s459_s15 = sshll.u32 %s4933_s17, 4  ;;  %s460_s15 = int_to_ptr.vmem [resolvable:$true] %s459_s15 }
  0x85   : > { %s4934_s10 = smov 16   ;;  %s4935_s23 = smov 1  }
  0x86   : > { %p4525_p0 = pnand %p4524_p4, %p66_p10  ;;  %s4936_s24 = smov [#allocation24]  }
  0x87   : > { %s473_s18 = sshll.u32 %s4936_s24, 4  ;;  %s7860_s0 = sld [smem:[#allocation38_spill]]  ;;  %s474_s18 = int_to_ptr.vmem [resolvable:$true] %s473_s18 }
  0x88   : > { %s457_s21 = sshll.u32 %s7858_s11, 4  ;;  %s7861_s2 = sld [smem:[#allocation40_spill]]  ;;  %s458_s21 = int_to_ptr.hbm [resolvable:$true] %s457_s21 }
  0x89   : > { %s471_s8 = sshll.u32 %s7859_s12, 4  ;;  %s497_s1 = scalar_lea.smem [#allocation5], %s5070_s27  ;;  %s472_s8 = int_to_ptr.hbm [resolvable:$true] %s471_s8 }
  0x8a   : > { %4527 = dma.hbm_to_vmem [thread:$0]  (!%p4525_p0), %s458_s21, 1024, %s460_s15, [#allocation6], %s4934_s10, %s4934_s10, %s4935_s23  }
  0x8b   : > { %4530 = dma.hbm_to_vmem [thread:$0]  (!%p4525_p0), %s472_s8, 4096, %s474_s18, [#allocation25], %s4934_s10, %s4934_s10, %s4935_s23  }
  0x8c   : > { %s7862_s9 = sand.u32 1, %s4923_s20  }
  0x8d   : > { %s501_s17 = scalar_lea.vmem %s7860_s0, %s5073_s28  ;;  %s494_s11 = scalar_lea.sflag [#allocation7], %s7862_s9 }
  0x8e   : > { %s503_s3 = sshll.u32 %s501_s17, 4  ;;  %s535_s22 = scalar_lea.vmem %s7861_s2, %s5073_s28  ;;  %s504_s3 = int_to_ptr.vmem [resolvable:$true] %s503_s3 }
  0x8f   : > { %s4771_s12 = sshra.s32 %s504_s3, 4  ;;  %s4778_s13 = scalar_lea.vmem %s7860_s0, 16  ;;  %s4772_s12 = int_to_ptr.vmem [resolvable:$true] %s4771_s12 }
  0x90   : > { %s4773_s21 = scalar_lea.vmem %s4772_s12, 8  ;;  %p4779_p11 = scmp.lt.s32.totalorder %s4772_s12, %s7860_s0 }
  0x91   : > { %p4774_p6 = scmp.ne.s32.totalorder %s4772_s12, %s4773_s21  ;;  %p4780_p12 = scmp.lt.s32.totalorder %s4778_s13, %s4773_s21 }
  0x93   : > { %p4776_p8 = pnand %p4774_p6, %p5090_p7  ;;  %p4781_p13 = por %p4780_p12, %p4779_p11 }
  0x95   : > { %p4777_p9 = pneg %p4776_p8 }
  0x97   : > { %p4782_p4 = pnand %p4781_p13, %p4777_p9 }
  0x99   : > { %4785 = shalt.err (!%p4782_p4)
}
  0x9a   : > { %4534 = dma.vmem_to_smem (!%p5075_p5), %s504_s3, 128, %s497_s1, %s494_s11  }
  0x9b   : > { %s537_s5 = sshll.u32 %s535_s22, 4  ;;  %s7863_s23 = sld [smem:[#allocation42_spill]]  ;;  %s538_s5 = int_to_ptr.vmem [resolvable:$true] %s537_s5 }
  0x9c   : > { %s531_s18 = scalar_lea.smem [#allocation10], %s5070_s27  ;;  %s4786_s17 = sshra.s32 %s538_s5, 4  ;;  %s4787_s17 = int_to_ptr.vmem [resolvable:$true] %s4786_s17 }
  0x9d   : > { %s4788_s12 = scalar_lea.vmem %s4787_s17, 8  ;;  %s4793_s16 = scalar_lea.vmem %s7861_s2, 16 }
  0x9e   : > { %p4789_p0 = scmp.ne.s32.totalorder %s4787_s17, %s4788_s12  ;;  %p4794_p9 = scmp.lt.s32.totalorder %s4787_s17, %s7861_s2 }
  0x9f   : > { %p4795_p11 = scmp.lt.s32.totalorder %s4793_s16, %s4788_s12 }
  0xa0   : > { %p4791_p6 = pnand %p4789_p0, %p5090_p7 }
  0xa1   : > { %s569_s24 = scalar_lea.vmem %s7863_s23, %s5073_s28  ;;  %p4796_p12 = por %p4795_p11, %p4794_p9 }
  0xa2   : > { %p4792_p8 = pneg %p4791_p6 }
  0xa4   : > { %p4797_p13 = pnand %p4796_p12, %p4792_p8 }
  0xa6   : > { %4800 = shalt.err (!%p4797_p13)
}
  0xa7   : > { %s7864_s11 = scalar_lea.sflag [#allocation9], %s5080_s30  ;;  %s571_s22 = sshll.u32 %s569_s24, 4  ;;  %s572_s22 = int_to_ptr.vmem [resolvable:$true] %s571_s22 }
  0xa8   : > { %4540 = dma.vmem_to_smem (!%p5075_p5), %s538_s5, 128, %s531_s18, %s7864_s11  }
  0xa9   : > { %s7865_s10 = sld [smem:[#allocation44_spill]]  ;;  %s565_s9 = scalar_lea.smem [#allocation13], %s5070_s27 }
  0xaa   : > { %s4801_s17 = sshra.s32 %s572_s22, 4  ;;  %s4808_s16 = scalar_lea.vmem %s7863_s23, 16  ;;  %s4802_s17 = int_to_ptr.vmem [resolvable:$true] %s4801_s17 }
  0xab   : > { %s4803_s12 = scalar_lea.vmem %s4802_s17, 8  ;;  %p4809_p8 = scmp.lt.s32.totalorder %s4802_s17, %s7863_s23 }
  0xac   : > { %p4804_p4 = scmp.ne.s32.totalorder %s4802_s17, %s4803_s12  ;;  %p4810_p9 = scmp.lt.s32.totalorder %s4808_s16, %s4803_s12 }
  0xae   : > { %p4806_p0 = pnand %p4804_p4, %p5090_p7  ;;  %p4811_p11 = por %p4810_p9, %p4809_p8 }
  0xaf   : > { %s603_s7 = scalar_lea.vmem %s7865_s10, %s5073_s28 }
  0xb0   : > { %p4807_p6 = pneg %p4806_p0 }
  0xb2   : > { %p4812_p12 = pnand %p4811_p11, %p4807_p6 }
  0xb4   : > { %4815 = shalt.err (!%p4812_p12)
}
  0xb5   : > { %s7866_s24 = scalar_lea.sflag [#allocation12], %s5080_s30  ;;  %s605_s18 = sshll.u32 %s603_s7, 4  ;;  %s606_s18 = int_to_ptr.vmem [resolvable:$true] %s605_s18 }
  0xb6   : > { %4546 = dma.vmem_to_smem (!%p5075_p5), %s572_s22, 128, %s565_s9, %s7866_s24  }
  0xb7   : > { %s7867_s1 = sld [smem:[#allocation46_spill]]  ;;  %s599_s21 = scalar_lea.smem [#allocation16], %s5070_s27 }
  0xb8   : > { %s4816_s17 = sshra.s32 %s606_s18, 4  ;;  %s4823_s13 = scalar_lea.vmem %s7865_s10, 16  ;;  %s4817_s17 = int_to_ptr.vmem [resolvable:$true] %s4816_s17 }
  0xb9   : > { %s4818_s12 = scalar_lea.vmem %s4817_s17, 8  ;;  %p4824_p6 = scmp.lt.s32.totalorder %s4817_s17, %s7865_s10 }
  0xba   : > { %p4819_p13 = scmp.ne.s32.totalorder %s4817_s17, %s4818_s12  ;;  %p4825_p8 = scmp.lt.s32.totalorder %s4823_s13, %s4818_s12 }
  0xbc   : > { %p4821_p4 = pnand %p4819_p13, %p5090_p7  ;;  %p4826_p9 = por %p4825_p8, %p4824_p6 }
  0xbd   : > { %s637_s8 = scalar_lea.vmem %s7867_s1, %s5073_s28 }
  0xbe   : > { %p4822_p0 = pneg %p4821_p4 }
  0xc0   : > { %p4827_p11 = pnand %p4826_p9, %p4822_p0 }
  0xc2   : > { %4830 = shalt.err (!%p4827_p11)
}
  0xc3   : > { %s7868_s7 = scalar_lea.sflag [#allocation15], %s5080_s30  ;;  %s639_s9 = sshll.u32 %s637_s8, 4  ;;  %s640_s9 = int_to_ptr.vmem [resolvable:$true] %s639_s9 }
  0xc4   : > { %4552 = dma.vmem_to_smem (!%p5075_p5), %s606_s18, 128, %s599_s21, %s7868_s7  }
  0xc5   : > { %s7869_s11 = sld [smem:[#allocation48_spill]]  ;;  %s633_s16 = scalar_lea.smem [#allocation19], %s5070_s27 }
  0xc6   : > { %s4831_s17 = sshra.s32 %s640_s9, 4  ;;  %s4838_s22 = scalar_lea.vmem %s7867_s1, 16  ;;  %s4832_s17 = int_to_ptr.vmem [resolvable:$true] %s4831_s17 }
  0xc7   : > { %s4833_s12 = scalar_lea.vmem %s4832_s17, 8  ;;  %p4839_p0 = scmp.lt.s32.totalorder %s4832_s17, %s7867_s1 }
  0xc8   : > { %p4834_p12 = scmp.ne.s32.totalorder %s4832_s17, %s4833_s12  ;;  %p4840_p6 = scmp.lt.s32.totalorder %s4838_s22, %s4833_s12 }
  0xca   : > { %p4836_p13 = pnand %p4834_p12, %p5090_p7  ;;  %p4841_p8 = por %p4840_p6, %p4839_p0 }
  0xcb   : > { %s671_s15 = scalar_lea.vmem %s7869_s11, %s5073_s28 }
  0xcc   : > { %p4837_p4 = pneg %p4836_p13 }
  0xce   : > { %p4842_p9 = pnand %p4841_p8, %p4837_p4 }
  0xd0   : > { %4845 = shalt.err (!%p4842_p9)
}
  0xd1   : > { %s7870_s28 = scalar_lea.sflag [#allocation18], %s5080_s30  ;;  %s673_s8 = sshll.u32 %s671_s15, 4  ;;  %s674_s8 = int_to_ptr.vmem [resolvable:$true] %s673_s8 }
  0xd2   : > { %4558 = dma.vmem_to_smem (!%p5075_p5), %s640_s9, 128, %s633_s16, %s7870_s28  }
  0xd3   : > { %s667_s21 = scalar_lea.smem [#allocation22], %s5070_s27  ;;  %s4846_s7 = sshra.s32 %s674_s8, 4  ;;  %s4847_s7 = int_to_ptr.vmem [resolvable:$true] %s4846_s7 }
  0xd4   : > { %s4848_s24 = scalar_lea.vmem %s4847_s7, 8  ;;  %s4853_s17 = scalar_lea.vmem %s7869_s11, 16 }
  0xd5   : > { %p4849_p11 = scmp.ne.s32.totalorder %s4847_s7, %s4848_s24  ;;  %p4854_p4 = scmp.lt.s32.totalorder %s4847_s7, %s7869_s11 }
  0xd6   : > { %p4855_p0 = scmp.lt.s32.totalorder %s4853_s17, %s4848_s24 }
  0xd7   : > { %p4851_p12 = pnand %p4849_p11, %p5090_p7 }
  0xd8   : > { %p4856_p6 = por %p4855_p0, %p4854_p4 }
  0xd9   : > { %p4852_p13 = pneg %p4851_p12 }
  0xdb   : > { %p4857_p8 = pnand %p4856_p6, %p4852_p13 }
  0xdd   : > { %4860 = shalt.err (!%p4857_p8)
}
  0xde   : > { %s7871_s27 = scalar_lea.sflag [#allocation21], %s5080_s30  ;;  %682 = sbr.rel (%p5200_p3) target bundleno = 1203 (0x4b3), region = 80 }
  0xdf   : > { %4564 = dma.vmem_to_smem (!%p5075_p5), %s674_s8, 128, %s667_s21, %s7871_s27  }
  0xe3   : > { %s5319_s14 = sand.u32 1, %s4919_s19  }
  0xe4   : > { %s5322_s9 = sshll.u32 %s5319_s14, 10  ;;  %s685_s15 = scalar_lea.sflag [#allocation7], %s5319_s14 }
  0xe5   : > { %7872 = sst [smem:[#allocation37_spill]] %s5322_s9 }
  0xe6   : > { %4882 = dma.done.wait (%p5189_p1), %s685_s15, 128  }
  0xe7   : > { %4884 = vsyncadd (%p5189_p1), %s685_s15, 4294967168  ;;  %s694_s29 = sand.u32 1, %s5179_s25  }
  0xe8   : > { %s695_s30 = scalar_lea.sflag [#allocation9], %s694_s29 }
  0xe9   : > { %4886 = dma.done.wait (%p5189_p1), %s695_s30, 256  }
  0xea   : > { %4888 = vsyncadd (%p5189_p1), %s695_s30, 4294967040  ;;  %s715_s22 = scalar_lea.sflag [#allocation12], %s694_s29  ;;  %s5338_s18 = scalar_lea.smem [#allocation11], %s5322_s9 }
  0xeb   : > { %4890 = dma.done.wait (%p5189_p1), %s715_s22, 256  }
  0xec   : > { %4892 = vsyncadd (%p5189_p1), %s715_s22, 4294967040  ;;  %s5345_s28 = scalar_lea.smem [#allocation13], %s5322_s9  ;;  %s735_s8 = scalar_lea.sflag [#allocation15], %s694_s29 }
  0xed   : > { %s5348_s21 = scalar_lea.smem [#allocation14], %s5322_s9 }
  0xee   : > { %4894 = dma.done.wait (%p5189_p1), %s735_s8, 256  }
  0xef   : > { %4896 = vsyncadd (%p5189_p1), %s735_s8, 4294967040  ;;  %s5355_s7 = scalar_lea.smem [#allocation16], %s5322_s9  ;;  %s755_s24 = scalar_lea.sflag [#allocation18], %s694_s29 }
  0xf0   : > { %s5358_s0 = scalar_lea.smem [#allocation17], %s5322_s9 }
  0xf1   : > { %4898 = dma.done.wait (%p5189_p1), %s755_s24, 256  }
  0xf2   : > { %4900 = vsyncadd (%p5189_p1), %s755_s24, 4294967040  ;;  %s5365_s3 = scalar_lea.smem [#allocation19], %s5322_s9  ;;  %s775_s17 = scalar_lea.sflag [#allocation21], %s694_s29 }
  0xf3   : > { %s5368_s12 = scalar_lea.smem [#allocation20], %s5322_s9 }
  0xf4   : > { %4902 = dma.done.wait (%p5189_p1), %s775_s17, 256  }
  0xf5   : > { %4904 = vsyncadd (%p5189_p1), %s775_s17, 4294967040  ;;  %s5375_s13 = scalar_lea.smem [#allocation22], %s5322_s9 }
  0xf6   : > { %4906 = dma.done.wait (%p66_p10), [#allocation6], 1024  }
  0xf7   : > { %4908 = vsyncadd (%p66_p10), [#allocation6], 4294966272 }
  0xf8   : > { %4910 = dma.done.wait (%p66_p10), [#allocation25], 4096  }
  0xf9   : > { %4912 = vsyncadd (%p66_p10), [#allocation25], 4294963200 }
  0xfa   : > { %804 = sfence }
  0xfb   : > { %s4435_s27 = sshll.u32 %s5319_s14, 4  ;;  %s7873_s29 = sld [smem:[#allocation51_spill]]  ;;  %v4937_v13 = vmov 683565275   ;;  %v4938_v15 = vmov 2475754826  }
  0xfc   : > { %s7874_s8 = sld [smem:[#allocation52_spill]]  ;;  %v4939_v17 = vmov 2131351028   ;;  %v4940_v19 = vmov 2102212464   ;;  %s5452_s24 = scalar_lea.vmem [#allocation26], %s4435_s27 }
  0xfd   : > { %v4941_v21 = vmov 920167782   ;;  %v4942_v27 = vmov 1326507024   ;;  %s5454_s17 = smov 0  }
 0x101   : > { %v5389_v0 = vld [vmem:[%s7873_s29] sm:$0x1] }
 0x102   : > { %v5394_v1 = vld [vmem:[%s7874_s8] sm:$0x1] }
 0x103   : > { %v901_v2 = vand.u32 2139095040, %v5394_v1  ;;  %v898_v4 = vand.u32 2147483647, %v5394_v1  ;;  %vm900_vm12 = vcmp.lt.s32.totalorder %v5394_v1, 0 }
 0x105   : > { %v902_v3 = vshrl.u32 %v901_v2, 23  ;;  %v905_v7 = vand.u32 8388607, %v898_v4  ;;  %vm5438_vm13 = vcmp.le.f32.partialorder %v898_v4, 0.7853982 }
 0x107   : > { %v4436_v5 = vadd.s32 4294967169, %v902_v3  ;;  %v906_v10 = vor.u32 8388608, %v905_v7  ;;  %v4943_v3 = vmov 0  }
 0x109   : > { %v908_v6 = vadd.s32 1, %v4436_v5  ;;  %v5403_v29 = vshll.u32 %v906_v10, 8 }
 0x10b   : > { %vm909_vm0 = vcmp.gt.s32.totalorder %v908_v6, 0  ;;  %v947_v41 = vand.u32 65535, %v5403_v29  ;;  %v948_v42 = vshrl.u32 %v5403_v29, 16 }
 0x10c   : > { %v910_v8 = vsel %vm909_vm0, %v908_v6, 0 }
 0x10d   : > { %v912_v9 = vand.u32 31, %v910_v8  ;;  %v5400_v11 = vshrl.u32 %v910_v8, 5 }
 0x10f   : > { %v913_v12 = vsub.s32 32, %v912_v9  ;;  %v915_v14 = vshll.u32 %v4937_v13, %v912_v9  ;;  %v918_v16 = vshll.u32 %v4938_v15, %v912_v9  ;;  %v921_v18 = vshll.u32 %v4939_v17, %v912_v9 }
 0x110   : > { %v924_v20 = vshll.u32 %v4940_v19, %v912_v9  ;;  %v927_v22 = vshll.u32 %v4941_v21, %v912_v9  ;;  %vm930_vm1 = vcmp.lt.s32.totalorder %v5400_v11, 1  ;;  %vm933_vm2 = vcmp.lt.s32.totalorder %v5400_v11, 4 }
 0x111   : > { %v916_v23 = vshrl.u32 %v4938_v15, %v913_v12  ;;  %v919_v24 = vshrl.u32 %v4939_v17, %v913_v12  ;;  %v922_v25 = vshrl.u32 %v4940_v19, %v913_v12  ;;  %v925_v26 = vshrl.u32 %v4941_v21, %v913_v12 }
 0x112   : > { %v928_v28 = vshrl.u32 %v4942_v27, %v913_v12  ;;  %vm932_vm3 = vcmp.lt.s32.totalorder %v5400_v11, 3  ;;  %vm931_vm4 = vcmp.lt.s32.totalorder %v5400_v11, 2  ;;  %v914_v49 = vshrl.u32 %v4937_v13, %v913_v12 }
 0x113   : > { %v917_v30 = vor.u32 %v916_v23, %v915_v14  ;;  %v920_v31 = vor.u32 %v919_v24, %v918_v16  ;;  %v923_v32 = vor.u32 %v922_v25, %v921_v18  ;;  %v926_v33 = vor.u32 %v925_v26, %v924_v20 }
 0x114   : > { %v929_v34 = vor.u32 %v928_v28, %v927_v22 }
 0x115   : > { %v938_v35 = vsel %vm930_vm1, %v917_v30, %v920_v31  ;;  %v942_v36 = vsel %vm930_vm1, %v920_v31, %v923_v32  ;;  %v939_v37 = vsel %vm933_vm2, %v926_v33, 920167782  ;;  %v934_v62 = vsel %vm930_vm1, %v914_v49, %v917_v30 }
 0x116   : > { %v943_v38 = vsel %vm933_vm2, %v929_v34, 1326507024  ;;  %v940_v39 = vsel %vm932_vm3, %v923_v32, %v939_v37  ;;  %v935_v2 = vsel %vm933_vm2, %v923_v32, 2102212464  ;;  %vm1041_vm1 = vweird.f32 %v5394_v1 }
 0x117   : > { %v944_v40 = vsel %vm932_vm3, %v926_v33, %v943_v38  ;;  %v941_v43 = vsel %vm931_vm4, %v938_v35, %v940_v39  ;;  %v936_v14 = vsel %vm932_vm3, %v920_v31, %v935_v2 }
 0x118   : > { %v945_v44 = vsel %vm931_vm4, %v942_v36, %v944_v40  ;;  %v971_v47 = vand.u32 65535, %v941_v43  ;;  %v972_v48 = vshrl.u32 %v941_v43, 16  ;;  %v937_v22 = vsel %vm931_vm4, %v934_v62, %v936_v14 }
 0x119   : > { %v949_v45 = vand.u32 65535, %v945_v44  ;;  %v950_v46 = vshrl.u32 %v945_v44, 16  ;;  %v991_v26 = vmul.u32 %v5403_v29, %v937_v22 }
 0x11a   : > { %v973_v53 = vmul.u32 %v971_v47, %v947_v41  ;;  %v974_v54 = vmul.u32 %v972_v48, %v947_v41  ;;  %v975_v55 = vmul.u32 %v971_v47, %v948_v42  ;;  %v976_v59 = vmul.u32 %v972_v48, %v948_v42 }
 0x11b   : > { %v951_v50 = vmul.u32 %v949_v45, %v947_v41  ;;  %v952_v51 = vmul.u32 %v950_v46, %v947_v41  ;;  %v953_v52 = vmul.u32 %v949_v45, %v948_v42  ;;  %v954_v56 = vmul.u32 %v950_v46, %v948_v42 }
 0x11c   : > { %v977_v60 = vshll.u32 %v974_v54, 16  ;;  %v979_v61 = vshll.u32 %v975_v55, 16  ;;  %v978_v12 = vshrl.u32 %v974_v54, 16  ;;  %v980_v18 = vshrl.u32 %v975_v55, 16 }
 0x11d   : > { %v955_v57 = vshll.u32 %v952_v51, 16  ;;  %v957_v58 = vshll.u32 %v953_v52, 16  ;;  %v956_v7 = vshrl.u32 %v952_v51, 16  ;;  %v958_v15 = vshrl.u32 %v953_v52, 16 }
 0x11e   : > { %vm981_vm6 = vc.u32 %v973_v53, %v977_v60  ;;  %v983_v6 = vadd.s32 %v977_v60, %v973_v53 }
 0x11f   : > { %vm959_vm5 = vc.u32 %v951_v50, %v955_v57  ;;  %v961_v63 = vadd.s32 %v955_v57, %v951_v50  ;;  %v982_v9 = vsel %vm981_vm6, 1, %v4943_v3 }
 0x120   : > { %v960_v5 = vsel %vm959_vm5, 1, %v4943_v3  ;;  %v984_v13 = vadd.s32 %v982_v9, %v976_v59  ;;  %vm985_vm8 = vc.u32 %v983_v6, %v979_v61  ;;  %v987_v21 = vadd.s32 %v983_v6, %v979_v61 }
 0x121   : > { %v962_v8 = vadd.s32 %v960_v5, %v954_v56  ;;  %vm963_vm7 = vc.u32 %v961_v63, %v957_v58  ;;  %v986_v17 = vsel %vm985_vm8, 1, %v4943_v3 }
 0x122   : > { %v964_v10 = vsel %vm963_vm7, 1, %v4943_v3  ;;  %v988_v19 = vadd.s32 %v986_v17, %v984_v13 }
 0x123   : > { %v966_v16 = vadd.s32 %v964_v10, %v962_v8 }
 0x124   : > { %v989_v23 = vadd.s32 %v988_v19, %v978_v12 }
 0x125   : > { %v967_v20 = vadd.s32 %v966_v16, %v956_v7 }
 0x126   : > { %v990_v25 = vadd.s32 %v989_v23, %v980_v18 }
 0x127   : > { %v968_v24 = vadd.s32 %v967_v20, %v958_v15 }
 0x128   : > { %v994_v27 = vadd.s32 1, %v990_v25 }
 0x129   : > { %vm993_vm9 = vc.u32 %v968_v24, %v987_v21  ;;  %v992_v11 = vadd.s32 %v987_v21, %v968_v24 }
 0x12a   : > { %v995_v28 = vsel %vm993_vm9, %v994_v27, %v990_v25 }
 0x12b   : > { %v996_v30 = vadd.s32 %v995_v28, %v991_v26 }
 0x12d   : > { %v997_v31 = vadd.s32 536870912, %v996_v30 }
 0x12f   : > { %v998_v32 = vshrl.u32 %v997_v31, 30 }
 0x131   : > { %v999_v33 = vshll.u32 %v998_v32, 30  ;;  %v1022_v53 = vsub.s32 4, %v998_v32 }
 0x133   : > { %v1000_v34 = vsub.s32 %v996_v30, %v999_v33  ;;  %v1023_v58 = vsel %vm900_vm12, %v1022_v53, %v998_v32 }
 0x134   : > { %v1025_v61 = vsel %vm5438_vm13, 0, %v1023_v58 }
 0x135   : > { %vm1001_vm10 = vcmp.lt.s32.totalorder %v1000_v34, 0  ;;  %v1002_v35 = vsub.s32 0, %v1000_v34  ;;  %v1042_v3 = vand.u32 3, %v1025_v61 }
 0x137   : > { %v1003_v36 = vsel %vm1001_vm10, %v1002_v35, %v1000_v34  ;;  %vm1047_vm14 = vcmp.eq.s32.totalorder %v1042_v3, 2  ;;  %vm1044_vm15 = vcmp.eq.s32.totalorder %v1042_v3, 0  ;;  %vm1043_vm0 = vcmp.lt.s32.totalorder %v1042_v3, 2 }
 0x138   : > { %v1004_v37 = vclz %v1003_v36 }
 0x13a   : > { %v4437_v38 = vadd.s32 4294967294, %v1004_v37 }
 0x13c   : > { %vm4438_vm11 = vcmp.lt.s32.totalorder %v4437_v38, 0 }
 0x13d   : > { %v1007_v39 = vsel %vm4438_vm11, 0, %v4437_v38 }
 0x13e   : > { %v1008_v40 = vsub.s32 32, %v1007_v39  ;;  %v1009_v41 = vshll.u32 %v1000_v34, %v1007_v39  ;;  %v1012_v42 = vsub.s32 4294967266, %v1007_v39 }
 0x140   : > { %v1010_v29 = vshrl.u32 %v992_v11, %v1008_v40  ;;  %v1013_v43 = vadd.s32 127, %v1012_v42 }
 0x142   : > { %v1011_v44 = vor.u32 %v1010_v29, %v1009_v41  ;;  %v1014_v45 = vshll.u32 %v1013_v43, 23 }
 0x144   : > { %v1015_v46 = vor.u32 4788187, %v1014_v45  ;;  %v1018_v47 = vcvt.s32.f32 %v1011_v44 }
 0x146   : > { %v1016_v48 = vand.u32 2147483647, %v1015_v46 }
 0x148   : > { %v1019_v49 = vmul.f32 %v1018_v47, %v1016_v48 }
 0x14a   : > { %v1020_v51 = vxor.u32 2147483648, %v1019_v49 }
 0x14c   : > { %v1021_v52 = vsel %vm900_vm12, %v1020_v51, %v1019_v49 }
 0x14d   : > { %v1024_v54 = vsel %vm5438_vm13, %v5394_v1, %v1021_v52 }
 0x14e   : > { %v1026_v55 = vmul.f32 %v1024_v54, %v1024_v54 }
 0x150   : > { %v1027_v56 = vmul.f32 -0.001358992, %v1026_v55  ;;  %v1034_v57 = vmul.f32 -0.00019511016, %v1026_v55 }
 0x152   : > { %v1028_v59 = vadd.f32 0.041655596, %v1027_v56  ;;  %v1035_v60 = vadd.f32 0.008332121, %v1034_v57 }
 0x154   : > { %v1029_v4 = vmul.f32 %v1028_v59, %v1026_v55  ;;  %v1036_v62 = vmul.f32 %v1035_v60, %v1026_v55 }
 0x156   : > { %v1030_v63 = vadd.f32 -0.4999988, %v1029_v4  ;;  %v1037_v2 = vadd.f32 -0.16666654, %v1036_v62 }
 0x158   : > { %v1031_v5 = vmul.f32 %v1030_v63, %v1026_v55  ;;  %v1038_v6 = vmul.f32 %v1037_v2, %v1026_v55 }
 0x15a   : > { %v1032_v7 = vadd.f32 1.0, %v1031_v5  ;;  %v1039_v8 = vadd.f32 1.0, %v1038_v6 }
 0x15c   : > { %v1040_v9 = vmul.f32 %v1039_v8, %v1024_v54  ;;  %v1048_v10 = vxor.u32 2147483648, %v1032_v7 }
 0x15e   : > { %v1045_v12 = vxor.u32 2147483648, %v1040_v9  ;;  %v1049_v13 = vsel %vm1047_vm14, %v1048_v10, %v1040_v9 }
 0x160   : > { %v1046_v14 = vsel %vm1044_vm15, %v1032_v7, %v1045_v12 }
 0x161   : > { %v1050_v15 = vsel %vm1043_vm0, %v1046_v14, %v1049_v13 }
 0x162   : > { %v5448_v16 = vsel %vm1041_vm1, nan, %v1050_v15 }
 0x163 LB: >> { %s7877_s9 = sld [smem:[#allocation37_spill]]  ;;  %s5460_s26 = sshll.u32 %s4931_s17, 7  ;;  %v4944_v46 = vmov 683565275   ;;  %v4945_v48 = vmov 2475754826   ;;  %s4931_s17 = sphi %s5454_s17, %s1057_s17  }
 0x164   : >> { %s1070_s29 = sld [smem:[%s5355_s7 + %s5460_s26]]  ;;  %s5479_s2 = sadd.s32 1, %s5460_s26  ;;  %v4946_v50 = vmov 2131351028   ;;  %v4947_v52 = vmov 2102212464  }
 0x165   : >> { %s1244_s22 = sld [smem:[%s5375_s13 + %s5460_s26]]  ;;  %v4948_v54 = vmov 920167782   ;;  %v4949_v62 = vmov 1326507024  }
 0x169   : >> { %s7878_s16 = scalar_lea.smem [#allocation5], %s7877_s9  ;;  %s7879_s6 = scalar_lea.smem [#allocation8], %s7877_s9 }
 0x16a   : >> { %s1059_s14 = sld [smem:[%s7878_s16 + %s5460_s26]]  ;;  %s7880_s5 = scalar_lea.smem [#allocation10], %s7877_s9 }
 0x16b   : >> { %s1062_s27 = sld [smem:[%s7879_s6 + %s5460_s26]]  ;;  %s1067_s6 = scalar_lea.vmem [#allocation2], %s4931_s17 }
 0x16c   : >> { %s5471_s15 = sld [smem:[%s7880_s5 + %s5460_s26]] }
 0x16d   : >> { %s1418_s5 = sld [smem:[%s5355_s7 + %s5479_s2]] }
 0x170   : >> { %s1060_s30 = scalar_lea.vmem [#allocation23], %s1059_s14  ;;  %s5625_s14 = sld [smem:[%s5345_s28 + %s5460_s26]] }
 0x171   : >> { %v1061_v17 = vld [vmem:[%s1060_s30] sm:$0x1]  ;;  %s1063_s8 = scalar_lea.vmem [#allocation23], %s1062_s27  ;;  %s5642_s27 = sld [smem:[%s5348_s21 + %s5460_s26]] }
 0x172   : >> { %v1064_v18 = vld [vmem:[%s1063_s8] sm:$0x1]  ;;  %s1071_s1 = ssub.f32 %s5471_s15, %s1070_s29 }
 0x173   : >> { %v1065_v19 = vadd.f32 %v1064_v18, %v1061_v17  ;;  %s1245_s16 = ssub.f32 %s5471_s15, %s1244_s22 }
 0x174   : >> { %v1072_v21 = vstv %s1071_s1  ;;  %s1419_s1 = ssub.f32 %s5471_s15, %s1418_s5 }
 0x175   : >> { %v1066_v20 = vadd.f32 %v1065_v19, %v5448_v16  ;;  %v1073_v22 = vmul.f32 %v1072_v21, %v5389_v0  ;;  %v1246_v24 = vstv %s1245_s16  ;;  %s5598_s16 = sld [smem:[%s5375_s13 + %s5479_s2]] }
 0x176   : >> { %v1247_v27 = vmul.f32 %v1246_v24, %v5389_v0  ;;  %v1420_v11 = vstv %s1419_s1  ;;  %s5617_s5 = sld [smem:[%s5338_s18 + %s5460_s26]]  ;;  %s1233_s30 = scalar_lea.vmem [#allocation23], %s5625_s14 }
 0x177   : >> { %1068 = vst [vmem:[%s1067_s6] sm:$0x1] %v1066_v20  ;;  %v5488_v23 = vadd.f32 %v1073_v22, %v5394_v1  ;;  %v1421_v44 = vmul.f32 %v1420_v11, %v5389_v0  ;;  %s1237_s22 = scalar_lea.vmem [#allocation24], %s5642_s27  ;;  %s5756_s8 = sld [smem:[%s5358_s0 + %s5460_s26]] }
 0x178   : >> { %v5496_v31 = vadd.f32 %v1247_v27, %v5394_v1  ;;  %s5760_s1 = sld [smem:[%s5365_s3 + %s5460_s26]] }
 0x179   : >> { %v1075_v25 = vand.u32 2147483647, %v5488_v23  ;;  %v1078_v26 = vand.u32 2139095040, %v5488_v23  ;;  %v5527_v27 = vadd.f32 %v1421_v44, %v5394_v1 }
 0x17a   : >> { %v1252_v33 = vand.u32 2139095040, %v5496_v31  ;;  %v1249_v37 = vand.u32 2147483647, %v5496_v31 }
 0x17b   : >> { %v1079_v28 = vshrl.u32 %v1078_v26, 23  ;;  %v1082_v30 = vand.u32 8388607, %v1075_v25  ;;  %s1591_s6 = ssub.f32 %s5471_s15, %s5598_s16  ;;  %s4443_s16 = sshll.u32 %s4931_s17, 3 }
 0x17c   : >> { %v1253_v36 = vshrl.u32 %v1252_v33, 23  ;;  %v1256_v29 = vand.u32 8388607, %v1249_v37  ;;  %s1230_s29 = scalar_lea.vmem [#allocation23], %s5617_s5  ;;  %s5801_s5 = sadd.s32 2, %s5460_s26 }
 0x17d   : >> { %v4440_v32 = vadd.s32 4294967169, %v1079_v28  ;;  %v1083_v34 = vor.u32 8388608, %v1082_v30  ;;  %s1404_s14 = scalar_lea.vmem [#allocation23], %s5756_s8  ;;  %s1057_s17 = sadd.s32 1, %s4931_s17  }
 0x17e   : >> { %v4444_v38 = vadd.s32 4294967169, %v1253_v36  ;;  %v1257_v17 = vor.u32 8388608, %v1256_v29  ;;  %s1407_s27 = scalar_lea.vmem [#allocation23], %s5760_s1  ;;  %s5895_s1 = scalar_lea.vmem [#allocation4], %s4443_s16 }
 0x17f   : >> { %v1085_v35 = vadd.s32 1, %v4440_v32  ;;  %v5501_v40 = vshll.u32 %v1083_v34, 8  ;;  %p1054_p5 = scmp.ge.s32.totalorder %s1057_s17, 8  }
 0x180   : >> { %v1259_v43 = vadd.s32 1, %v4444_v38  ;;  %v5535_v38 = vshll.u32 %v1257_v17, 8 }
 0x181   : >> { %vm1086_vm2 = vcmp.gt.s32.totalorder %v1085_v35, 0  ;;  %v1124_v56 = vand.u32 65535, %v5501_v40  ;;  %v1125_v57 = vshrl.u32 %v5501_v40, 16 }
 0x182   : >> { %v1087_v39 = vsel %vm1086_vm2, %v1085_v35, 0  ;;  %vm1260_vm5 = vcmp.gt.s32.totalorder %v1259_v43, 0 }
 0x183   : >> { %v1088_v41 = vshrl.u32 %v1087_v39, 5  ;;  %v1089_v42 = vand.u32 31, %v1087_v39  ;;  %v1261_v8 = vsel %vm1260_vm5, %v1259_v43, 0 }
 0x184   : >> { %v1263_v21 = vand.u32 31, %v1261_v8  ;;  %v5524_v26 = vshrl.u32 %v1261_v8, 5 }
 0x185   : >> { %v1090_v45 = vsub.s32 32, %v1089_v42  ;;  %v1092_v47 = vshll.u32 %v4944_v46, %v1089_v42  ;;  %v1095_v49 = vshll.u32 %v4945_v48, %v1089_v42  ;;  %v1098_v51 = vshll.u32 %v4946_v50, %v1089_v42 }
 0x186   : >> { %v1101_v53 = vshll.u32 %v4947_v52, %v1089_v42  ;;  %v1104_v55 = vshll.u32 %v4948_v54, %v1089_v42  ;;  %vm1107_vm3 = vcmp.lt.s32.totalorder %v1088_v41, 1  ;;  %vm1110_vm4 = vcmp.lt.s32.totalorder %v1088_v41, 4 }
 0x187   : >> { %v1093_v58 = vshrl.u32 %v4945_v48, %v1090_v45  ;;  %v1096_v59 = vshrl.u32 %v4946_v50, %v1090_v45  ;;  %v1099_v60 = vshrl.u32 %v4947_v52, %v1090_v45  ;;  %v1091_v61 = vshrl.u32 %v4944_v46, %v1090_v45 }
 0x188   : >> { %v1102_v4 = vshrl.u32 %v4948_v54, %v1090_v45  ;;  %v1105_v63 = vshrl.u32 %v4949_v62, %v1090_v45  ;;  %vm1109_vm6 = vcmp.lt.s32.totalorder %v1088_v41, 3  ;;  %vm1108_vm7 = vcmp.lt.s32.totalorder %v1088_v41, 2 }
 0x189   : >> { %v1094_v2 = vor.u32 %v1093_v58, %v1092_v47  ;;  %v1097_v3 = vor.u32 %v1096_v59, %v1095_v49  ;;  %v1100_v5 = vor.u32 %v1099_v60, %v1098_v51  ;;  %v5532_v35 = vsub.s32 32, %v1263_v21 }
 0x18a   : >> { %v1103_v6 = vor.u32 %v1102_v4, %v1101_v53  ;;  %v1106_v7 = vor.u32 %v1105_v63, %v1104_v55  ;;  %v1266_v36 = vshll.u32 %v4944_v46, %v1263_v21  ;;  %v1269_v29 = vshll.u32 %v4945_v48, %v1263_v21 }
 0x18b   : >> { %v1112_v9 = vsel %vm1110_vm4, %v1100_v5, 2102212464  ;;  %v1115_v10 = vsel %vm1107_vm3, %v1094_v2, %v1097_v3  ;;  %v1119_v12 = vsel %vm1107_vm3, %v1097_v3, %v1100_v5  ;;  %v1111_v13 = vsel %vm1107_vm3, %v1091_v61, %v1094_v2 }
 0x18c   : >> { %v1116_v14 = vsel %vm1110_vm4, %v1103_v6, 920167782  ;;  %v1120_v15 = vsel %vm1110_vm4, %v1106_v7, 1326507024  ;;  %v1113_v18 = vsel %vm1109_vm6, %v1097_v3, %v1112_v9  ;;  %v1272_v47 = vshll.u32 %v4946_v50, %v1263_v21 }
 0x18d   : >> { %v1117_v19 = vsel %vm1109_vm6, %v1100_v5, %v1116_v14  ;;  %v1121_v20 = vsel %vm1109_vm6, %v1103_v6, %v1120_v15  ;;  %v5530_v34 = vsel %vm1108_vm7, %v1111_v13, %v1113_v18  ;;  %vm1281_vm8 = vcmp.lt.s32.totalorder %v5524_v26, 1 }
 0x18e   : >> { %v1118_v22 = vsel %vm1108_vm7, %v1115_v10, %v1117_v19  ;;  %v1122_v24 = vsel %vm1108_vm7, %v1119_v12, %v1121_v20  ;;  %v1267_v63 = vshrl.u32 %v4945_v48, %v5532_v35  ;;  %v1273_v15 = vshrl.u32 %v4947_v52, %v5532_v35 }
 0x18f   : >> { %v1126_v28 = vand.u32 65535, %v1122_v24  ;;  %v1127_v30 = vshrl.u32 %v1122_v24, 16  ;;  %v1148_v32 = vand.u32 65535, %v1118_v22  ;;  %v1149_v33 = vshrl.u32 %v1118_v22, 16 }
 0x190   : >> { %v1268_v10 = vor.u32 %v1267_v63, %v1266_v36  ;;  %v1275_v18 = vshll.u32 %v4947_v52, %v1263_v21  ;;  %v1276_v19 = vshrl.u32 %v4948_v54, %v5532_v35  ;;  %v1278_v20 = vshll.u32 %v4948_v54, %v1263_v21 }
 0x191   : >> { %v1128_v11 = vmul.u32 %v1126_v28, %v1124_v56  ;;  %v1129_v39 = vmul.u32 %v1127_v30, %v1124_v56  ;;  %v1130_v42 = vmul.u32 %v1126_v28, %v1125_v57  ;;  %v1150_v43 = vmul.u32 %v1148_v32, %v1124_v56 }
 0x192   : >> { %v1151_v44 = vmul.u32 %v1149_v33, %v1124_v56  ;;  %v1152_v45 = vmul.u32 %v1148_v32, %v1125_v57  ;;  %v1131_v49 = vmul.u32 %v1127_v30, %v1125_v57  ;;  %v1153_v53 = vmul.u32 %v1149_v33, %v1125_v57 }
 0x193   : >> { %v1132_v41 = vshll.u32 %v1129_v39, 16  ;;  %v1134_v51 = vshll.u32 %v1130_v42, 16  ;;  %v1133_v55 = vshrl.u32 %v1129_v39, 16  ;;  %v1135_v58 = vshrl.u32 %v1130_v42, 16 }
 0x194   : >> { %v1154_v59 = vshll.u32 %v1151_v44, 16  ;;  %v1156_v60 = vshll.u32 %v1152_v45, 16  ;;  %v1155_v4 = vshrl.u32 %v1151_v44, 16  ;;  %v4950_v56 = vmov 0  }
 0x195   : >> { %vm1136_vm9 = vc.u32 %v1128_v11, %v1132_v41  ;;  %v1138_v61 = vadd.s32 %v1132_v41, %v1128_v11  ;;  %v1270_v57 = vshrl.u32 %v4946_v50, %v5532_v35  ;;  %v1157_v6 = vshrl.u32 %v1152_v45, 16 }
 0x196   : >> { %v1137_v2 = vsel %vm1136_vm9, 1, %v4950_v56  ;;  %vm1158_vm10 = vc.u32 %v1150_v43, %v1154_v59  ;;  %v1160_v3 = vadd.s32 %v1154_v59, %v1150_v43  ;;  %v1274_v28 = vor.u32 %v1273_v15, %v1272_v47 }
 0x197   : >> { %v1139_v5 = vadd.s32 %v1137_v2, %v1131_v49  ;;  %vm1140_vm11 = vc.u32 %v1138_v61, %v1134_v51  ;;  %v1159_v7 = vsel %vm1158_vm10, 1, %v4950_v56  ;;  %v1271_v14 = vor.u32 %v1270_v57, %v1269_v29 }
 0x198   : >> { %v1141_v8 = vsel %vm1140_vm11, 1, %v4950_v56  ;;  %v1161_v9 = vadd.s32 %v1159_v7, %v1153_v53  ;;  %vm1162_vm12 = vc.u32 %v1160_v3, %v1156_v60  ;;  %v5554_v24 = vadd.s32 %v1160_v3, %v1156_v60 }
 0x199   : >> { %v1143_v12 = vadd.s32 %v1141_v8, %v1139_v5  ;;  %v1163_v13 = vsel %vm1162_vm12, 1, %v4950_v56  ;;  %v1279_v30 = vshrl.u32 %v4949_v62, %v5532_v35  ;;  %v1277_v33 = vor.u32 %v1276_v19, %v1275_v18 }
 0x19a   : >> { %v1165_v17 = vadd.s32 %v1163_v13, %v1161_v9  ;;  %vm1283_vm13 = vcmp.lt.s32.totalorder %v5524_v26, 3  ;;  %vm1284_vm14 = vcmp.lt.s32.totalorder %v5524_v26, 4  ;;  %vm1282_vm15 = vcmp.lt.s32.totalorder %v5524_v26, 2 }
 0x19b   : >> { %v1144_v22 = vadd.s32 %v1143_v12, %v1133_v55  ;;  %v1280_v11 = vor.u32 %v1279_v30, %v1278_v20  ;;  %v1289_v21 = vsel %vm1281_vm8, %v1268_v10, %v1271_v14  ;;  %v1290_v42 = vsel %vm1284_vm14, %v1277_v33, 920167782 }
 0x19c   : >> { %v1166_v32 = vadd.s32 %v1165_v17, %v1155_v4  ;;  %v1426_v29 = vand.u32 2139095040, %v5527_v27  ;;  %v1168_v43 = vmul.u32 %v5501_v40, %v5530_v34  ;;  %v1291_v44 = vsel %vm1283_vm13, %v1274_v28, %v1290_v42 }
 0x19d   : >> { %v5560_v36 = vadd.s32 %v1144_v22, %v1135_v58  ;;  %v1298_v45 = vand.u32 65535, %v5535_v38  ;;  %v1292_v49 = vsel %vm1282_vm15, %v1289_v21, %v1291_v44  ;;  %v1293_v41 = vsel %vm1281_vm8, %v1271_v14, %v1274_v28 }
 0x19e   : >> { %v1167_v39 = vadd.s32 %v1166_v32, %v1157_v6  ;;  %v1294_v51 = vsel %vm1284_vm14, %v1280_v11, 1326507024  ;;  %v1299_v34 = vshrl.u32 %v5535_v38, 16  ;;  %v1322_v53 = vand.u32 65535, %v1292_v49 }
 0x19f   : >> { %vm1170_vm0 = vc.u32 %v5560_v36, %v5554_v24  ;;  %v1295_v40 = vsel %vm1283_vm13, %v1277_v33, %v1294_v51  ;;  %v1323_v55 = vshrl.u32 %v1292_v49, 16  ;;  %v1265_v61 = vshrl.u32 %v4944_v46, %v5532_v35 }
 0x1a0   : >> { %v1171_v47 = vadd.s32 1, %v1167_v39  ;;  %v1296_v59 = vsel %vm1282_vm15, %v1293_v41, %v1295_v40  ;;  %v1286_v2 = vsel %vm1284_vm14, %v1274_v28, 2102212464  ;;  %v1326_v57 = vmul.u32 %v1322_v53, %v1299_v34 }
 0x1a1   : >> { %v1300_v4 = vand.u32 65535, %v1296_v59  ;;  %v1301_v63 = vshrl.u32 %v1296_v59, 16  ;;  %v1325_v3 = vmul.u32 %v1323_v55, %v1298_v45  ;;  %v1427_v8 = vshrl.u32 %v1426_v29, 23 }
 0x1a2   : >> { %v1172_v58 = vsel %vm1170_vm0, %v1171_v47, %v1167_v39  ;;  %v1324_v12 = vmul.u32 %v1322_v53, %v1298_v45  ;;  %v1423_v15 = vand.u32 2147483647, %v5527_v27  ;;  %v1285_v35 = vsel %vm1281_vm8, %v1265_v61, %v1268_v10 }
 0x1a3   : >> { %v1173_v60 = vadd.s32 %v1172_v58, %v1168_v43  ;;  %v1302_v6 = vmul.u32 %v1300_v4, %v1298_v45  ;;  %v1303_v7 = vmul.u32 %v1301_v63, %v1298_v45  ;;  %v1304_v9 = vmul.u32 %v1300_v4, %v1299_v34 }
 0x1a4   : >> { %v1328_v13 = vshll.u32 %v1325_v3, 16  ;;  %v1305_v18 = vmul.u32 %v1301_v63, %v1299_v34  ;;  %v1287_v20 = vsel %vm1283_vm13, %v1271_v14, %v1286_v2  ;;  %v1327_v28 = vmul.u32 %v1323_v55, %v1299_v34 }
 0x1a5   : >> { %v1174_v5 = vadd.s32 536870912, %v1173_v60  ;;  %v1306_v19 = vshll.u32 %v1303_v7, 16  ;;  %v1308_v22 = vshll.u32 %v1304_v9, 16  ;;  %v1330_v30 = vshll.u32 %v1326_v57, 16 }
 0x1a6   : >> { %v4447_v11 = vadd.s32 4294967169, %v1427_v8  ;;  %v1307_v39 = vshrl.u32 %v1303_v7, 16  ;;  %vm1332_vm2 = vc.u32 %v1324_v12, %v1328_v13  ;;  %v1334_v42 = vadd.s32 %v1328_v13, %v1324_v12 }
 0x1a7   : >> { %v1175_v17 = vshrl.u32 %v1174_v5, 30  ;;  %vm1310_vm1 = vc.u32 %v1302_v6, %v1306_v19  ;;  %v1312_v33 = vadd.s32 %v1306_v19, %v1302_v6  ;;  %v1329_v43 = vshrl.u32 %v1325_v3, 16 }
 0x1a8   : >> { %v1311_v21 = vsel %vm1310_vm1, 1, %v4950_v56  ;;  %v1309_v14 = vshrl.u32 %v1304_v9, 16  ;;  %v1333_v45 = vsel %vm1332_vm2, 1, %v4950_v56  ;;  %vm1336_vm4 = vc.u32 %v1334_v42, %v1330_v30 }
 0x1a9   : >> { %v1176_v32 = vshll.u32 %v1175_v17, 30  ;;  %v1313_v29 = vadd.s32 %v1311_v21, %v1305_v18  ;;  %vm1314_vm3 = vc.u32 %v1312_v33, %v1308_v22  ;;  %v1335_v41 = vadd.s32 %v1333_v45, %v1327_v28 }
 0x1aa   : >> { %v1315_v44 = vsel %vm1314_vm3, 1, %v4950_v56  ;;  %v1337_v51 = vsel %vm1336_vm4, 1, %v4950_v56  ;;  %v1433_v40 = vadd.s32 1, %v4447_v11  ;;  %v1331_v55 = vshrl.u32 %v1326_v57, 16 }
 0x1ab   : >> { %v1177_v10 = vsub.s32 %v1173_v60, %v1176_v32  ;;  %v1317_v49 = vadd.s32 %v1315_v44, %v1313_v29  ;;  %v1339_v58 = vadd.s32 %v1337_v51, %v1335_v41  ;;  %v1288_v60 = vsel %vm1282_vm15, %v1285_v35, %v1287_v20 }
 0x1ac   : >> { %v5605_v61 = vadd.s32 %v1334_v42, %v1330_v30  ;;  %vm1434_vm6 = vcmp.gt.s32.totalorder %v1433_v40, 0  ;;  %v1430_v2 = vand.u32 8388607, %v1423_v15  ;;  %v1199_v5 = vsub.s32 4, %v1175_v17 }
 0x1ad   : >> { %vm1178_vm5 = vcmp.lt.s32.totalorder %v1177_v10, 0  ;;  %v1179_v47 = vsub.s32 0, %v1177_v10  ;;  %v1318_v53 = vadd.s32 %v1317_v49, %v1307_v39  ;;  %v1340_v63 = vadd.s32 %v1339_v58, %v1329_v43 }
 0x1ae   : >> { %v1435_v3 = vsel %vm1434_vm6, %v1433_v40, 0  ;;  %v1169_v26 = vadd.s32 %v5554_v24, %v5560_v36  ;;  %v1342_v8 = vmul.u32 %v5535_v38, %v1288_v60  ;;  %vm1077_vm9 = vcmp.lt.s32.totalorder %v5488_v23, 0 }
 0x1af   : >> { %v1180_v34 = vsel %vm1178_vm5, %v1179_v47, %v1177_v10  ;;  %v5607_v4 = vadd.s32 %v1318_v53, %v1309_v14  ;;  %v1341_v6 = vadd.s32 %v1340_v63, %v1331_v55  ;;  %v1437_v7 = vand.u32 31, %v1435_v3 }
 0x1b0   : >> { %v1181_v59 = vclz %v1180_v34  ;;  %v1431_v13 = vor.u32 8388608, %v1430_v2  ;;  %v5629_v36 = vsel %vm1077_vm9, %v1199_v5, %v1175_v17  ;;  %v1592_v20 = vstv %s1591_s6  ;;  %v1231_v5 = vld [vmem:[%s1230_s29] sm:$0x1]  ;;  %s5779_s6 = sld [smem:[%s5368_s12 + %s5460_s26]]  ;;  %s5814_s29 = scalar_lea.vmem [#allocation3], %s4443_s16 }
 0x1b1   : >> { %vm1344_vm8 = vc.u32 %v5607_v4, %v5605_v61  ;;  %v1345_v12 = vadd.s32 1, %v1341_v6  ;;  %v1438_v19 = vsub.s32 32, %v1437_v7  ;;  %vm5633_vm10 = vcmp.le.f32.partialorder %v1075_v25, 0.7853982  ;;  %s5934_s16 = sld [smem:[%s5338_s18 + %s5479_s2]] }
 0x1b2   : >> { %v4441_v57 = vadd.s32 4294967294, %v1181_v59  ;;  %v1202_v33 = vsel %vm5633_vm10, 0, %v5629_v36  ;;  %v5644_v17 = vshll.u32 %v1431_v13, 8  ;;  %v5647_v42 = vmul.f32 %v1592_v20, %v5389_v0 }
 0x1b3   : >> { %v1346_v38 = vsel %vm1344_vm8, %v1345_v12, %v1341_v6  ;;  %v1443_v25 = vshll.u32 %v4945_v48, %v1437_v7  ;;  %v1446_v29 = vshll.u32 %v4946_v50, %v1437_v7  ;;  %v1447_v43 = vshrl.u32 %v4947_v52, %v1438_v19  ;;  %v1234_v6 = vld [vmem:[%s1233_s30] sm:$0x1]  ;;  %s5825_s30 = sld [smem:[%s5355_s7 + %s5801_s5]] }
 0x1b4   : >> { %vm4442_vm7 = vcmp.lt.s32.totalorder %v4441_v57, 0  ;;  %v1347_v32 = vadd.s32 %v1346_v38, %v1342_v8  ;;  %vm1251_vm11 = vcmp.lt.s32.totalorder %v5496_v31, 0  ;;  %v5654_v47 = vshrl.u32 %v1435_v3, 5  ;;  %v1238_v38 = vld [vmem:[%s1237_s22] sm:$0x1] }
 0x1b5   : >> { %v1184_v9 = vsel %vm4442_vm7, 0, %v4441_v57  ;;  %v1449_v49 = vshll.u32 %v4947_v52, %v1437_v7  ;;  %v1450_v41 = vshrl.u32 %v4948_v54, %v1438_v19  ;;  %v1452_v51 = vshll.u32 %v4948_v54, %v1437_v7 }
 0x1b6   : >> { %v1185_v35 = vsub.s32 32, %v1184_v9  ;;  %v1186_v18 = vshll.u32 %v1177_v10, %v1184_v9  ;;  %v1189_v24 = vsub.s32 4294967266, %v1184_v9  ;;  %v1348_v21 = vadd.s32 536870912, %v1347_v32  ;;  %s1411_s22 = scalar_lea.vmem [#allocation24], %s5779_s6  ;;  %s5942_s6 = sld [smem:[%s5345_s28 + %s5479_s2]] }
 0x1b7   : >> { %v1444_v10 = vshrl.u32 %v4946_v50, %v1438_v19  ;;  %v1453_v40 = vshrl.u32 %v4949_v62, %v1438_v19  ;;  %v1440_v55 = vshll.u32 %v4944_v46, %v1437_v7  ;;  %v5662_v58 = vand.u32 65535, %v5644_v17 }
 0x1b8   : >> { %v1187_v28 = vshrl.u32 %v1169_v26, %v1185_v35  ;;  %v1190_v30 = vadd.s32 127, %v1189_v24  ;;  %v1349_v45 = vshrl.u32 %v1348_v21, 30  ;;  %vm5666_vm12 = vcmp.le.f32.partialorder %v1249_v37, 0.7853982 }
 0x1b9   : >> { %v1441_v60 = vshrl.u32 %v4945_v48, %v1438_v19  ;;  %v5671_v63 = vor.u32 %v1444_v10, %v1443_v25  ;;  %v1448_v2 = vor.u32 %v1447_v43, %v1446_v29  ;;  %v1454_v3 = vor.u32 %v1453_v40, %v1452_v51  ;;  %s1764_s8 = ssub.f32 %s5471_s15, %s5825_s30 }
 0x1ba   : >> { %v1188_v11 = vor.u32 %v1187_v28, %v1186_v18  ;;  %v1191_v39 = vshll.u32 %v1190_v30, 23  ;;  %v1350_v53 = vshll.u32 %v1349_v45, 30  ;;  %vm1455_vm13 = vcmp.lt.s32.totalorder %v5654_v47, 1  ;;  %s5984_s30 = sld [smem:[%s5348_s21 + %s5479_s2]] }
 0x1bb   : >> { %vm1458_vm14 = vcmp.lt.s32.totalorder %v5654_v47, 4  ;;  %v1373_v37 = vsub.s32 4, %v1349_v45  ;;  %v1451_v26 = vor.u32 %v1450_v41, %v1449_v49  ;;  %vm1457_vm15 = vcmp.lt.s32.totalorder %v5654_v47, 3 }
 0x1bc   : >> { %v1192_v14 = vor.u32 4788187, %v1191_v39  ;;  %v1195_v44 = vcvt.s32.f32 %v1188_v11  ;;  %v5675_v7 = vsub.s32 %v1347_v32, %v1350_v53  ;;  %v5681_v8 = vshrl.u32 %v5644_v17, 16 }
 0x1bd   : >> { %vm1456_vm1 = vcmp.lt.s32.totalorder %v5654_v47, 2  ;;  %v1235_v13 = vadd.f32 %v1234_v6, %v1231_v5  ;;  %v1439_v35 = vshrl.u32 %v4944_v46, %v1438_v19  ;;  %v1467_v18 = vsel %vm1455_vm13, %v5671_v63, %v1448_v2 }
 0x1be   : >> { %v1193_v34 = vand.u32 2147483647, %v1192_v14  ;;  %vm1352_vm0 = vcmp.lt.s32.totalorder %v5675_v7, 0  ;;  %v1353_v12 = vsub.s32 0, %v5675_v7  ;;  %v1468_v24 = vsel %vm1458_vm14, %v1454_v3, 1326507024 }
 0x1bf   : >> { %v1442_v28 = vor.u32 %v1441_v60, %v1440_v55  ;;  %v1469_v30 = vsel %vm1457_vm15, %v1451_v26, %v1468_v24  ;;  %v5705_v11 = vsel %vm1251_vm11, %v1373_v37, %v1349_v45  ;;  %v1464_v25 = vsel %vm1458_vm14, %v1451_v26, 920167782 }
 0x1c0   : >> { %v1196_v57 = vmul.f32 %v1195_v44, %v1193_v34  ;;  %v1354_v20 = vsel %vm1352_vm0, %v1353_v12, %v5675_v7  ;;  %v1470_v39 = vsel %vm1456_vm1, %v1467_v18, %v1469_v30  ;;  %v5713_v43 = vand.u32 3, %v1202_v33 }
 0x1c1   : >> { %v1355_v32 = vclz %v1354_v20  ;;  %v1474_v10 = vand.u32 65535, %v1470_v39  ;;  %v1475_v29 = vshrl.u32 %v1470_v39, 16  ;;  %v5715_v22 = vadd.f32 %v1238_v38, %v1235_v13 }
 0x1c2   : >> { %v1197_v9 = vxor.u32 2147483648, %v1196_v57  ;;  %v1343_v14 = vadd.s32 %v5605_v61, %v5607_v4  ;;  %v1376_v41 = vsel %vm5666_vm12, 0, %v5705_v11  ;;  %v5724_v51 = vsel %vm1455_vm13, %v1439_v35, %v1442_v28  ;;  %v1412_v11 = vld [vmem:[%s1411_s22] sm:$0x1]  ;;  %s1581_s22 = scalar_lea.vmem [#allocation23], %s5942_s6  ;;  %s6069_s6 = sld [smem:[%s5358_s0 + %s5479_s2]] }
 0x1c3   : >> { %v4445_v44 = vadd.s32 4294967294, %v1355_v32  ;;  %v1463_v33 = vsel %vm1455_vm13, %v1442_v28, %v5671_v63  ;;  %v1465_v40 = vsel %vm1457_vm15, %v1448_v2, %v1464_v25  ;;  %v5732_v61 = vmul.u32 %v1475_v29, %v5662_v58 }
 0x1c4   : >> { %v1198_v36 = vsel %vm1077_vm9, %v1197_v9, %v1196_v57  ;;  %v5735_v55 = vmul.u32 %v1474_v10, %v5681_v8  ;;  %vm1224_vm3 = vcmp.eq.s32.totalorder %v5713_v43, 2  ;;  %v1460_v5 = vsel %vm1458_vm14, %v1448_v2, 2102212464 }
 0x1c5   : >> { %v5701_v19 = vsel %vm5633_vm10, %v5488_v23, %v1198_v36  ;;  %vm4446_vm2 = vcmp.lt.s32.totalorder %v4445_v44, 0  ;;  %v1466_v26 = vsel %vm1456_vm1, %v1463_v33, %v1465_v40  ;;  %v1476_v9 = vmul.u32 %v1474_v10, %v5662_v58 }
 0x1c6   : >> { %v1203_v21 = vmul.f32 %v5701_v19, %v5701_v19  ;;  %v1358_v53 = vsel %vm4446_vm2, 0, %v4445_v44  ;;  %vm1221_vm4 = vcmp.eq.s32.totalorder %v5713_v43, 0  ;;  %v1480_v35 = vshll.u32 %v5732_v61, 16 }
 0x1c7   : >> { %v1359_v60 = vsub.s32 32, %v1358_v53  ;;  %v1360_v3 = vshll.u32 %v5675_v7, %v1358_v53  ;;  %v1363_v57 = vsub.s32 4294967266, %v1358_v53  ;;  %v1496_v7 = vand.u32 65535, %v1466_v26 }
 0x1c8   : >> { %v1204_v45 = vmul.f32 -0.001358992, %v1203_v21  ;;  %v1211_v49 = vmul.f32 -0.00019511016, %v1203_v21  ;;  %vm1220_vm5 = vcmp.lt.s32.totalorder %v5713_v43, 2  ;;  %v1479_v2 = vmul.u32 %v1475_v29, %v5681_v8 }
 0x1c9   : >> { %v1361_v12 = vshrl.u32 %v1343_v14, %v1359_v60  ;;  %v1364_v13 = vadd.s32 127, %v1363_v57  ;;  %v1482_v36 = vshll.u32 %v5735_v55, 16  ;;  %vm1218_vm6 = vweird.f32 %v5488_v23  ;;  %v1405_v23 = vld [vmem:[%s1404_s14] sm:$0x1]  ;;  %s5968_s14 = sld [smem:[%s5375_s13 + %s5801_s5]] }
 0x1ca   : >> { %v1205_v4 = vadd.f32 0.041655596, %v1204_v45  ;;  %v1212_v34 = vadd.f32 0.008332121, %v1211_v49  ;;  %v1497_v28 = vshrl.u32 %v1466_v26, 16  ;;  %v5752_v30 = vadd.f32 %v5647_v42, %v5394_v1 }
 0x1cb   : >> { %v1362_v38 = vor.u32 %v1361_v12, %v1360_v3  ;;  %v1365_v20 = vshll.u32 %v1364_v13, 23  ;;  %vm1484_vm7 = vc.u32 %v1476_v9, %v1480_v35  ;;  %v1486_v25 = vadd.s32 %v1480_v35, %v1476_v9 }
 0x1cc   : >> { %v1206_v6 = vmul.f32 %v1205_v4, %v1203_v21  ;;  %v1213_v37 = vmul.f32 %v1212_v34, %v1203_v21  ;;  %v1485_v29 = vsel %vm1484_vm7, 1, %v4950_v56  ;;  %v1498_v44 = vmul.u32 %v1496_v7, %v5662_v58 }
 0x1cd   : >> { %v1366_v10 = vor.u32 4788187, %v1365_v20  ;;  %v1369_v14 = vcvt.s32.f32 %v1362_v38  ;;  %v1487_v33 = vadd.s32 %v1485_v29, %v1479_v2  ;;  %vm1488_vm8 = vc.u32 %v1486_v25, %v1482_v36  ;;  %v1408_v25 = vld [vmem:[%s1407_s27] sm:$0x1]  ;;  %s1578_s27 = scalar_lea.vmem [#allocation23], %s5934_s16  ;;  %s1585_s16 = scalar_lea.vmem [#allocation24], %s5984_s30 }
 0x1ce   : >> { %v1207_v18 = vadd.f32 -0.4999988, %v1206_v6  ;;  %v1214_v24 = vadd.f32 -0.16666654, %v1213_v37  ;;  %v1499_v40 = vmul.u32 %v1497_v28, %v5662_v58  ;;  %v1500_v4 = vmul.u32 %v1496_v7, %v5681_v8 }
 0x1cf   : >> { %v1367_v42 = vand.u32 2147483647, %v1366_v10  ;;  %v1481_v60 = vshrl.u32 %v5732_v61, 16  ;;  %v1501_v6 = vmul.u32 %v1497_v28, %v5681_v8  ;;  %v1461_v58 = vsel %vm1457_vm15, %v5671_v63, %v1460_v5 }
 0x1d0   : >> { %v1208_v32 = vmul.f32 %v1207_v18, %v1203_v21  ;;  %v1215_v39 = vmul.f32 %v1214_v24, %v1203_v21  ;;  %v1489_v21 = vsel %vm1488_vm8, 1, %v4950_v56  ;;  %v1502_v37 = vshll.u32 %v1499_v40, 16 }
 0x1d1   : >> { %v1491_v3 = vadd.s32 %v1489_v21, %v1487_v33  ;;  %v1370_v57 = vmul.f32 %v1369_v14, %v1367_v42  ;;  %v1504_v26 = vshll.u32 %v1500_v4, 16  ;;  %v1483_v13 = vshrl.u32 %v5735_v55, 16 }
 0x1d2   : >> { %v1209_v45 = vadd.f32 1.0, %v1208_v32  ;;  %v1216_v49 = vadd.f32 1.0, %v1215_v39  ;;  %v1503_v61 = vshrl.u32 %v1499_v40, 16  ;;  %vm1506_vm9 = vc.u32 %v1498_v44, %v1502_v37 }
 0x1d3   : >> { %v1508_v35 = vadd.s32 %v1502_v37, %v1498_v44  ;;  %v1492_v7 = vadd.s32 %v1491_v3, %v1481_v60  ;;  %v1507_v18 = vsel %vm1506_vm9, 1, %v4950_v56  ;;  %v1598_v24 = vand.u32 2139095040, %v5752_v30 }
 0x1d4   : >> { %v1217_v34 = vmul.f32 %v1216_v49, %v5701_v19  ;;  %v1225_v53 = vxor.u32 2147483648, %v1209_v45  ;;  %v1371_v19 = vxor.u32 2147483648, %v1370_v57  ;;  %v1509_v5 = vadd.s32 %v1507_v18, %v1501_v6 }
 0x1d5   : >> { %vm1510_vm10 = vc.u32 %v1508_v35, %v1504_v26  ;;  %v1505_v38 = vshrl.u32 %v1500_v4, 16  ;;  %v1599_v39 = vshrl.u32 %v1598_v24, 23  ;;  %v1462_v10 = vsel %vm1456_vm1, %v5724_v51, %v1461_v58 }
 0x1d6   : >> { %v1222_v9 = vxor.u32 2147483648, %v1217_v34  ;;  %v1226_v12 = vsel %vm1224_vm3, %v1225_v53, %v1217_v34  ;;  %v1372_v55 = vsel %vm1251_vm11, %v1371_v19, %v1370_v57  ;;  %v1511_v20 = vsel %vm1510_vm10, 1, %v4950_v56 }
 0x1d7   : >> { %v5794_v36 = vsel %vm5666_vm12, %v5496_v31, %v1372_v55  ;;  %v1513_v32 = vadd.s32 %v1511_v20, %v1509_v5  ;;  %v5808_v14 = vadd.s32 %v1492_v7, %v1483_v13  ;;  %v4450_v49 = vadd.s32 4294967169, %v1599_v39 }
 0x1d8   : >> { %v1223_v8 = vsel %vm1221_vm4, %v1209_v45, %v1222_v9  ;;  %v1377_v28 = vmul.f32 %v5794_v36, %v5794_v36  ;;  %v5821_v47 = vand.u32 3, %v1376_v41  ;;  %v1409_v40 = vadd.f32 %v1408_v25, %v1405_v23 }
 0x1d9   : >> { %v1227_v63 = vsel %vm1220_vm5, %v1223_v8, %v1226_v12  ;;  %v1514_v45 = vadd.s32 %v1513_v32, %v1503_v61  ;;  %v1605_v21 = vadd.s32 1, %v4450_v49  ;;  %v1516_v4 = vmul.u32 %v5644_v17, %v1462_v10 }
 0x1da   : >> { %v1228_v2 = vsel %vm1218_vm6, nan, %v1227_v63  ;;  %v1378_v29 = vmul.f32 -0.001358992, %v1377_v28  ;;  %v1385_v44 = vmul.f32 -0.00019511016, %v1377_v28  ;;  %vm1394_vm13 = vcmp.lt.s32.totalorder %v5821_v47, 2 }
 0x1db   : >> { %v1240_v43 = vadd.f32 %v5715_v22, %v1228_v2  ;;  %v5810_v22 = vadd.s32 %v1508_v35, %v1504_v26  ;;  %v1515_v42 = vadd.s32 %v1514_v45, %v1505_v38  ;;  %v1595_v34 = vand.u32 2147483647, %v5752_v30 }
 0x1dc   : >> { %v1379_v51 = vadd.f32 0.041655596, %v1378_v29  ;;  %v1386_v33 = vadd.f32 0.008332121, %v1385_v44  ;;  %vm1606_vm12 = vcmp.gt.s32.totalorder %v1605_v21, 0  ;;  %vm1392_vm14 = vweird.f32 %v5496_v31 }
 0x1dd   : >> { %1243 = vst [vmem:[%s5814_s29] sm:$0x1] %v1240_v43  ;;  %vm1518_vm11 = vc.u32 %v5808_v14, %v5810_v22  ;;  %v1519_v60 = vadd.s32 1, %v1515_v42  ;;  %v1607_v41 = vsel %vm1606_vm12, %v1605_v21, 0  ;;  %vm1395_vm15 = vcmp.eq.s32.totalorder %v5821_v47, 0 }
 0x1de   : >> { %v1380_v53 = vmul.f32 %v1379_v51, %v1377_v28  ;;  %v1387_v59 = vmul.f32 %v1386_v33, %v1377_v28  ;;  %vm1398_vm0 = vcmp.eq.s32.totalorder %v5821_v47, 2  ;;  %v1609_v37 = vand.u32 31, %v1607_v41 }
 0x1df   : >> { %v1520_v6 = vsel %vm1518_vm11, %v1519_v60, %v1515_v42  ;;  %v1413_v12 = vadd.f32 %v1412_v11, %v1409_v40  ;;  %v1602_v58 = vand.u32 8388607, %v1595_v34  ;;  %v5838_v19 = vshrl.u32 %v1607_v41, 5 }
 0x1e0   : >> { %v1381_v3 = vadd.f32 -0.4999988, %v1380_v53  ;;  %v1388_v57 = vadd.f32 -0.16666654, %v1387_v59  ;;  %v1521_v17 = vadd.s32 %v1520_v6, %v1516_v4  ;;  %v5840_v61 = vsub.s32 32, %v1609_v37 }
 0x1e1   : >> { %v1612_v35 = vshll.u32 %v4944_v46, %v1609_v37  ;;  %v1615_v18 = vshll.u32 %v4945_v48, %v1609_v37  ;;  %v1618_v24 = vshll.u32 %v4946_v50, %v1609_v37  ;;  %v1621_v2 = vshll.u32 %v4947_v52, %v1609_v37 }
 0x1e2   : >> { %v1382_v26 = vmul.f32 %v1381_v3, %v1377_v28  ;;  %v1389_v9 = vmul.f32 %v1388_v57, %v1377_v28  ;;  %v1522_v13 = vadd.s32 536870912, %v1521_v17  ;;  %v1613_v55 = vshrl.u32 %v4945_v48, %v5840_v61 }
 0x1e3   : >> { %v1616_v5 = vshrl.u32 %v4946_v50, %v5840_v61  ;;  %v1619_v43 = vshrl.u32 %v4947_v52, %v5840_v61  ;;  %v1622_v28 = vshrl.u32 %v4948_v54, %v5840_v61  ;;  %v1603_v39 = vor.u32 8388608, %v1602_v58 }
 0x1e4   : >> { %v1383_v8 = vadd.f32 1.0, %v1382_v26  ;;  %v1390_v7 = vadd.f32 1.0, %v1389_v9  ;;  %v5847_v63 = vshrl.u32 %v1522_v13, 30  ;;  %vm1627_vm1 = vcmp.lt.s32.totalorder %v5838_v19, 1 }
 0x1e5   : >> { %v1765_v23 = vstv %s1764_s8  ;;  %v5863_v29 = vor.u32 %v1613_v55, %v1612_v35  ;;  %v1623_v45 = vor.u32 %v1622_v28, %v1621_v2  ;;  %v1624_v49 = vshll.u32 %v4948_v54, %v1609_v37  ;;  %s1936_s8 = ssub.f32 %s5471_s15, %s5968_s14  ;;  %s6072_s14 = sadd.s32 3, %s5460_s26 }
 0x1e6   : >> { %v1391_v38 = vmul.f32 %v1390_v7, %v5794_v36  ;;  %v1399_v20 = vxor.u32 2147483648, %v1383_v8  ;;  %v1524_v32 = vshll.u32 %v5847_v63, 30  ;;  %v5865_v36 = vor.u32 %v1616_v5, %v1615_v18  ;;  %s6085_s30 = sld [smem:[%s5355_s7 + %s6072_s14]] }
 0x1e7   : >> { %v1625_v51 = vshrl.u32 %v4949_v62, %v5840_v61  ;;  %v1620_v42 = vor.u32 %v1619_v43, %v1618_v24  ;;  %vm1629_vm2 = vcmp.lt.s32.totalorder %v5838_v19, 3  ;;  %vm1630_vm3 = vcmp.lt.s32.totalorder %v5838_v19, 4 }
 0x1e8   : >> { %v1396_v25 = vxor.u32 2147483648, %v1391_v38  ;;  %v1400_v10 = vsel %vm1398_vm0, %v1399_v20, %v1391_v38  ;;  %v1525_v44 = vsub.s32 %v1521_v17, %v1524_v32  ;;  %vm1628_vm5 = vcmp.lt.s32.totalorder %v5838_v19, 2 }
 0x1e9   : >> { %v1626_v4 = vor.u32 %v1625_v51, %v1624_v49  ;;  %v1635_v59 = vsel %vm1627_vm1, %v5863_v29, %v5865_v36  ;;  %v1766_v60 = vmul.f32 %v1765_v23, %v5389_v0  ;;  %v1636_v47 = vsel %vm1630_vm3, %v1623_v45, 920167782 }
 0x1ea   : >> { %v1397_v33 = vsel %vm1395_vm15, %v1383_v8, %v1396_v25  ;;  %vm1526_vm4 = vcmp.lt.s32.totalorder %v1525_v44, 0  ;;  %v1527_v40 = vsub.s32 0, %v1525_v44  ;;  %v5886_v3 = vshll.u32 %v1603_v39, 8 }
 0x1eb   : >> { %v1401_v21 = vsel %vm1394_vm13, %v1397_v33, %v1400_v10  ;;  %v1637_v31 = vsel %vm1629_vm2, %v1620_v42, %v1636_v47  ;;  %v1639_v6 = vsel %vm1627_vm1, %v5865_v36, %v1620_v42  ;;  %v1640_v37 = vsel %vm1630_vm3, %v1626_v4, 1326507024 }
 0x1ec   : >> { %v1402_v53 = vsel %vm1392_vm14, nan, %v1401_v21  ;;  %v1528_v41 = vsel %vm1526_vm4, %v1527_v40, %v1525_v44  ;;  %v1638_v17 = vsel %vm1628_vm5, %v1635_v59, %v1637_v31  ;;  %v1641_v9 = vsel %vm1629_vm2, %v1623_v45, %v1640_v37 }
 0x1ed   : >> { %v1414_v11 = vadd.f32 %v1413_v12, %v1402_v53  ;;  %v1529_v57 = vclz %v1528_v41  ;;  %v5905_v12 = vadd.f32 %v1766_v60, %v5394_v1  ;;  %v1517_v58 = vadd.s32 %v5810_v22, %v5808_v14 }
 0x1ee   : >> { %v1547_v13 = vsub.s32 4, %v5847_v63  ;;  %v1642_v35 = vsel %vm1628_vm5, %v1639_v6, %v1641_v9  ;;  %v1644_v8 = vand.u32 65535, %v5886_v3  ;;  %v1645_v7 = vshrl.u32 %v5886_v3, 16 }
 0x1ef   : >> { %1416 = vst [vmem:[%s5895_s1] sm:$0x1] %v1414_v11  ;;  %v4448_v26 = vadd.s32 4294967294, %v1529_v57  ;;  %v1646_v18 = vand.u32 65535, %v1642_v35  ;;  %v1669_v24 = vshrl.u32 %v1638_v17, 16  ;;  %vm1425_vm7 = vcmp.lt.s32.totalorder %v5527_v27, 0 }
 0x1f0   : >> { %v1647_v5 = vshrl.u32 %v1642_v35, 16  ;;  %v1668_v2 = vand.u32 65535, %v1638_v17  ;;  %v1771_v22 = vand.u32 2139095040, %v5905_v12  ;;  %v5919_v43 = vsel %vm1425_vm7, %v1547_v13, %v5847_v63 }
 0x1f1   : >> { %vm4449_vm6 = vcmp.lt.s32.totalorder %v4448_v26, 0  ;;  %v1611_v28 = vshrl.u32 %v4944_v46, %v5840_v61  ;;  %v1648_v32 = vmul.u32 %v1646_v18, %v1644_v8  ;;  %v1650_v10 = vmul.u32 %v1646_v18, %v1645_v7 }
 0x1f2   : >> { %v1532_v55 = vsel %vm4449_vm6, 0, %v4448_v26  ;;  %v1649_v39 = vmul.u32 %v1647_v5, %v1644_v8  ;;  %v1671_v45 = vmul.u32 %v1669_v24, %v1644_v8  ;;  %vm5925_vm8 = vcmp.le.f32.partialorder %v1423_v15, 0.7853982 }
 0x1f3   : >> { %v1533_v38 = vsub.s32 32, %v1532_v55  ;;  %v1534_v20 = vshll.u32 %v1525_v44, %v1532_v55  ;;  %v1537_v14 = vsub.s32 4294967266, %v1532_v55  ;;  %v1632_v49 = vsel %vm1630_vm3, %v1620_v42, 2102212464 }
 0x1f4   : >> { %v1651_v63 = vmul.u32 %v1647_v5, %v1645_v7  ;;  %v1652_v51 = vshll.u32 %v1649_v39, 16  ;;  %v1672_v33 = vmul.u32 %v1668_v2, %v1645_v7  ;;  %v1654_v40 = vshll.u32 %v1650_v10, 16 }
 0x1f5   : >> { %v1535_v23 = vshrl.u32 %v1517_v58, %v1533_v38  ;;  %v1538_v25 = vadd.s32 127, %v1537_v14  ;;  %v1670_v4 = vmul.u32 %v1668_v2, %v1644_v8  ;;  %v1673_v15 = vmul.u32 %v1669_v24, %v1645_v7 }
 0x1f6   : >> { %vm1656_vm9 = vc.u32 %v1648_v32, %v1652_v51  ;;  %v1658_v53 = vadd.s32 %v1652_v51, %v1648_v32  ;;  %v1772_v59 = vshrl.u32 %v1771_v22, 23  ;;  %v1674_v42 = vshll.u32 %v1671_v45, 16 }
 0x1f7   : >> { %v1536_v21 = vor.u32 %v1535_v23, %v1534_v20  ;;  %v1539_v61 = vshll.u32 %v1538_v25, 23  ;;  %v1657_v41 = vsel %vm1656_vm9, 1, %v4950_v56  ;;  %v1653_v47 = vshrl.u32 %v1649_v39, 16 }
 0x1f8   : >> { %v1659_v57 = vadd.s32 %v1657_v41, %v1651_v63  ;;  %vm1660_vm10 = vc.u32 %v1658_v53, %v1654_v40  ;;  %v1676_v31 = vshll.u32 %v1672_v33, 16  ;;  %v1631_v17 = vsel %vm1627_vm1, %v1611_v28, %v5863_v29 }
 0x1f9   : >> { %v1540_v60 = vor.u32 4788187, %v1539_v61  ;;  %v1543_v11 = vcvt.s32.f32 %v1536_v21  ;;  %v1661_v37 = vsel %vm1660_vm10, 1, %v4950_v56  ;;  %vm1678_vm11 = vc.u32 %v1670_v4, %v1674_v42  ;;  %v1579_v61 = vld [vmem:[%s1578_s27] sm:$0x1]  ;;  %s6077_s27 = sld [smem:[%s5365_s3 + %s5479_s2]] }
 0x1fa   : >> { %v1663_v26 = vadd.s32 %v1661_v37, %v1659_v57  ;;  %v1679_v9 = vsel %vm1678_vm11, 1, %v4950_v56  ;;  %v1680_v58 = vadd.s32 %v1674_v42, %v1670_v4  ;;  %v4453_v13 = vadd.s32 4294967169, %v1772_v59 }
 0x1fb   : >> { %v1541_v6 = vand.u32 2147483647, %v1540_v60  ;;  %v1633_v8 = vsel %vm1629_vm2, %v5865_v36, %v1632_v49  ;;  %v1655_v7 = vshrl.u32 %v1650_v10, 16  ;;  %v1681_v18 = vadd.s32 %v1679_v9, %v1673_v15  ;;  %v1582_v60 = vld [vmem:[%s1581_s22] sm:$0x1]  ;;  %s6090_s22 = sld [smem:[%s5368_s12 + %s5479_s2]] }
 0x1fc   : >> { %v1664_v24 = vadd.s32 %v1663_v26, %v1653_v47  ;;  %v1675_v55 = vshrl.u32 %v1671_v45, 16  ;;  %vm1682_vm12 = vc.u32 %v1680_v58, %v1676_v31  ;;  %v1778_v29 = vadd.s32 1, %v4453_v13  ;;  %s2109_s2 = ssub.f32 %s5471_s15, %s6085_s30 }
 0x1fd   : >> { %v1544_v35 = vmul.f32 %v1543_v11, %v1541_v6  ;;  %v1550_v2 = vsel %vm5925_vm8, 0, %v5919_v43  ;;  %v1683_v38 = vsel %vm1682_vm12, 1, %v4950_v56  ;;  %v1768_v20 = vand.u32 2147483647, %v5905_v12  ;;  %s6244_s30 = sld [smem:[%s5345_s28 + %s5801_s5]] }
 0x1fe   : >> { %v1634_v36 = vsel %vm1628_vm5, %v1631_v17, %v1633_v8  ;;  %v1677_v14 = vshrl.u32 %v1672_v33, 16  ;;  %v1685_v22 = vadd.s32 %v1683_v38, %v1681_v18  ;;  %vm1779_vm13 = vcmp.gt.s32.totalorder %v1778_v29, 0 }
 0x1ff   : >> { %v1545_v5 = vxor.u32 2147483648, %v1544_v35  ;;  %v5957_v32 = vadd.s32 %v1664_v24, %v1655_v7  ;;  %v5959_v39 = vadd.s32 %v1680_v58, %v1676_v31  ;;  %v1780_v23 = vsel %vm1779_vm13, %v1778_v29, 0 }
 0x200   : >> { %v1686_v19 = vadd.s32 %v1685_v22, %v1675_v55  ;;  %v1782_v10 = vand.u32 31, %v1780_v23  ;;  %v5972_v45 = vand.u32 3, %v1550_v2  ;;  %v1688_v63 = vmul.u32 %v5886_v3, %v1634_v36 }
 0x201   : >> { %v1546_v28 = vsel %vm1425_vm7, %v1545_v5, %v1544_v35  ;;  %v1775_v44 = vand.u32 8388607, %v1768_v20  ;;  %vm1690_vm14 = vc.u32 %v5957_v32, %v5959_v39  ;;  %v5999_v26 = vshrl.u32 %v1780_v23, 5 }
 0x202   : >> { %v5964_v43 = vsel %vm5925_vm8, %v5527_v27, %v1546_v28  ;;  %v1687_v49 = vadd.s32 %v1686_v19, %v1677_v14  ;;  %v5979_v21 = vsub.s32 32, %v1782_v10  ;;  %v1785_v4 = vshll.u32 %v4944_v46, %v1782_v10 }
 0x203   : >> { %v1551_v25 = vmul.f32 %v5964_v43, %v5964_v43  ;;  %v1788_v53 = vshll.u32 %v4945_v48, %v1782_v10  ;;  %v1791_v3 = vshll.u32 %v4946_v50, %v1782_v10  ;;  %v1794_v41 = vshll.u32 %v4947_v52, %v1782_v10 }
 0x204   : >> { %v1691_v40 = vadd.s32 1, %v1687_v49  ;;  %v1786_v11 = vshrl.u32 %v4945_v48, %v5979_v21  ;;  %v1789_v47 = vshrl.u32 %v4946_v50, %v5979_v21  ;;  %v1792_v57 = vshrl.u32 %v4947_v52, %v5979_v21 }
 0x205   : >> { %v1552_v51 = vmul.f32 -0.001358992, %v1551_v25  ;;  %v1559_v33 = vmul.f32 -0.00019511016, %v1551_v25  ;;  %v1795_v31 = vshrl.u32 %v4948_v54, %v5979_v21  ;;  %vm1569_vm15 = vcmp.eq.s32.totalorder %v5972_v45, 0 }
 0x206   : >> { %v1692_v42 = vsel %vm1690_vm14, %v1691_v40, %v1687_v49  ;;  %vm1572_vm0 = vcmp.eq.s32.totalorder %v5972_v45, 2  ;;  %v1583_v9 = vadd.f32 %v1582_v60, %v1579_v61  ;;  %v1776_v58 = vor.u32 8388608, %v1775_v44 }
 0x207   : >> { %v1553_v15 = vadd.f32 0.041655596, %v1552_v51  ;;  %v1560_v59 = vadd.f32 0.008332121, %v1559_v33  ;;  %v1693_v37 = vadd.s32 %v1692_v42, %v1688_v63  ;;  %v6003_v13 = vor.u32 %v1786_v11, %v1785_v4  ;;  %v1586_v33 = vld [vmem:[%s1585_s16] sm:$0x1] }
 0x208   : >> { %vm1568_vm1 = vcmp.lt.s32.totalorder %v5972_v45, 2  ;;  %v6008_v18 = vor.u32 %v1789_v47, %v1788_v53  ;;  %v6010_v24 = vor.u32 %v1792_v57, %v1791_v3  ;;  %v1796_v55 = vor.u32 %v1795_v31, %v1794_v41  ;;  %s1753_s16 = scalar_lea.vmem [#allocation23], %s6077_s27  ;;  %s6233_s27 = sld [smem:[%s5338_s18 + %s5801_s5]] }
 0x209   : >> { %v1554_v6 = vmul.f32 %v1553_v15, %v1551_v25  ;;  %v1561_v17 = vmul.f32 %v1560_v59, %v1551_v25  ;;  %v1694_v7 = vadd.s32 536870912, %v1693_v37  ;;  %v1797_v29 = vshll.u32 %v4948_v54, %v1782_v10 }
 0x20a   : >> { %v1798_v5 = vshrl.u32 %v4949_v62, %v5979_v21  ;;  %vm1800_vm2 = vcmp.lt.s32.totalorder %v5999_v26, 1  ;;  %vm1803_vm3 = vcmp.lt.s32.totalorder %v5999_v26, 4  ;;  %v6019_v22 = vshll.u32 %v1776_v58, 8 }
 0x20b   : >> { %v1555_v35 = vadd.f32 -0.4999988, %v1554_v6  ;;  %v1562_v8 = vadd.f32 -0.16666654, %v1561_v17  ;;  %v6015_v36 = vshrl.u32 %v1694_v7, 30  ;;  %v1937_v28 = vstv %s1936_s8  ;;  %s1750_s8 = scalar_lea.vmem [#allocation23], %s6069_s6 }
 0x20c   : >> { %v1799_v14 = vor.u32 %v1798_v5, %v1797_v29  ;;  %vm1802_vm4 = vcmp.lt.s32.totalorder %v5999_v26, 3  ;;  %vm1801_vm5 = vcmp.lt.s32.totalorder %v5999_v26, 2  ;;  %v1809_v49 = vsel %vm1803_vm3, %v1796_v55, 920167782  ;;  %s1757_s6 = scalar_lea.vmem [#allocation24], %s6090_s22  ;;  %s6258_s22 = sld [smem:[%s5348_s21 + %s5801_s5]] }
 0x20d   : >> { %v1556_v2 = vmul.f32 %v1555_v35, %v1551_v25  ;;  %v1563_v38 = vmul.f32 %v1562_v8, %v1551_v25  ;;  %v1696_v10 = vshll.u32 %v6015_v36, 30  ;;  %v1808_v25 = vsel %vm1800_vm2, %v6003_v13, %v6008_v18 }
 0x20e   : >> { %v1813_v63 = vsel %vm1803_vm3, %v1799_v14, 1326507024  ;;  %v1812_v40 = vsel %vm1800_vm2, %v6008_v18, %v6010_v24  ;;  %v1810_v4 = vsel %vm1802_vm4, %v6010_v24, %v1809_v49  ;;  %v1817_v3 = vand.u32 65535, %v6019_v22 }
 0x20f   : >> { %v1557_v23 = vadd.f32 1.0, %v1556_v2  ;;  %v1564_v19 = vadd.f32 1.0, %v1563_v38  ;;  %v1697_v61 = vsub.s32 %v1693_v37, %v1696_v10  ;;  %v1814_v53 = vsel %vm1802_vm4, %v1796_v55, %v1813_v63 }
 0x210   : >> { %vm1566_vm7 = vweird.f32 %v5527_v27  ;;  %v1587_v11 = vadd.f32 %v1586_v33, %v1583_v9  ;;  %v1811_v41 = vsel %vm1801_vm5, %v1808_v25, %v1810_v4  ;;  %v1815_v42 = vsel %vm1801_vm5, %v1812_v40, %v1814_v53 }
 0x211   : >> { %v1565_v44 = vmul.f32 %v1564_v19, %v5964_v43  ;;  %v1573_v51 = vxor.u32 2147483648, %v1557_v23  ;;  %v1818_v43 = vshrl.u32 %v6019_v22, 16  ;;  %vm1698_vm6 = vcmp.lt.s32.totalorder %v1697_v61, 0 }
 0x212   : >> { %v1699_v60 = vsub.s32 0, %v1697_v61  ;;  %v1819_v31 = vand.u32 65535, %v1815_v42  ;;  %v1820_v6 = vshrl.u32 %v1815_v42, 16  ;;  %v1842_v58 = vshrl.u32 %v1811_v41, 16 }
 0x213   : >> { %v1570_v15 = vxor.u32 2147483648, %v1565_v44  ;;  %v1574_v59 = vsel %vm1572_vm0, %v1573_v51, %v1565_v44  ;;  %v1938_v27 = vmul.f32 %v1937_v28, %v5389_v0  ;;  %v1841_v38 = vand.u32 65535, %v1811_v41 }
 0x214   : >> { %v1700_v57 = vsel %vm1698_vm6, %v1699_v60, %v1697_v61  ;;  %v1821_v35 = vmul.u32 %v1819_v31, %v1817_v3  ;;  %v1822_v8 = vmul.u32 %v1820_v6, %v1817_v3  ;;  %v1823_v7 = vmul.u32 %v1819_v31, %v1818_v43 }
 0x215   : >> { %v1571_v47 = vsel %vm1569_vm15, %v1557_v23, %v1570_v15  ;;  %v1701_v37 = vclz %v1700_v57  ;;  %v1689_v14 = vadd.s32 %v5959_v39, %v5957_v32  ;;  %v1824_v45 = vmul.u32 %v1820_v6, %v1818_v43 }
 0x216   : >> { %v1575_v17 = vsel %vm1568_vm1, %v1571_v47, %v1574_v59  ;;  %v1825_v5 = vshll.u32 %v1822_v8, 16  ;;  %v1827_v2 = vshll.u32 %v1823_v7, 16  ;;  %v6061_v23 = vadd.f32 %v1938_v27, %v5394_v1 }
 0x217   : >> { %v1576_v9 = vsel %vm1566_vm7, nan, %v1575_v17  ;;  %v4451_v29 = vadd.s32 4294967294, %v1701_v37  ;;  %v1844_v10 = vmul.u32 %v1842_v58, %v1817_v3  ;;  %vm1597_vm10 = vcmp.lt.s32.totalorder %v5752_v30, 0 }
 0x218   : >> { %v1588_v55 = vadd.f32 %v1587_v11, %v1576_v9  ;;  %vm1829_vm9 = vc.u32 %v1821_v35, %v1825_v5  ;;  %v1831_v19 = vadd.s32 %v1825_v5, %v1821_v35  ;;  %v1784_v32 = vshrl.u32 %v4944_v46, %v5979_v21 }
 0x219   : >> { %vm4452_vm8 = vcmp.lt.s32.totalorder %v4451_v29, 0  ;;  %v1830_v39 = vsel %vm1829_vm9, 1, %v4950_v56  ;;  %v1843_v44 = vmul.u32 %v1841_v38, %v1817_v3  ;;  %v1845_v51 = vmul.u32 %v1841_v38, %v1818_v43 }
 0x21a   : >> { %1589 = vst [vmem:[%s5814_s29 + $0x1] sm:$0x1] %v1588_v55  ;;  %v1704_v28 = vsel %vm4452_vm8, 0, %v4451_v29  ;;  %vm1833_vm11 = vc.u32 %v1831_v19, %v1827_v2  ;;  %v1826_v4 = vshrl.u32 %v1822_v8, 16  ;;  %v1832_v53 = vadd.s32 %v1830_v39, %v1824_v45 }
 0x21b   : >> { %v1705_v25 = vsub.s32 32, %v1704_v28  ;;  %v1706_v49 = vshll.u32 %v1697_v61, %v1704_v28  ;;  %v1709_v63 = vsub.s32 4294967266, %v1704_v28  ;;  %v1719_v61 = vsub.s32 4, %v6015_v36 }
 0x21c   : >> { %v1834_v21 = vsel %vm1833_vm11, 1, %v4950_v56  ;;  %v1846_v3 = vmul.u32 %v1842_v58, %v1818_v43  ;;  %v1847_v15 = vshll.u32 %v1844_v10, 16  ;;  %v1805_v11 = vsel %vm1803_vm3, %v6010_v24, 2102212464 }
 0x21d   : >> { %v1707_v33 = vshrl.u32 %v1689_v14, %v1705_v25  ;;  %v1710_v40 = vadd.s32 127, %v1709_v63  ;;  %v1836_v41 = vadd.s32 %v1834_v21, %v1832_v53  ;;  %v1828_v42 = vshrl.u32 %v1823_v7, 16  ;;  %v1754_v63 = vld [vmem:[%s1753_s16] sm:$0x1]  ;;  %s6291_s16 = sld [smem:[%s5375_s13 + %s6072_s14]] }
 0x21e   : >> { %v1849_v47 = vshll.u32 %v1845_v51, 16  ;;  %vm1851_vm12 = vc.u32 %v1843_v44, %v1847_v15  ;;  %v1853_v57 = vadd.s32 %v1847_v15, %v1843_v44  ;;  %v1804_v43 = vsel %vm1800_vm2, %v1784_v32, %v6003_v13  ;;  %v1758_v15 = vld [vmem:[%s1757_s6] sm:$0x1]  ;;  %s1930_s6 = scalar_lea.vmem [#allocation24], %s6258_s22 }
 0x21f   : >> { %v1708_v59 = vor.u32 %v1707_v33, %v1706_v49  ;;  %v1711_v60 = vshll.u32 %v1710_v40, 23  ;;  %v1837_v17 = vadd.s32 %v1836_v41, %v1826_v4  ;;  %v1852_v37 = vsel %vm1851_vm12, 1, %v4950_v56  ;;  %v1751_v49 = vld [vmem:[%s1750_s8] sm:$0x1]  ;;  %s1926_s8 = scalar_lea.vmem [#allocation23], %s6244_s30  ;;  %s6349_s30 = sadd.s32 4, %s5460_s26 }
 0x220   : >> { %v1848_v58 = vshrl.u32 %v1844_v10, 16  ;;  %v1854_v24 = vadd.s32 %v1852_v37, %v1846_v3  ;;  %vm1855_vm13 = vc.u32 %v1853_v57, %v1849_v47  ;;  %v1806_v9 = vsel %vm1802_vm4, %v6008_v18, %v1805_v11  ;;  %s6358_s22 = sld [smem:[%s5355_s7 + %s6349_s30]] }
 0x221   : >> { %v1712_v31 = vor.u32 4788187, %v1711_v60  ;;  %v1715_v6 = vcvt.s32.f32 %v1708_v59  ;;  %v1856_v35 = vsel %vm1855_vm13, 1, %v4950_v56  ;;  %v1943_v8 = vand.u32 2139095040, %v6061_v23 }
 0x222   : >> { %v1720_v7 = vsel %vm1597_vm10, %v1719_v61, %v6015_v36  ;;  %v1850_v55 = vshrl.u32 %v1845_v51, 16  ;;  %v1858_v13 = vadd.s32 %v1856_v35, %v1854_v24  ;;  %v6103_v5 = vadd.s32 %v1837_v17, %v1828_v42 }
 0x223   : >> { %v1713_v27 = vand.u32 2147483647, %v1712_v31  ;;  %v6105_v2 = vadd.s32 %v1853_v57, %v1849_v47  ;;  %v1944_v18 = vshrl.u32 %v1943_v8, 23  ;;  %v1807_v38 = vsel %vm1801_vm5, %v1804_v43, %v1806_v9 }
 0x224   : >> { %v1859_v14 = vadd.s32 %v1858_v13, %v1848_v58  ;;  %v1940_v45 = vand.u32 2147483647, %v6061_v23  ;;  %vm6112_vm14 = vcmp.le.f32.partialorder %v1595_v34, 0.7853982  ;;  %v1861_v34 = vmul.u32 %v6019_v22, %v1807_v38 }
 0x225   : >> { %v1716_v29 = vmul.f32 %v1715_v6, %v1713_v27  ;;  %v4456_v19 = vadd.s32 4294967169, %v1944_v18  ;;  %v1722_v10 = vsel %vm6112_vm14, 0, %v1720_v7  ;;  %vm1863_vm15 = vc.u32 %v6103_v5, %v6105_v2 }
 0x226   : >> { %v1860_v25 = vadd.s32 %v1859_v14, %v1850_v55  ;;  %v1947_v51 = vand.u32 8388607, %v1940_v45  ;;  %v6132_v40 = vand.u32 3, %v1722_v10  ;;  %v1755_v4 = vadd.f32 %v1754_v63, %v1751_v49 }
 0x227   : >> { %v1717_v28 = vxor.u32 2147483648, %v1716_v29  ;;  %v1950_v32 = vadd.s32 1, %v4456_v19  ;;  %v2110_v22 = vstv %s2109_s2  ;;  %vm1738_vm4 = vweird.f32 %v5752_v30  ;;  %s1923_s2 = scalar_lea.vmem [#allocation23], %s6233_s27  ;;  %s2281_s27 = ssub.f32 %s5471_s15, %s6291_s16 }
 0x228   : >> { %v1864_v44 = vadd.s32 1, %v1860_v25  ;;  %v1948_v60 = vor.u32 8388608, %v1947_v51  ;;  %v2111_v57 = vmul.f32 %v2110_v22, %v5389_v0  ;;  %vm1744_vm1 = vcmp.eq.s32.totalorder %v6132_v40, 2  ;;  %s2454_s16 = ssub.f32 %s5471_s15, %s6358_s22 }
 0x229   : >> { %v1718_v26 = vsel %vm1597_vm10, %v1717_v28, %v1716_v29  ;;  %vm1951_vm0 = vcmp.gt.s32.totalorder %v1950_v32, 0  ;;  %v6137_v31 = vadd.f32 %v1758_v15, %v1755_v4  ;;  %vm1741_vm2 = vcmp.eq.s32.totalorder %v6132_v40, 0  ;;  %s6425_s22 = sld [smem:[%s5368_s12 + %s5801_s5]] }
 0x22a   : >> { %v1721_v39 = vsel %vm6112_vm14, %v5752_v30, %v1718_v26  ;;  %v1865_v53 = vsel %vm1863_vm15, %v1864_v44, %v1860_v25  ;;  %v1952_v61 = vsel %vm1951_vm0, %v1950_v32, 0  ;;  %v6148_v8 = vshll.u32 %v1948_v60, 8 }
 0x22b   : >> { %v1723_v33 = vmul.f32 %v1721_v39, %v1721_v39  ;;  %v1866_v59 = vadd.s32 %v1865_v53, %v1861_v34  ;;  %v1954_v11 = vand.u32 31, %v1952_v61  ;;  %v6139_v6 = vshrl.u32 %v1952_v61, 5 }
 0x22c   : >> { %vm1740_vm3 = vcmp.lt.s32.totalorder %v6132_v40, 2  ;;  %v6153_v29 = vadd.f32 %v2111_v57, %v5394_v1  ;;  %vm1770_vm7 = vcmp.lt.s32.totalorder %v5905_v12, 0  ;;  %v1989_v15 = vand.u32 65535, %v6148_v8 }
 0x22d   : >> { %v1724_v21 = vmul.f32 -0.001358992, %v1723_v33  ;;  %v1731_v3 = vmul.f32 -0.00019511016, %v1723_v33  ;;  %v1867_v47 = vadd.s32 536870912, %v1866_v59  ;;  %v1955_v17 = vsub.s32 32, %v1954_v11 }
 0x22e   : >> { %v1957_v24 = vshll.u32 %v4944_v46, %v1954_v11  ;;  %v1960_v9 = vshll.u32 %v4945_v48, %v1954_v11  ;;  %v1963_v18 = vshll.u32 %v4946_v50, %v1954_v11  ;;  %v1966_v14 = vshll.u32 %v4947_v52, %v1954_v11 }
 0x22f   : >> { %v1725_v41 = vadd.f32 0.041655596, %v1724_v21  ;;  %v1732_v42 = vadd.f32 0.008332121, %v1731_v3  ;;  %v6141_v58 = vshrl.u32 %v1867_v47, 30  ;;  %v1958_v27 = vshrl.u32 %v4945_v48, %v1955_v17 }
 0x230   : >> { %v1961_v35 = vshrl.u32 %v4946_v50, %v1955_v17  ;;  %v1964_v38 = vshrl.u32 %v4947_v52, %v1955_v17  ;;  %vm1972_vm5 = vcmp.lt.s32.totalorder %v6139_v6, 1  ;;  %v1967_v26 = vshrl.u32 %v4948_v54, %v1955_v17 }
 0x231   : >> { %v1726_v37 = vmul.f32 %v1725_v41, %v1723_v33  ;;  %v1733_v43 = vmul.f32 %v1732_v42, %v1723_v33  ;;  %v1869_v13 = vshll.u32 %v6141_v58, 30  ;;  %v1959_v10 = vor.u32 %v1958_v27, %v1957_v24 }
 0x232   : >> { %v6160_v25 = vor.u32 %v1961_v35, %v1960_v9  ;;  %v1969_v49 = vshll.u32 %v4948_v54, %v1954_v11  ;;  %v1970_v63 = vshrl.u32 %v4949_v62, %v1955_v17  ;;  %v1965_v51 = vor.u32 %v1964_v38, %v1963_v18 }
 0x233   : >> { %v1727_v7 = vadd.f32 -0.4999988, %v1726_v37  ;;  %v1734_v55 = vadd.f32 -0.16666654, %v1733_v43  ;;  %v1870_v19 = vsub.s32 %v1866_v59, %v1869_v13  ;;  %v1968_v4 = vor.u32 %v1967_v26, %v1966_v14 }
 0x234   : >> { %v1971_v53 = vor.u32 %v1970_v63, %v1969_v49  ;;  %vm1974_vm8 = vcmp.lt.s32.totalorder %v6139_v6, 3  ;;  %vm1975_vm9 = vcmp.lt.s32.totalorder %v6139_v6, 4  ;;  %v1862_v21 = vadd.s32 %v6105_v2, %v6103_v5 }
 0x235   : >> { %v1728_v36 = vmul.f32 %v1727_v7, %v1723_v33  ;;  %v1735_v28 = vmul.f32 %v1734_v55, %v1723_v33  ;;  %vm1871_vm6 = vcmp.lt.s32.totalorder %v1870_v19, 0  ;;  %v1872_v44 = vsub.s32 0, %v1870_v19 }
 0x236   : >> { %vm1973_vm10 = vcmp.lt.s32.totalorder %v6139_v6, 2  ;;  %v1981_v11 = vsel %vm1975_vm9, %v1968_v4, 920167782  ;;  %v1990_v2 = vshrl.u32 %v6148_v8, 16  ;;  %v2116_v42 = vand.u32 2139095040, %v6153_v29 }
 0x237   : >> { %v1729_v34 = vadd.f32 1.0, %v1728_v36  ;;  %v1736_v32 = vadd.f32 1.0, %v1735_v28  ;;  %v1873_v22 = vsel %vm1871_vm6, %v1872_v44, %v1870_v19  ;;  %v1982_v5 = vsel %vm1974_vm8, %v1965_v51, %v1981_v11 }
 0x238   : >> { %v1874_v3 = vclz %v1873_v22  ;;  %v1892_v57 = vsub.s32 4, %v6141_v58  ;;  %v1956_v37 = vshrl.u32 %v4944_v46, %v1955_v17  ;;  %v1985_v43 = vsel %vm1975_vm9, %v1971_v53, 1326507024 }
 0x239   : >> { %v1737_v33 = vmul.f32 %v1736_v32, %v1721_v39  ;;  %v1745_v61 = vxor.u32 2147483648, %v1729_v34  ;;  %v1980_v39 = vsel %vm1972_vm5, %v1959_v10, %v6160_v25  ;;  %v1984_v9 = vsel %vm1972_vm5, %v6160_v25, %v1965_v51 }
 0x23a   : >> { %v4454_v41 = vadd.s32 4294967294, %v1874_v3  ;;  %v1983_v27 = vsel %vm1973_vm10, %v1980_v39, %v1982_v5  ;;  %v1986_v17 = vsel %vm1974_vm8, %v1968_v4, %v1985_v43  ;;  %v6204_v14 = vsel %vm1770_vm7, %v1892_v57, %v6141_v58 }
 0x23b   : >> { %v1742_v59 = vxor.u32 2147483648, %v1737_v33  ;;  %v1746_v60 = vsel %vm1744_vm1, %v1745_v61, %v1737_v33  ;;  %v2013_v55 = vand.u32 65535, %v1983_v27  ;;  %v2117_v36 = vshrl.u32 %v2116_v42, 23 }
 0x23c   : >> { %vm4455_vm11 = vcmp.lt.s32.totalorder %v4454_v41, 0  ;;  %v1987_v26 = vsel %vm1973_vm10, %v1984_v9, %v1986_v17  ;;  %v2014_v49 = vshrl.u32 %v1983_v27, 16  ;;  %v1976_v63 = vsel %vm1972_vm5, %v1956_v37, %v1959_v10 }
 0x23d   : >> { %v1743_v47 = vsel %vm1741_vm2, %v1729_v34, %v1742_v59  ;;  %v1877_v7 = vsel %vm4455_vm11, 0, %v4454_v41  ;;  %v1992_v34 = vshrl.u32 %v1987_v26, 16  ;;  %vm6215_vm12 = vcmp.le.f32.partialorder %v1768_v20, 0.7853982 }
 0x23e   : >> { %v1747_v24 = vsel %vm1740_vm3, %v1743_v47, %v1746_v60  ;;  %v1878_v40 = vsub.s32 32, %v1877_v7  ;;  %v1879_v18 = vshll.u32 %v1870_v19, %v1877_v7  ;;  %v1882_v38 = vsub.s32 4294967266, %v1877_v7 }
 0x23f   : >> { %v1748_v35 = vsel %vm1738_vm4, nan, %v1747_v24  ;;  %v1991_v19 = vand.u32 65535, %v1987_v26  ;;  %v2016_v4 = vmul.u32 %v2014_v49, %v1989_v15  ;;  %v2017_v53 = vmul.u32 %v2013_v55, %v1990_v2 }
 0x240   : >> { %v1760_v13 = vadd.f32 %v6137_v31, %v1748_v35  ;;  %v1880_v28 = vshrl.u32 %v1862_v21, %v1878_v40  ;;  %v1883_v30 = vadd.s32 127, %v1882_v38  ;;  %v1977_v31 = vsel %vm1975_vm9, %v1965_v51, 2102212464 }
 0x241   : >> { %v1993_v33 = vmul.u32 %v1991_v19, %v1989_v15  ;;  %v1994_v61 = vmul.u32 %v1992_v34, %v1989_v15  ;;  %v1995_v22 = vmul.u32 %v1991_v19, %v1990_v2  ;;  %v2015_v21 = vmul.u32 %v2013_v55, %v1989_v15 }
 0x242   : >> { %1761 = vst [vmem:[%s5895_s1 + $0x1] sm:$0x1] %v1760_v13  ;;  %v1881_v32 = vor.u32 %v1880_v28, %v1879_v18  ;;  %v1884_v44 = vshll.u32 %v1883_v30, 23  ;;  %v1978_v51 = vsel %vm1974_vm8, %v6160_v25, %v1977_v31  ;;  %v2019_v59 = vshll.u32 %v2016_v4, 16 }
 0x243   : >> { %v1996_v60 = vmul.u32 %v1992_v34, %v1990_v2  ;;  %v1997_v20 = vshll.u32 %v1994_v61, 16  ;;  %v1999_v39 = vshll.u32 %v1995_v22, 16  ;;  %v2018_v11 = vmul.u32 %v2014_v49, %v1990_v2 }
 0x244   : >> { %v1885_v10 = vor.u32 4788187, %v1884_v44  ;;  %v1888_v3 = vcvt.s32.f32 %v1881_v32  ;;  %v1998_v5 = vshrl.u32 %v1994_v61, 16  ;;  %v2020_v42 = vshrl.u32 %v2016_v4, 16 }
 0x245   : >> { %v2021_v47 = vshll.u32 %v2017_v53, 16  ;;  %vm2001_vm13 = vc.u32 %v1993_v33, %v1997_v20  ;;  %v2003_v57 = vadd.s32 %v1997_v20, %v1993_v33  ;;  %vm2023_vm14 = vc.u32 %v2015_v21, %v2019_v59 }
 0x246   : >> { %v1886_v41 = vand.u32 2147483647, %v1885_v10  ;;  %v2025_v37 = vadd.s32 %v2019_v59, %v2015_v21  ;;  %v2002_v43 = vsel %vm2001_vm13, 1, %v4950_v56  ;;  %v2024_v24 = vsel %vm2023_vm14, 1, %v4950_v56 }
 0x247   : >> { %v4459_v25 = vadd.s32 4294967169, %v2117_v36  ;;  %v2004_v27 = vadd.s32 %v2002_v43, %v1996_v60  ;;  %vm2005_vm15 = vc.u32 %v2003_v57, %v1999_v39  ;;  %v2026_v2 = vadd.s32 %v2024_v24, %v2018_v11 }
 0x248   : >> { %v1889_v15 = vmul.f32 %v1888_v3, %v1886_v41  ;;  %vm2027_vm0 = vc.u32 %v2025_v37, %v2021_v47  ;;  %v2000_v35 = vshrl.u32 %v1995_v22, 16  ;;  %v2006_v7 = vsel %vm2005_vm15, 1, %v4950_v56 }
 0x249   : >> { %v2028_v17 = vsel %vm2027_vm0, 1, %v4950_v56  ;;  %v2008_v55 = vadd.s32 %v2006_v7, %v2004_v27  ;;  %v2022_v13 = vshrl.u32 %v2017_v53, 16  ;;  %v2123_v18 = vadd.s32 1, %v4459_v25 }
 0x24a   : >> { %v1890_v9 = vxor.u32 2147483648, %v1889_v15  ;;  %v2030_v40 = vadd.s32 %v2028_v17, %v2026_v2  ;;  %v1895_v36 = vsel %vm6215_vm12, 0, %v6204_v14  ;;  %v1979_v28 = vsel %vm1973_vm10, %v1976_v63, %v1978_v51  ;;  %v1924_v2 = vld [vmem:[%s1923_s2] sm:$0x1]  ;;  %s6364_s2 = sld [smem:[%s5358_s0 + %s5801_s5]] }
 0x24b   : >> { %v2009_v26 = vadd.s32 %v2008_v55, %v1998_v5  ;;  %v6246_v49 = vadd.s32 %v2025_v37, %v2021_v47  ;;  %v2113_v19 = vand.u32 2147483647, %v6153_v29  ;;  %vm2124_vm1 = vcmp.gt.s32.totalorder %v2123_v18, 0 }
 0x24c   : >> { %v1891_v38 = vsel %vm1770_vm7, %v1890_v9, %v1889_v15  ;;  %v2031_v31 = vadd.s32 %v2030_v40, %v2020_v42  ;;  %v6251_v6 = vand.u32 3, %v1895_v36  ;;  %v2125_v58 = vsel %vm2124_vm1, %v2123_v18, 0  ;;  %v1927_v9 = vld [vmem:[%s1926_s8] sm:$0x1]  ;;  %s6368_s8 = sld [smem:[%s5365_s3 + %s5801_s5]]  ;;  %s2102_s5 = scalar_lea.vmem [#allocation24], %s6425_s22 }
 0x24d   : >> { %v6240_v30 = vsel %vm6215_vm12, %v5905_v12, %v1891_v38  ;;  %v6253_v63 = vadd.s32 %v2009_v26, %v2000_v35  ;;  %v2033_v4 = vmul.u32 %v6148_v8, %v1979_v28  ;;  %v2127_v53 = vand.u32 31, %v2125_v58 }
 0x24e   : >> { %v1896_v14 = vmul.f32 %v6240_v30, %v6240_v30  ;;  %v2032_v34 = vadd.s32 %v2031_v31, %v2022_v13  ;;  %vm1917_vm3 = vcmp.eq.s32.totalorder %v6251_v6, 2  ;;  %v2120_v3 = vand.u32 8388607, %v2113_v19 }
 0x24f   : >> { %vm2035_vm2 = vc.u32 %v6253_v63, %v6246_v49  ;;  %v6262_v21 = vsub.s32 32, %v2127_v53  ;;  %v2130_v60 = vshll.u32 %v4944_v46, %v2127_v53  ;;  %vm1914_vm4 = vcmp.eq.s32.totalorder %v6251_v6, 0 }
 0x250   : >> { %v1897_v32 = vmul.f32 -0.001358992, %v1896_v14  ;;  %v1904_v44 = vmul.f32 -0.00019511016, %v1896_v14  ;;  %v2036_v33 = vadd.s32 1, %v2032_v34  ;;  %v2133_v39 = vshll.u32 %v4945_v48, %v2127_v53 }
 0x251   : >> { %v2131_v20 = vshrl.u32 %v4945_v48, %v6262_v21  ;;  %v2134_v11 = vshrl.u32 %v4946_v50, %v6262_v21  ;;  %v2139_v41 = vshll.u32 %v4947_v52, %v2127_v53  ;;  %vm1913_vm5 = vcmp.lt.s32.totalorder %v6251_v6, 2 }
 0x252   : >> { %v1898_v61 = vadd.f32 0.041655596, %v1897_v32  ;;  %v1905_v22 = vadd.f32 0.008332121, %v1904_v44  ;;  %v2037_v10 = vsel %vm2035_vm2, %v2036_v33, %v2032_v34  ;;  %v6276_v57 = vshrl.u32 %v2125_v58, 5 }
 0x253   : >> { %v2038_v8 = vadd.s32 %v2037_v10, %v2033_v4  ;;  %vm1911_vm6 = vweird.f32 %v5905_v12  ;;  %v2136_v37 = vshll.u32 %v4946_v50, %v2127_v53  ;;  %v2137_v15 = vshrl.u32 %v4947_v52, %v6262_v21  ;;  %v1931_v58 = vld [vmem:[%s1930_s6] sm:$0x1]  ;;  %s2095_s6 = scalar_lea.vmem [#allocation23], %s6364_s2  ;;  %s6540_s2 = sld [smem:[%s5338_s18 + %s6072_s14]] }
 0x254   : >> { %v1899_v51 = vmul.f32 %v1898_v61, %v1896_v14  ;;  %v1906_v59 = vmul.f32 %v1905_v22, %v1896_v14  ;;  %v2140_v43 = vshrl.u32 %v4948_v54, %v6262_v21  ;;  %v2142_v24 = vshll.u32 %v4948_v54, %v2127_v53 }
 0x255   : >> { %v2039_v47 = vadd.s32 536870912, %v2038_v8  ;;  %v2121_v7 = vor.u32 8388608, %v2120_v3  ;;  %v6293_v17 = vor.u32 %v2131_v20, %v2130_v60  ;;  %v6295_v55 = vor.u32 %v2134_v11, %v2133_v39 }
 0x256   : >> { %v1900_v5 = vadd.f32 -0.4999988, %v1899_v51  ;;  %v1907_v42 = vadd.f32 -0.16666654, %v1906_v59  ;;  %v2141_v13 = vor.u32 %v2140_v43, %v2139_v41  ;;  %v2143_v40 = vshrl.u32 %v4949_v62, %v6262_v21 }
 0x257   : >> { %v6287_v35 = vshrl.u32 %v2039_v47, 30  ;;  %vm2145_vm7 = vcmp.lt.s32.totalorder %v6276_v57, 1  ;;  %v1928_v28 = vadd.f32 %v1927_v9, %v1924_v2  ;;  %v6301_v26 = vor.u32 %v2137_v15, %v2136_v37 }
 0x258   : >> { %v1901_v25 = vmul.f32 %v1900_v5, %v1896_v14  ;;  %v1908_v27 = vmul.f32 %v1907_v42, %v1896_v14  ;;  %v2144_v31 = vor.u32 %v2143_v40, %v2142_v24  ;;  %vm2148_vm8 = vcmp.lt.s32.totalorder %v6276_v57, 4 }
 0x259   : >> { %v2041_v36 = vshll.u32 %v6287_v35, 30  ;;  %vm2147_vm9 = vcmp.lt.s32.totalorder %v6276_v57, 3  ;;  %vm2146_vm10 = vcmp.lt.s32.totalorder %v6276_v57, 2  ;;  %v2153_v44 = vsel %vm2145_vm7, %v6293_v17, %v6295_v55 }
 0x25a   : >> { %v1902_v18 = vadd.f32 1.0, %v1901_v25  ;;  %v1909_v38 = vadd.f32 1.0, %v1908_v27  ;;  %v2154_v4 = vsel %vm2148_vm8, %v2141_v13, 920167782  ;;  %v6314_v53 = vshll.u32 %v2121_v7, 8 }
 0x25b   : >> { %v2042_v32 = vsub.s32 %v2038_v8, %v2041_v36  ;;  %v1932_v22 = vadd.f32 %v1931_v58, %v1928_v28  ;;  %v2155_v10 = vsel %vm2147_vm9, %v6301_v26, %v2154_v4  ;;  %v2157_v3 = vsel %vm2145_vm7, %v6295_v55, %v6301_v26 }
 0x25c   : >> { %v1910_v14 = vmul.f32 %v1909_v38, %v6240_v30  ;;  %v1918_v34 = vxor.u32 2147483648, %v1902_v18  ;;  %v2158_v51 = vsel %vm2148_vm8, %v2144_v31, 1326507024  ;;  %v2156_v60 = vsel %vm2146_vm10, %v2153_v44, %v2155_v10 }
 0x25d   : >> { %vm2043_vm11 = vcmp.lt.s32.totalorder %v2042_v32, 0  ;;  %v2044_v61 = vsub.s32 0, %v2042_v32  ;;  %v2159_v11 = vsel %vm2147_vm9, %v2141_v13, %v2158_v51  ;;  %v2162_v41 = vand.u32 65535, %v6314_v53 }
 0x25e   : >> { %v1915_v30 = vxor.u32 2147483648, %v1910_v14  ;;  %v1919_v33 = vsel %vm1917_vm3, %v1918_v34, %v1910_v14  ;;  %v2160_v42 = vsel %vm2146_vm10, %v2157_v3, %v2159_v11  ;;  %v2163_v47 = vshrl.u32 %v6314_v53, 16 }
 0x25f   : >> { %v2045_v8 = vsel %vm2043_vm11, %v2044_v61, %v2042_v32  ;;  %v2187_v37 = vshrl.u32 %v2156_v60, 16  ;;  %v2164_v6 = vand.u32 65535, %v2160_v42  ;;  %v2165_v24 = vshrl.u32 %v2160_v42, 16 }
 0x260   : >> { %v1916_v59 = vsel %vm1914_vm4, %v1902_v18, %v1915_v30  ;;  %v2046_v39 = vclz %v2045_v8  ;;  %v2186_v25 = vand.u32 65535, %v2156_v60  ;;  %v2282_v27 = vstv %s2281_s27  ;;  %s2098_s27 = scalar_lea.vmem [#allocation23], %s6368_s8  ;;  %s6553_s8 = sld [smem:[%s5345_s28 + %s6072_s14]] }
 0x261   : >> { %v1920_v20 = vsel %vm1913_vm5, %v1916_v59, %v1919_v33  ;;  %v2034_v2 = vadd.s32 %v6246_v49, %v6253_v63  ;;  %v6346_v12 = vmul.u32 %v2187_v37, %v2162_v41  ;;  %v2166_v7 = vmul.u32 %v2164_v6, %v2162_v41 }
 0x262   : >> { %v1921_v5 = vsel %vm1911_vm6, nan, %v1920_v20  ;;  %v4457_v43 = vadd.s32 4294967294, %v2046_v39  ;;  %v2167_v13 = vmul.u32 %v2165_v24, %v2162_v41  ;;  %v2168_v40 = vmul.u32 %v2164_v6, %v2163_v47 }
 0x263   : >> { %v1933_v15 = vadd.f32 %v1932_v22, %v1921_v5  ;;  %v2283_v28 = vmul.f32 %v2282_v27, %v5389_v0  ;;  %v2129_v31 = vshrl.u32 %v4944_v46, %v6262_v21  ;;  %v2169_v49 = vmul.u32 %v2165_v24, %v2163_v47 }
 0x264   : >> { %vm4458_vm12 = vcmp.lt.s32.totalorder %v4457_v43, 0  ;;  %v2170_v63 = vshll.u32 %v2167_v13, 16  ;;  %v2190_v14 = vmul.u32 %v2186_v25, %v2163_v47  ;;  %vm1942_vm13 = vcmp.lt.s32.totalorder %v6061_v23, 0 }
 0x265   : >> { %1934 = vst [vmem:[%s5814_s29 + $0x2] sm:$0x1] %v1933_v15  ;;  %v2049_v9 = vsel %vm4458_vm12, 0, %v4457_v43  ;;  %v2064_v44 = vsub.s32 4, %v6287_v35  ;;  %v2172_v4 = vshll.u32 %v2168_v40, 16  ;;  %v2188_v30 = vmul.u32 %v2186_v25, %v2162_v41 }
 0x266   : >> { %v2050_v18 = vsub.s32 32, %v2049_v9  ;;  %v2051_v38 = vshll.u32 %v2042_v32, %v2049_v9  ;;  %v2054_v36 = vsub.s32 4294967266, %v2049_v9  ;;  %vm2174_vm14 = vc.u32 %v2166_v7, %v2170_v63  ;;  %s2271_s22 = scalar_lea.vmem [#allocation23], %s6553_s8  ;;  %s6656_s8 = sadd.s32 5, %s5460_s26 }
 0x267   : >> { %v2176_v32 = vadd.s32 %v2170_v63, %v2166_v7  ;;  %v2192_v21 = vshll.u32 %v6346_v12, 16  ;;  %v2175_v22 = vsel %vm2174_vm14, 1, %v4950_v56  ;;  %v2191_v10 = vmul.u32 %v2187_v37, %v2163_v47 }
 0x268   : >> { %v2052_v34 = vshrl.u32 %v2034_v2, %v2050_v18  ;;  %v2055_v58 = vadd.s32 127, %v2054_v36  ;;  %v2171_v3 = vshrl.u32 %v2167_v13, 16  ;;  %v2177_v51 = vadd.s32 %v2175_v22, %v2169_v49 }
 0x269   : >> { %vm2178_vm15 = vc.u32 %v2176_v32, %v2172_v4  ;;  %v2194_v59 = vshll.u32 %v2190_v14, 16  ;;  %v2149_v20 = vsel %vm2145_vm7, %v2129_v31, %v6293_v17  ;;  %v2150_v11 = vsel %vm2148_vm8, %v6301_v26, 2102212464  ;;  %v2099_v32 = vld [vmem:[%s2098_s27] sm:$0x1]  ;;  %s2268_s27 = scalar_lea.vmem [#allocation23], %s6540_s2 }
 0x26a   : >> { %v2053_v33 = vor.u32 %v2052_v34, %v2051_v38  ;;  %v2056_v61 = vshll.u32 %v2055_v58, 23  ;;  %v2179_v39 = vsel %vm2178_vm15, 1, %v4950_v56  ;;  %vm2196_vm0 = vc.u32 %v2188_v30, %v2192_v21  ;;  %v2096_v34 = vld [vmem:[%s2095_s6] sm:$0x1]  ;;  %s6589_s6 = sld [smem:[%s5375_s13 + %s6349_s30]] }
 0x26b   : >> { %v2181_v41 = vadd.s32 %v2179_v39, %v2177_v51  ;;  %v2198_v5 = vadd.s32 %v2192_v21, %v2188_v30  ;;  %v2173_v47 = vshrl.u32 %v2168_v40, 16  ;;  %v2197_v37 = vsel %vm2196_vm0, 1, %v4950_v56 }
 0x26c   : >> { %v2057_v8 = vor.u32 4788187, %v2056_v61  ;;  %v2060_v60 = vcvt.s32.f32 %v2053_v33  ;;  %v6379_v15 = vadd.f32 %v2283_v28, %v5394_v1  ;;  %v2193_v17 = vshrl.u32 %v6346_v12, 16 }
 0x26d   : >> { %v2182_v43 = vadd.s32 %v2181_v41, %v2171_v3  ;;  %v2199_v6 = vadd.s32 %v2197_v37, %v2191_v10  ;;  %vm2200_vm1 = vc.u32 %v2198_v5, %v2194_v59  ;;  %v2151_v26 = vsel %vm2147_vm9, %v6295_v55, %v2150_v11 }
 0x26e   : >> { %v2058_v42 = vand.u32 2147483647, %v2057_v8  ;;  %v2201_v25 = vsel %vm2200_vm1, 1, %v4950_v56  ;;  %v2288_v27 = vand.u32 2139095040, %v6379_v15  ;;  %vm6391_vm2 = vcmp.le.f32.partialorder %v1940_v45, 0.7853982 }
 0x26f   : >> { %v2065_v12 = vsel %vm1942_vm13, %v2064_v44, %v6287_v35  ;;  %v2195_v9 = vshrl.u32 %v2190_v14, 16  ;;  %v2203_v7 = vadd.s32 %v2201_v25, %v2199_v6  ;;  %v6398_v55 = vadd.s32 %v2182_v43, %v2173_v47 }
 0x270   : >> { %v2061_v24 = vmul.f32 %v2060_v60, %v2058_v42  ;;  %v6400_v40 = vadd.s32 %v2198_v5, %v2194_v59  ;;  %v2289_v18 = vshrl.u32 %v2288_v27, 23  ;;  %v2152_v38 = vsel %vm2146_vm10, %v2149_v20, %v2151_v26  ;;  %s2626_s2 = ssub.f32 %s5471_s15, %s6589_s6 }
 0x271   : >> { %v2204_v45 = vadd.s32 %v2203_v7, %v2193_v17  ;;  %v2285_v36 = vand.u32 2147483647, %v6379_v15  ;;  %v2067_v28 = vsel %vm6391_vm2, 0, %v2065_v12  ;;  %v2455_v49 = vstv %s2454_s16  ;;  %s6572_s16 = sld [smem:[%s5348_s21 + %s6072_s14]] }
 0x272   : >> { %v2062_v13 = vxor.u32 2147483648, %v2061_v24  ;;  %v4462_v31 = vadd.s32 4294967169, %v2289_v18  ;;  %v2206_v58 = vmul.u32 %v6314_v53, %v2152_v38  ;;  %vm2208_vm3 = vc.u32 %v6398_v55, %v6400_v40  ;;  %s6669_s6 = sld [smem:[%s5355_s7 + %s6656_s8]] }
 0x273   : >> { %v2205_v57 = vadd.s32 %v2204_v45, %v2195_v9  ;;  %v6420_v4 = vand.u32 3, %v2067_v28  ;;  %v2292_v21 = vand.u32 8388607, %v2285_v36  ;;  %v2456_v33 = vmul.f32 %v2455_v49, %v5389_v0  ;;  %v2103_v49 = vld [vmem:[%s2102_s5] sm:$0x1] }
 0x274   : >> { %v2063_v35 = vsel %vm1942_vm13, %v2062_v13, %v2061_v24  ;;  %v2295_v44 = vadd.s32 1, %v4462_v31  ;;  %v2100_v8 = vadd.f32 %v2099_v32, %v2096_v34  ;;  %vm2083_vm8 = vweird.f32 %v6061_v23 }
 0x275   : >> { %v6412_v63 = vsel %vm6391_vm2, %v6061_v23, %v2063_v35  ;;  %v2209_v30 = vadd.s32 1, %v2205_v57  ;;  %vm2089_vm5 = vcmp.eq.s32.totalorder %v6420_v4, 2  ;;  %v6432_v20 = vadd.f32 %v2456_v33, %v5394_v1 }
 0x276   : >> { %v2068_v14 = vmul.f32 %v6412_v63, %v6412_v63  ;;  %vm2296_vm4 = vcmp.gt.s32.totalorder %v2295_v44, 0  ;;  %v2293_v5 = vor.u32 8388608, %v2292_v21  ;;  %vm2086_vm6 = vcmp.eq.s32.totalorder %v6420_v4, 0 }
 0x277   : >> { %v2210_v53 = vsel %vm2208_vm3, %v2209_v30, %v2205_v57  ;;  %v2297_v10 = vsel %vm2296_vm4, %v2295_v44, 0  ;;  %vm2085_vm7 = vcmp.lt.s32.totalorder %v6420_v4, 2  ;;  %v2461_v18 = vand.u32 2139095040, %v6432_v20  ;;  %s2275_s5 = scalar_lea.vmem [#allocation24], %s6572_s16  ;;  %s6660_s16 = sld [smem:[%s5358_s0 + %s6072_s14]] }
 0x278   : >> { %v2069_v61 = vmul.f32 -0.001358992, %v2068_v14  ;;  %v2076_v22 = vmul.f32 -0.00019511016, %v2068_v14  ;;  %v2211_v59 = vadd.s32 %v2210_v53, %v2206_v58  ;;  %v2299_v60 = vand.u32 31, %v2297_v10 }
 0x279   : >> { %v6435_v42 = vshrl.u32 %v2297_v10, 5  ;;  %v6460_v35 = vshll.u32 %v2293_v5, 8  ;;  %vm2115_vm11 = vcmp.lt.s32.totalorder %v6153_v29, 0  ;;  %vm6508_vm0 = vcmp.le.f32.partialorder %v2113_v19, 0.7853982 }
 0x27a   : >> { %v2070_v3 = vadd.f32 0.041655596, %v2069_v61  ;;  %v2077_v51 = vadd.f32 0.008332121, %v2076_v22  ;;  %v2212_v41 = vadd.s32 536870912, %v2211_v59  ;;  %v6437_v47 = vsub.s32 32, %v2299_v60 }
 0x27b   : >> { %v2302_v37 = vshll.u32 %v4944_v46, %v2299_v60  ;;  %v2305_v43 = vshll.u32 %v4945_v48, %v2299_v60  ;;  %v2308_v26 = vshll.u32 %v4946_v50, %v2299_v60  ;;  %v2311_v12 = vshll.u32 %v4947_v52, %v2299_v60 }
 0x27c   : >> { %v2071_v39 = vmul.f32 %v2070_v3, %v2068_v14  ;;  %v2078_v11 = vmul.f32 %v2077_v51, %v2068_v14  ;;  %v6442_v24 = vshrl.u32 %v2212_v41, 30  ;;  %v2303_v25 = vshrl.u32 %v4945_v48, %v6437_v47 }
 0x27d   : >> { %v2306_v27 = vshrl.u32 %v4946_v50, %v6437_v47  ;;  %v2309_v2 = vshrl.u32 %v4947_v52, %v6437_v47  ;;  %v2312_v45 = vshrl.u32 %v4948_v54, %v6437_v47  ;;  %vm2317_vm9 = vcmp.lt.s32.totalorder %v6435_v42, 1 }
 0x27e   : >> { %v2072_v17 = vadd.f32 -0.4999988, %v2071_v39  ;;  %v2079_v6 = vadd.f32 -0.16666654, %v2078_v11  ;;  %v2214_v13 = vshll.u32 %v6442_v24, 30  ;;  %v6455_v38 = vor.u32 %v2303_v25, %v2302_v37 }
 0x27f   : >> { %v6463_v34 = vor.u32 %v2306_v27, %v2305_v43  ;;  %v2313_v58 = vor.u32 %v2312_v45, %v2311_v12  ;;  %v2314_v44 = vshll.u32 %v4948_v54, %v2299_v60  ;;  %v2315_v32 = vshrl.u32 %v4949_v62, %v6437_v47 }
 0x280   : >> { %v2073_v9 = vmul.f32 %v2072_v17, %v2068_v14  ;;  %v2080_v7 = vmul.f32 %v2079_v6, %v2068_v14  ;;  %v2215_v57 = vsub.s32 %v2211_v59, %v2214_v13  ;;  %v2310_v14 = vor.u32 %v2309_v2, %v2308_v26 }
 0x281   : >> { %v2104_v61 = vadd.f32 %v2103_v49, %v2100_v8  ;;  %v2316_v22 = vor.u32 %v2315_v32, %v2314_v44  ;;  %vm2319_vm12 = vcmp.lt.s32.totalorder %v6435_v42, 3  ;;  %vm2320_vm13 = vcmp.lt.s32.totalorder %v6435_v42, 4 }
 0x282   : >> { %v2074_v28 = vadd.f32 1.0, %v2073_v9  ;;  %v2081_v31 = vadd.f32 1.0, %v2080_v7  ;;  %vm2216_vm10 = vcmp.lt.s32.totalorder %v2215_v57, 0  ;;  %v2217_v33 = vsub.s32 0, %v2215_v57 }
 0x283   : >> { %vm2318_vm14 = vcmp.lt.s32.totalorder %v6435_v42, 2  ;;  %v2325_v59 = vsel %vm2317_vm9, %v6455_v38, %v6463_v34  ;;  %v2326_v8 = vsel %vm2320_vm13, %v2313_v58, 920167782  ;;  %v2334_v11 = vand.u32 65535, %v6460_v35 }
 0x284   : >> { %v2082_v30 = vmul.f32 %v2081_v31, %v6412_v63  ;;  %v2090_v21 = vxor.u32 2147483648, %v2074_v28  ;;  %v2218_v3 = vsel %vm2216_vm10, %v2217_v33, %v2215_v57  ;;  %v2207_v63 = vadd.s32 %v6400_v40, %v6398_v55 }
 0x285   : >> { %v2219_v51 = vclz %v2218_v3  ;;  %v2327_v39 = vsel %vm2319_vm12, %v2310_v14, %v2326_v8  ;;  %v2462_v41 = vshrl.u32 %v2461_v18, 23  ;;  %v2335_v37 = vshrl.u32 %v6460_v35, 16 }
 0x286   : >> { %v2087_v53 = vxor.u32 2147483648, %v2082_v30  ;;  %v2091_v10 = vsel %vm2089_vm5, %v2090_v21, %v2082_v30  ;;  %v2328_v5 = vsel %vm2318_vm14, %v2325_v59, %v2327_v39  ;;  %v2237_v17 = vsub.s32 4, %v6442_v24 }
 0x287   : >> { %v4460_v40 = vadd.s32 4294967294, %v2219_v51  ;;  %v2330_v6 = vsel %vm2320_vm13, %v2316_v22, 1326507024  ;;  %v2359_v26 = vshrl.u32 %v2328_v5, 16  ;;  %v2329_v4 = vsel %vm2317_vm9, %v6463_v34, %v2310_v14 }
 0x288   : >> { %v2088_v60 = vsel %vm2086_vm6, %v2074_v28, %v2087_v53  ;;  %v2358_v27 = vand.u32 65535, %v2328_v5  ;;  %v2331_v12 = vsel %vm2319_vm12, %v2313_v58, %v2330_v6  ;;  %v4465_v23 = vadd.s32 4294967169, %v2462_v41 }
 0x289   : >> { %v2092_v55 = vsel %vm2085_vm7, %v2088_v60, %v2091_v10  ;;  %vm4461_vm15 = vcmp.lt.s32.totalorder %v4460_v40, 0  ;;  %v6503_v9 = vmul.u32 %v2359_v26, %v2334_v11  ;;  %v2238_v28 = vsel %vm2115_vm11, %v2237_v17, %v6442_v24 }
 0x28a   : >> { %v2093_v43 = vsel %vm2083_vm8, nan, %v2092_v55  ;;  %v2222_v2 = vsel %vm4461_vm15, 0, %v4460_v40  ;;  %v2301_v31 = vshrl.u32 %v4944_v46, %v6437_v47  ;;  %v2332_v49 = vsel %vm2318_vm14, %v2329_v4, %v2331_v12 }
 0x28b   : >> { %v2105_v25 = vadd.f32 %v2104_v61, %v2093_v43  ;;  %v2223_v13 = vsub.s32 32, %v2222_v2  ;;  %v2224_v18 = vshll.u32 %v2215_v57, %v2222_v2  ;;  %v2227_v45 = vsub.s32 4294967266, %v2222_v2 }
 0x28c   : >> { %v2458_v58 = vand.u32 2147483647, %v6432_v20  ;;  %v2336_v32 = vand.u32 65535, %v2332_v49  ;;  %v2360_v30 = vmul.u32 %v2358_v27, %v2334_v11  ;;  %v2337_v21 = vshrl.u32 %v2332_v49, 16 }
 0x28d   : >> { %2106 = vst [vmem:[%s5895_s1 + $0x2] sm:$0x1] %v2105_v25  ;;  %v2225_v44 = vshrl.u32 %v2207_v63, %v2223_v13  ;;  %v2228_v19 = vadd.s32 127, %v2227_v45  ;;  %v2362_v33 = vmul.u32 %v2358_v27, %v2335_v37  ;;  %v2364_v57 = vshll.u32 %v6503_v9, 16 }
 0x28e   : >> { %v2468_v61 = vadd.s32 1, %v4465_v23  ;;  %v2240_v24 = vsel %vm6508_vm0, 0, %v2238_v28  ;;  %v2322_v47 = vsel %vm2320_vm13, %v2310_v14, 2102212464  ;;  %v2338_v10 = vmul.u32 %v2336_v32, %v2334_v11 }
 0x28f   : >> { %v2226_v22 = vor.u32 %v2225_v44, %v2224_v18  ;;  %v2229_v53 = vshll.u32 %v2228_v19, 23  ;;  %v2339_v3 = vmul.u32 %v2337_v21, %v2334_v11  ;;  %v2340_v51 = vmul.u32 %v2336_v32, %v2335_v37 }
 0x290   : >> { %v2363_v63 = vmul.u32 %v2359_v26, %v2335_v37  ;;  %v2321_v60 = vsel %vm2317_vm9, %v2301_v31, %v6455_v38  ;;  %vm2368_vm1 = vc.u32 %v2360_v30, %v2364_v57  ;;  %v2323_v39 = vsel %vm2319_vm12, %v6463_v34, %v2322_v47 }
 0x291   : >> { %v2230_v59 = vor.u32 4788187, %v2229_v53  ;;  %v2233_v8 = vcvt.s32.f32 %v2226_v22  ;;  %v2341_v41 = vmul.u32 %v2337_v21, %v2335_v37  ;;  %v2342_v55 = vshll.u32 %v2339_v3, 16 }
 0x292   : >> { %v2366_v40 = vshll.u32 %v2362_v33, 16  ;;  %v2344_v14 = vshll.u32 %v2340_v51, 16  ;;  %v2365_v11 = vshrl.u32 %v6503_v9, 16  ;;  %v2369_v43 = vsel %vm2368_vm1, 1, %v4950_v56 }
 0x293   : >> { %v2231_v5 = vand.u32 2147483647, %v2230_v59  ;;  %vm2346_vm2 = vc.u32 %v2338_v10, %v2342_v55  ;;  %v2348_v17 = vadd.s32 %v2342_v55, %v2338_v10  ;;  %v2370_v6 = vadd.s32 %v2364_v57, %v2360_v30 }
 0x294   : >> { %v2371_v26 = vadd.s32 %v2369_v43, %v2363_v63  ;;  %v2347_v38 = vsel %vm2346_vm2, 1, %v4950_v56  ;;  %v2367_v4 = vshrl.u32 %v2362_v33, 16  ;;  %vm2469_vm3 = vcmp.gt.s32.totalorder %v2468_v61, 0 }
 0x295   : >> { %v2234_v25 = vmul.f32 %v2233_v8, %v2231_v5  ;;  %v2343_v34 = vshrl.u32 %v2339_v3, 16  ;;  %v2349_v37 = vadd.s32 %v2347_v38, %v2341_v41  ;;  %vm2350_vm4 = vc.u32 %v2348_v17, %v2344_v14 }
 0x296   : >> { %vm2372_vm5 = vc.u32 %v2370_v6, %v2366_v40  ;;  %v2351_v2 = vsel %vm2350_vm4, 1, %v4950_v56  ;;  %v2470_v9 = vsel %vm2469_vm3, %v2468_v61, 0  ;;  %v2345_v23 = vshrl.u32 %v2340_v51, 16 }
 0x297   : >> { %v2235_v27 = vxor.u32 2147483648, %v2234_v25  ;;  %v2373_v12 = vsel %vm2372_vm5, 1, %v4950_v56  ;;  %v2353_v13 = vadd.s32 %v2351_v2, %v2349_v37  ;;  %v2472_v45 = vand.u32 31, %v2470_v9 }
 0x298   : >> { %v2375_v18 = vadd.s32 %v2373_v12, %v2371_v26  ;;  %v2324_v31 = vsel %vm2318_vm14, %v2321_v60, %v2323_v39  ;;  %v6544_v49 = vadd.s32 %v2370_v6, %v2366_v40  ;;  %v6559_v42 = vand.u32 3, %v2240_v24 }
 0x299   : >> { %v2236_v28 = vsel %vm2115_vm11, %v2235_v27, %v2234_v25  ;;  %v2354_v19 = vadd.s32 %v2353_v13, %v2343_v34  ;;  %v6555_v30 = vsub.s32 32, %v2472_v45  ;;  %v2465_v33 = vand.u32 8388607, %v2458_v58 }
 0x29a   : >> { %v6549_v44 = vsel %vm6508_vm0, %v6153_v29, %v2236_v28  ;;  %v2376_v32 = vadd.s32 %v2375_v18, %v2365_v11  ;;  %v2378_v61 = vmul.u32 %v6460_v35, %v2324_v31  ;;  %v6566_v22 = vshrl.u32 %v2470_v9, 5  ;;  %v2269_v9 = vld [vmem:[%s2268_s27] sm:$0x1]  ;;  %s6673_s27 = sld [smem:[%s5365_s3 + %s6072_s14]] }
 0x29b   : >> { %v2241_v21 = vmul.f32 %v6549_v44, %v6549_v44  ;;  %v6563_v57 = vadd.s32 %v2354_v19, %v2345_v23  ;;  %v2475_v10 = vshll.u32 %v4944_v46, %v2472_v45  ;;  %v2478_v3 = vshll.u32 %v4945_v48, %v2472_v45  ;;  %v2272_v23 = vld [vmem:[%s2271_s22] sm:$0x1]  ;;  %s2799_s22 = ssub.f32 %s5471_s15, %s6669_s6 }
 0x29c   : >> { %v2377_v7 = vadd.s32 %v2376_v32, %v2367_v4  ;;  %v2476_v51 = vshrl.u32 %v4945_v48, %v6555_v30  ;;  %v2481_v35 = vshll.u32 %v4946_v50, %v2472_v45  ;;  %v2479_v8 = vshrl.u32 %v4946_v50, %v6555_v30  ;;  %s6727_s6 = sld [smem:[%s5368_s12 + %s6072_s14]] }
 0x29d   : >> { %v2242_v53 = vmul.f32 -0.001358992, %v2241_v21  ;;  %v2249_v47 = vmul.f32 -0.00019511016, %v2241_v21  ;;  %vm2380_vm6 = vc.u32 %v6563_v57, %v6544_v49  ;;  %v2482_v60 = vshrl.u32 %v4947_v52, %v6555_v30 }
 0x29e   : >> { %v2381_v24 = vadd.s32 1, %v2377_v7  ;;  %v2484_v41 = vshll.u32 %v4947_v52, %v2472_v45  ;;  %v2485_v55 = vshrl.u32 %v4948_v54, %v6555_v30  ;;  %v2487_v40 = vshll.u32 %v4948_v54, %v2472_v45 }
 0x29f   : >> { %v2243_v63 = vadd.f32 0.041655596, %v2242_v53  ;;  %v2250_v59 = vadd.f32 0.008332121, %v2249_v47  ;;  %v2466_v43 = vor.u32 8388608, %v2465_v33  ;;  %v6591_v17 = vor.u32 %v2476_v51, %v2475_v10 }
 0x2a0   : >> { %v2382_v39 = vsel %vm2380_vm6, %v2381_v24, %v2377_v7  ;;  %v2486_v6 = vor.u32 %v2485_v55, %v2484_v41  ;;  %v2488_v26 = vshrl.u32 %v4949_v62, %v6555_v30  ;;  %vm2258_vm7 = vcmp.lt.s32.totalorder %v6559_v42, 2  ;;  %v2276_v47 = vld [vmem:[%s2275_s5] sm:$0x1]  ;;  %s2440_s5 = scalar_lea.vmem [#allocation23], %s6660_s16  ;;  %s6832_s16 = sld [smem:[%s5338_s18 + %s6349_s30]] }
 0x2a1   : >> { %v2244_v5 = vmul.f32 %v2243_v63, %v2241_v21  ;;  %v2251_v14 = vmul.f32 %v2250_v59, %v2241_v21  ;;  %v2383_v11 = vadd.s32 %v2382_v39, %v2378_v61  ;;  %v6596_v34 = vor.u32 %v2479_v8, %v2478_v3 }
 0x2a2   : >> { %v6598_v37 = vor.u32 %v2482_v60, %v2481_v35  ;;  %v2489_v27 = vor.u32 %v2488_v26, %v2487_v40  ;;  %vm2490_vm8 = vcmp.lt.s32.totalorder %v6566_v22, 1  ;;  %vm2493_vm9 = vcmp.lt.s32.totalorder %v6566_v22, 4  ;;  %s2447_s14 = scalar_lea.vmem [#allocation24], %s6727_s6 }
 0x2a3   : >> { %v2245_v25 = vadd.f32 -0.4999988, %v2244_v5  ;;  %v2252_v38 = vadd.f32 -0.16666654, %v2251_v14  ;;  %v2384_v4 = vadd.s32 536870912, %v2383_v11  ;;  %vm2492_vm10 = vcmp.lt.s32.totalorder %v6566_v22, 3 }
 0x2a4   : >> { %vm2259_vm11 = vcmp.eq.s32.totalorder %v6559_v42, 0  ;;  %vm2491_vm12 = vcmp.lt.s32.totalorder %v6566_v22, 2  ;;  %v2499_v18 = vsel %vm2493_vm9, %v2486_v6, 920167782  ;;  %v6611_v45 = vshll.u32 %v2466_v43, 8 }
 0x2a5   : >> { %v2246_v2 = vmul.f32 %v2245_v25, %v2241_v21  ;;  %v2253_v12 = vmul.f32 %v2252_v38, %v2241_v21  ;;  %v6604_v13 = vshrl.u32 %v2384_v4, 30  ;;  %v2498_v32 = vsel %vm2490_vm8, %v6591_v17, %v6596_v34 }
 0x2a6   : >> { %vm2262_vm13 = vcmp.eq.s32.totalorder %v6559_v42, 2  ;;  %v2273_v21 = vadd.f32 %v2272_v23, %v2269_v9  ;;  %v2500_v33 = vsel %vm2492_vm10, %v6598_v37, %v2499_v18  ;;  %v2503_v7 = vsel %vm2493_vm9, %v2489_v27, 1326507024 }
 0x2a7   : >> { %v2247_v28 = vadd.f32 1.0, %v2246_v2  ;;  %v2254_v31 = vadd.f32 1.0, %v2253_v12  ;;  %v2386_v19 = vshll.u32 %v6604_v13, 30  ;;  %v2502_v3 = vsel %vm2490_vm8, %v6596_v34, %v6598_v37 }
 0x2a8   : >> { %v2501_v24 = vsel %vm2491_vm12, %v2498_v32, %v2500_v33  ;;  %v2504_v51 = vsel %vm2492_vm10, %v2486_v6, %v2503_v7  ;;  %v2507_v35 = vand.u32 65535, %v6611_v45  ;;  %v2508_v63 = vshrl.u32 %v6611_v45, 16 }
 0x2a9   : >> { %v2255_v61 = vmul.f32 %v2254_v31, %v6549_v44  ;;  %v2263_v53 = vxor.u32 2147483648, %v2247_v28  ;;  %v2387_v10 = vsub.s32 %v2383_v11, %v2386_v19  ;;  %vm2256_vm15 = vweird.f32 %v6153_v29 }
 0x2aa   : >> { %v2277_v60 = vadd.f32 %v2276_v47, %v2273_v21  ;;  %v2505_v39 = vsel %vm2491_vm12, %v2502_v3, %v2504_v51  ;;  %v2532_v41 = vshrl.u32 %v2501_v24, 16  ;;  %v2531_v6 = vand.u32 65535, %v2501_v24 }
 0x2ab   : >> { %v2260_v44 = vxor.u32 2147483648, %v2255_v61  ;;  %v2264_v59 = vsel %vm2262_vm13, %v2263_v53, %v2255_v61  ;;  %vm2388_vm14 = vcmp.lt.s32.totalorder %v2387_v10, 0  ;;  %v2389_v8 = vsub.s32 0, %v2387_v10 }
 0x2ac   : >> { %v2509_v5 = vand.u32 65535, %v2505_v39  ;;  %v2510_v14 = vshrl.u32 %v2505_v39, 16  ;;  %v2627_v26 = vstv %s2626_s2  ;;  %v2534_v23 = vmul.u32 %v2532_v41, %v2507_v35  ;;  %s2443_s2 = scalar_lea.vmem [#allocation23], %s6673_s27  ;;  %s6845_s27 = sld [smem:[%s5345_s28 + %s6349_s30]] }
 0x2ad   : >> { %v2261_v55 = vsel %vm2259_vm11, %v2247_v28, %v2260_v44  ;;  %v2390_v40 = vsel %vm2388_vm14, %v2389_v8, %v2387_v10  ;;  %v2379_v18 = vadd.s32 %v6544_v49, %v6563_v57  ;;  %v2628_v28 = vmul.f32 %v2627_v26, %v5389_v0 }
 0x2ae   : >> { %v2265_v11 = vsel %vm2258_vm7, %v2261_v55, %v2264_v59  ;;  %v2391_v43 = vclz %v2390_v40  ;;  %v2511_v29 = vmul.u32 %v2509_v5, %v2507_v35  ;;  %v2512_v38 = vmul.u32 %v2510_v14, %v2507_v35 }
 0x2af   : >> { %v2266_v25 = vsel %vm2256_vm15, nan, %v2265_v11  ;;  %v2513_v4 = vmul.u32 %v2509_v5, %v2508_v63  ;;  %v2514_v42 = vmul.u32 %v2510_v14, %v2508_v63  ;;  %v2535_v32 = vmul.u32 %v2531_v6, %v2508_v63 }
 0x2b0   : >> { %v2278_v27 = vadd.f32 %v2277_v60, %v2266_v25  ;;  %v4463_v2 = vadd.s32 4294967294, %v2391_v43  ;;  %v2515_v12 = vshll.u32 %v2512_v38, 16  ;;  %vm2287_vm2 = vcmp.lt.s32.totalorder %v6379_v15, 0 }
 0x2b1   : >> { %v2517_v9 = vshll.u32 %v2513_v4, 16  ;;  %v2474_v61 = vshrl.u32 %v4944_v46, %v6555_v30  ;;  %v2533_v57 = vmul.u32 %v2531_v6, %v2507_v35  ;;  %v2537_v53 = vshll.u32 %v2534_v23, 16 }
 0x2b2   : >> { %2279 = vst [vmem:[%s5814_s29 + $0x3] sm:$0x1] %v2278_v27  ;;  %vm4464_vm0 = vcmp.lt.s32.totalorder %v4463_v2, 0  ;;  %vm2519_vm1 = vc.u32 %v2511_v29, %v2515_v12  ;;  %v2521_v19 = vadd.s32 %v2515_v12, %v2511_v29  ;;  %v2516_v24 = vshrl.u32 %v2512_v38, 16  ;;  %s2616_s6 = scalar_lea.vmem [#allocation23], %s6845_s27  ;;  %s6962_s27 = sld [smem:[%s5358_s0 + %s6349_s30]] }
 0x2b3   : >> { %v2394_v31 = vsel %vm4464_vm0, 0, %v4463_v2  ;;  %v2520_v49 = vsel %vm2519_vm1, 1, %v4950_v56  ;;  %v2495_v30 = vsel %vm2493_vm9, %v6598_v37, 2102212464  ;;  %v2536_v35 = vmul.u32 %v2532_v41, %v2508_v63 }
 0x2b4   : >> { %v2395_v21 = vsub.s32 32, %v2394_v31  ;;  %v2396_v33 = vshll.u32 %v2387_v10, %v2394_v31  ;;  %v2399_v7 = vsub.s32 4294967266, %v2394_v31  ;;  %vm2523_vm3 = vc.u32 %v2521_v19, %v2517_v9 }
 0x2b5   : >> { %v2522_v51 = vadd.s32 %v2520_v49, %v2514_v42  ;;  %v2524_v10 = vsel %vm2523_vm3, 1, %v4950_v56  ;;  %v2539_v44 = vshll.u32 %v2535_v32, 16  ;;  %v2409_v60 = vsub.s32 4, %v6604_v13 }
 0x2b6   : >> { %v2397_v47 = vshrl.u32 %v2379_v18, %v2395_v21  ;;  %v2400_v3 = vadd.s32 127, %v2399_v7  ;;  %v2518_v55 = vshrl.u32 %v2513_v4, 16  ;;  %vm2541_vm4 = vc.u32 %v2533_v57, %v2537_v53  ;;  %v2441_v7 = vld [vmem:[%s2440_s5] sm:$0x1]  ;;  %s6874_s5 = sld [smem:[%s5375_s13 + %s6656_s8]] }
 0x2b7   : >> { %v2526_v39 = vadd.s32 %v2524_v10, %v2522_v51  ;;  %v2543_v40 = vadd.s32 %v2537_v53, %v2533_v57  ;;  %v6676_v5 = vadd.f32 %v2628_v28, %v5394_v1  ;;  %v2542_v63 = vsel %vm2541_vm4, 1, %v4950_v56  ;;  %v2444_v57 = vld [vmem:[%s2443_s2] sm:$0x1]  ;;  %s2613_s2 = scalar_lea.vmem [#allocation23], %s6832_s16 }
 0x2b8   : >> { %v2398_v59 = vor.u32 %v2397_v47, %v2396_v33  ;;  %v2401_v8 = vshll.u32 %v2400_v3, 23  ;;  %v2494_v41 = vsel %vm2490_vm8, %v2474_v61, %v6591_v17  ;;  %v2538_v43 = vshrl.u32 %v2534_v23, 16 }
 0x2b9   : >> { %v2527_v11 = vadd.s32 %v2526_v39, %v2516_v24  ;;  %v2544_v6 = vadd.s32 %v2542_v63, %v2536_v35  ;;  %vm2545_vm5 = vc.u32 %v2543_v40, %v2539_v44  ;;  %v2496_v25 = vsel %vm2492_vm10, %v6596_v34, %v2495_v30 }
 0x2ba   : >> { %v2402_v37 = vor.u32 4788187, %v2401_v8  ;;  %v2405_v14 = vcvt.s32.f32 %v2398_v59  ;;  %v2546_v29 = vsel %vm2545_vm5, 1, %v4950_v56  ;;  %v2633_v38 = vand.u32 2139095040, %v6676_v5 }
 0x2bb   : >> { %v2410_v4 = vsel %vm2287_vm2, %v2409_v60, %v6604_v13  ;;  %v2540_v27 = vshrl.u32 %v2535_v32, 16  ;;  %v2548_v17 = vadd.s32 %v2546_v29, %v2544_v6  ;;  %v6690_v12 = vadd.s32 %v2527_v11, %v2518_v55 }
 0x2bc   : >> { %v2403_v26 = vand.u32 2147483647, %v2402_v37  ;;  %v6692_v9 = vadd.s32 %v2543_v40, %v2539_v44  ;;  %v2634_v23 = vshrl.u32 %v2633_v38, 23  ;;  %v2497_v34 = vsel %vm2491_vm12, %v2494_v41, %v2496_v25  ;;  %s2971_s16 = ssub.f32 %s5471_s15, %s6874_s5 }
 0x2bd   : >> { %v2549_v18 = vadd.s32 %v2548_v17, %v2538_v43  ;;  %vm6698_vm6 = vcmp.le.f32.partialorder %v2285_v36, 0.7853982  ;;  %v2630_v28 = vand.u32 2147483647, %v6676_v5  ;;  %v2551_v21 = vmul.u32 %v6611_v45, %v2497_v34  ;;  %s6972_s5 = sld [smem:[%s5365_s3 + %s6349_s30]] }
 0x2be   : >> { %v2406_v2 = vmul.f32 %v2405_v14, %v2403_v26  ;;  %v4468_v31 = vadd.s32 4294967169, %v2634_v23  ;;  %v2412_v19 = vsel %vm6698_vm6, 0, %v2410_v4  ;;  %vm2553_vm7 = vc.u32 %v6690_v12, %v6692_v9 }
 0x2bf   : >> { %v2550_v32 = vadd.s32 %v2549_v18, %v2540_v27  ;;  %v2637_v45 = vand.u32 8388607, %v2630_v28  ;;  %v2800_v53 = vstv %s2799_s22  ;;  %v6723_v47 = vand.u32 3, %v2412_v19  ;;  %s6860_s22 = sld [smem:[%s5348_s21 + %s6349_s30]] }
 0x2c0   : >> { %v2407_v13 = vxor.u32 2147483648, %v2406_v2  ;;  %v2640_v36 = vadd.s32 1, %v4468_v31  ;;  %v2445_v35 = vadd.f32 %v2444_v57, %v2441_v7  ;;  %v2801_v59 = vmul.f32 %v2800_v53, %v5389_v0 }
 0x2c1   : >> { %v2554_v61 = vadd.s32 1, %v2550_v32  ;;  %v2638_v55 = vor.u32 8388608, %v2637_v45  ;;  %vm2434_vm9 = vcmp.eq.s32.totalorder %v6723_v47, 2  ;;  %vm2430_vm10 = vcmp.lt.s32.totalorder %v6723_v47, 2  ;;  %v2448_v45 = vld [vmem:[%s2447_s14] sm:$0x1] }
 0x2c2   : >> { %v2408_v22 = vsel %vm2287_vm2, %v2407_v13, %v2406_v2  ;;  %vm2641_vm8 = vcmp.gt.s32.totalorder %v2640_v36, 0  ;;  %v6750_v2 = vadd.f32 %v2801_v59, %v5394_v1  ;;  %vm2428_vm11 = vweird.f32 %v6379_v15 }
 0x2c3   : >> { %v6715_v33 = vsel %vm6698_vm6, %v6379_v15, %v2408_v22  ;;  %v2555_v3 = vsel %vm2553_vm7, %v2554_v61, %v2550_v32  ;;  %v2642_v24 = vsel %vm2641_vm8, %v2640_v36, 0  ;;  %v6758_v18 = vshll.u32 %v2638_v55, 8 }
 0x2c4   : >> { %v2413_v49 = vmul.f32 %v6715_v33, %v6715_v33  ;;  %v2556_v10 = vadd.s32 %v2555_v3, %v2551_v21  ;;  %v2644_v44 = vand.u32 31, %v2642_v24  ;;  %v6731_v40 = vshrl.u32 %v2642_v24, 5 }
 0x2c5   : >> { %vm2431_vm1 = vcmp.eq.s32.totalorder %v6723_v47, 0  ;;  %vm2460_vm3 = vcmp.lt.s32.totalorder %v6432_v20, 0  ;;  %vm6808_vm4 = vcmp.le.f32.partialorder %v2458_v58, 0.7853982  ;;  %s2620_s14 = scalar_lea.vmem [#allocation24], %s6860_s22  ;;  %s6968_s22 = sadd.s32 6, %s5460_s26 }
 0x2c6   : >> { %v2414_v51 = vmul.f32 -0.001358992, %v2413_v49  ;;  %v2421_v30 = vmul.f32 -0.00019511016, %v2413_v49  ;;  %v2557_v39 = vadd.s32 536870912, %v2556_v10  ;;  %v6733_v37 = vsub.s32 32, %v2644_v44 }
 0x2c7   : >> { %v2647_v14 = vshll.u32 %v4944_v46, %v2644_v44  ;;  %v2650_v11 = vshll.u32 %v4945_v48, %v2644_v44  ;;  %v2653_v6 = vshll.u32 %v4946_v50, %v2644_v44  ;;  %v2656_v38 = vshll.u32 %v4947_v52, %v2644_v44 }
 0x2c8   : >> { %v2415_v8 = vadd.f32 0.041655596, %v2414_v51  ;;  %v2422_v60 = vadd.f32 0.008332121, %v2421_v30  ;;  %v6737_v43 = vshrl.u32 %v2557_v39, 30  ;;  %v2648_v26 = vshrl.u32 %v4945_v48, %v6733_v37 }
 0x2c9   : >> { %v2651_v25 = vshrl.u32 %v4946_v50, %v6733_v37  ;;  %v2654_v29 = vshrl.u32 %v4947_v52, %v6733_v37  ;;  %v2657_v34 = vshrl.u32 %v4948_v54, %v6733_v37  ;;  %vm2662_vm12 = vcmp.lt.s32.totalorder %v6731_v40, 1 }
 0x2ca   : >> { %v2416_v63 = vmul.f32 %v2415_v8, %v2413_v49  ;;  %v2423_v41 = vmul.f32 %v2422_v60, %v2413_v49  ;;  %v2559_v17 = vshll.u32 %v6737_v43, 30  ;;  %v6753_v23 = vor.u32 %v2648_v26, %v2647_v14 }
 0x2cb   : >> { %v6760_v19 = vor.u32 %v2651_v25, %v2650_v11  ;;  %v2655_v32 = vor.u32 %v2654_v29, %v2653_v6  ;;  %v2658_v22 = vor.u32 %v2657_v34, %v2656_v38  ;;  %v2659_v21 = vshll.u32 %v4948_v54, %v2644_v44 }
 0x2cc   : >> { %v2417_v4 = vadd.f32 -0.4999988, %v2416_v63  ;;  %v2424_v27 = vadd.f32 -0.16666654, %v2423_v41  ;;  %v2560_v31 = vsub.s32 %v2556_v10, %v2559_v17  ;;  %v2660_v36 = vshrl.u32 %v4949_v62, %v6733_v37 }
 0x2cd   : >> { %vm2664_vm14 = vcmp.lt.s32.totalorder %v6731_v40, 3  ;;  %vm2665_vm15 = vcmp.lt.s32.totalorder %v6731_v40, 4  ;;  %vm2663_vm0 = vcmp.lt.s32.totalorder %v6731_v40, 2  ;;  %v2670_v10 = vsel %vm2662_vm12, %v6753_v23, %v6760_v19 }
 0x2ce   : >> { %v2418_v42 = vmul.f32 %v2417_v4, %v2413_v49  ;;  %v2425_v13 = vmul.f32 %v2424_v27, %v2413_v49  ;;  %vm2561_vm13 = vcmp.lt.s32.totalorder %v2560_v31, 0  ;;  %v2562_v57 = vsub.s32 0, %v2560_v31 }
 0x2cf   : >> { %v2661_v53 = vor.u32 %v2660_v36, %v2659_v21  ;;  %v2806_v49 = vand.u32 2139095040, %v6750_v2  ;;  %v2671_v44 = vsel %vm2665_vm15, %v2658_v22, 920167782  ;;  %v2552_v39 = vadd.s32 %v6692_v9, %v6690_v12 }
 0x2d0   : >> { %v2419_v7 = vadd.f32 1.0, %v2418_v42  ;;  %v2426_v61 = vadd.f32 1.0, %v2425_v13  ;;  %v2563_v51 = vsel %vm2561_vm13, %v2562_v57, %v2560_v31  ;;  %v2672_v60 = vsel %vm2664_vm14, %v2655_v32, %v2671_v44 }
 0x2d1   : >> { %v2564_v30 = vclz %v2563_v51  ;;  %v2673_v14 = vsel %vm2663_vm0, %v2670_v10, %v2672_v60  ;;  %v2679_v11 = vand.u32 65535, %v6758_v18  ;;  %v2675_v41 = vsel %vm2665_vm15, %v2661_v53, 1326507024 }
 0x2d2   : >> { %v2427_v3 = vmul.f32 %v2426_v61, %v6715_v33  ;;  %v2435_v24 = vxor.u32 2147483648, %v2419_v7  ;;  %v2449_v33 = vadd.f32 %v2448_v45, %v2445_v35  ;;  %v2680_v6 = vshrl.u32 %v6758_v18, 16 }
 0x2d3   : >> { %v4466_v55 = vadd.s32 4294967294, %v2564_v30  ;;  %v2807_v35 = vshrl.u32 %v2806_v49, 23  ;;  %v2674_v12 = vsel %vm2662_vm12, %v6760_v19, %v2655_v32  ;;  %v2704_v9 = vshrl.u32 %v2673_v14, 16 }
 0x2d4   : >> { %v2432_v59 = vxor.u32 2147483648, %v2427_v3  ;;  %v2436_v8 = vsel %vm2434_vm9, %v2435_v24, %v2427_v3  ;;  %v2676_v38 = vsel %vm2664_vm14, %v2658_v22, %v2675_v41  ;;  %v2703_v4 = vand.u32 65535, %v2673_v14 }
 0x2d5   : >> { %vm4467_vm2 = vcmp.lt.s32.totalorder %v4466_v55, 0  ;;  %v2646_v47 = vshrl.u32 %v4944_v46, %v6733_v37  ;;  %v2803_v13 = vand.u32 2147483647, %v6750_v2  ;;  %v2677_v15 = vsel %vm2663_vm0, %v2674_v12, %v2676_v38 }
 0x2d6   : >> { %v2433_v63 = vsel %vm2431_vm1, %v2419_v7, %v2432_v59  ;;  %v2567_v29 = vsel %vm4467_vm2, 0, %v4466_v55  ;;  %v2706_v7 = vmul.u32 %v2704_v9, %v2679_v11  ;;  %v2681_v22 = vand.u32 65535, %v2677_v15 }
 0x2d7   : >> { %v2437_v26 = vsel %vm2430_vm10, %v2433_v63, %v2436_v8  ;;  %v2568_v17 = vsub.s32 32, %v2567_v29  ;;  %v2569_v34 = vshll.u32 %v2560_v31, %v2567_v29  ;;  %v2572_v42 = vsub.s32 4294967266, %v2567_v29 }
 0x2d8   : >> { %v2438_v25 = vsel %vm2428_vm11, nan, %v2437_v26  ;;  %v2682_v61 = vshrl.u32 %v2677_v15, 16  ;;  %v2707_v57 = vmul.u32 %v2703_v4, %v2680_v6  ;;  %v4471_v45 = vadd.s32 4294967169, %v2807_v35 }
 0x2d9   : >> { %v2450_v27 = vadd.f32 %v2449_v33, %v2438_v25  ;;  %v2570_v21 = vshrl.u32 %v2552_v39, %v2568_v17  ;;  %v2573_v36 = vadd.s32 127, %v2572_v42  ;;  %v2667_v49 = vsel %vm2665_vm15, %v2655_v32, 2102212464 }
 0x2da   : >> { %v2705_v3 = vmul.u32 %v2703_v4, %v2679_v11  ;;  %v2683_v24 = vmul.u32 %v2681_v22, %v2679_v11  ;;  %v2684_v51 = vmul.u32 %v2682_v61, %v2679_v11  ;;  %v2685_v30 = vmul.u32 %v2681_v22, %v2680_v6 }
 0x2db   : >> { %2451 = vst [vmem:[%s5895_s1 + $0x3] sm:$0x1] %v2450_v27  ;;  %v2571_v37 = vor.u32 %v2570_v21, %v2569_v34  ;;  %v2574_v53 = vshll.u32 %v2573_v36, 23  ;;  %v2709_v10 = vshll.u32 %v2706_v7, 16  ;;  %v2582_v8 = vsub.s32 4, %v6737_v43 }
 0x2dc   : >> { %v2666_v58 = vsel %vm2662_vm12, %v2646_v47, %v6753_v23  ;;  %v2686_v33 = vmul.u32 %v2682_v61, %v2680_v6  ;;  %v2687_v60 = vshll.u32 %v2684_v51, 16  ;;  %v2708_v39 = vmul.u32 %v2704_v9, %v2680_v6 }
 0x2dd   : >> { %v2575_v44 = vor.u32 4788187, %v2574_v53  ;;  %v2578_v59 = vcvt.s32.f32 %v2571_v37  ;;  %v2711_v55 = vshll.u32 %v2707_v57, 16  ;;  %v2668_v32 = vsel %vm2664_vm14, %v6760_v19, %v2667_v49 }
 0x2de   : >> { %v2689_v11 = vshll.u32 %v2685_v30, 16  ;;  %v2710_v63 = vshrl.u32 %v2706_v7, 16  ;;  %vm2691_vm5 = vc.u32 %v2683_v24, %v2687_v60  ;;  %v2693_v41 = vadd.s32 %v2687_v60, %v2683_v24 }
 0x2df   : >> { %v2576_v14 = vand.u32 2147483647, %v2575_v44  ;;  %vm2713_vm6 = vc.u32 %v2705_v3, %v2709_v10  ;;  %v2715_v35 = vadd.s32 %v2709_v10, %v2705_v3  ;;  %v2688_v12 = vshrl.u32 %v2684_v51, 16 }
 0x2e0   : >> { %v2692_v25 = vsel %vm2691_vm5, 1, %v4950_v56  ;;  %v2714_v23 = vsel %vm2713_vm6, 1, %v4950_v56  ;;  %vm2695_vm7 = vc.u32 %v2693_v41, %v2689_v11  ;;  %v2690_v29 = vshrl.u32 %v2685_v30, 16 }
 0x2e1   : >> { %v2579_v26 = vmul.f32 %v2578_v59, %v2576_v14  ;;  %v2694_v6 = vadd.s32 %v2692_v25, %v2686_v33  ;;  %v2716_v9 = vadd.s32 %v2714_v23, %v2708_v39  ;;  %vm2717_vm8 = vc.u32 %v2715_v35, %v2711_v55 }
 0x2e2   : >> { %v2696_v38 = vsel %vm2695_vm7, 1, %v4950_v56  ;;  %v2718_v4 = vsel %vm2717_vm8, 1, %v4950_v56  ;;  %v2712_v17 = vshrl.u32 %v2707_v57, 16  ;;  %v2813_v42 = vadd.s32 1, %v4471_v45 }
 0x2e3   : >> { %v2580_v19 = vxor.u32 2147483648, %v2579_v26  ;;  %v2698_v27 = vadd.s32 %v2696_v38, %v2694_v6  ;;  %v2720_v34 = vadd.s32 %v2718_v4, %v2716_v9  ;;  %v2583_v21 = vsel %vm2460_vm3, %v2582_v8, %v6737_v43  ;;  %v2614_v38 = vld [vmem:[%s2613_s2] sm:$0x1]  ;;  %s6978_s2 = sld [smem:[%s5355_s7 + %s6968_s22]] }
 0x2e4   : >> { %v2669_v36 = vsel %vm2663_vm0, %v2666_v58, %v2668_v32  ;;  %v6836_v15 = vadd.s32 %v2715_v35, %v2711_v55  ;;  %vm2814_vm9 = vcmp.gt.s32.totalorder %v2813_v42, 0  ;;  %v6851_v40 = vand.u32 8388607, %v2803_v13  ;;  %v2617_v4 = vld [vmem:[%s2616_s6] sm:$0x1]  ;;  %s6982_s6 = sld [smem:[%s5368_s12 + %s6349_s30]]  ;;  %s2785_s30 = scalar_lea.vmem [#allocation23], %s6962_s27 }
 0x2e5   : >> { %v2581_v47 = vsel %vm2460_vm3, %v2580_v19, %v2579_v26  ;;  %v2699_v22 = vadd.s32 %v2698_v27, %v2688_v12  ;;  %v2721_v61 = vadd.s32 %v2720_v34, %v2710_v63  ;;  %v2815_v57 = vsel %vm2814_vm9, %v2813_v42, 0  ;;  %s7141_s27 = sld [smem:[%s5345_s28 + %s6656_s8]] }
 0x2e6   : >> { %v6841_v7 = vsel %vm6808_vm4, %v6432_v20, %v2581_v47  ;;  %v2585_v45 = vsel %vm6808_vm4, 0, %v2583_v21  ;;  %v2817_v49 = vand.u32 31, %v2815_v57  ;;  %v2723_v51 = vmul.u32 %v6758_v18, %v2669_v36 }
 0x2e7   : >> { %v2586_v43 = vmul.f32 %v6841_v7, %v6841_v7  ;;  %v6855_v37 = vadd.s32 %v2699_v22, %v2690_v29  ;;  %v2722_v53 = vadd.s32 %v2721_v61, %v2712_v17  ;;  %v6866_v59 = vand.u32 3, %v2585_v45  ;;  %v2621_v45 = vld [vmem:[%s2620_s14] sm:$0x1]  ;;  %s2788_s14 = scalar_lea.vmem [#allocation23], %s6972_s5  ;;  %s7159_s5 = sld [smem:[%s5375_s13 + %s6968_s22]] }
 0x2e8   : >> { %v6864_v10 = vsub.s32 32, %v2817_v49  ;;  %v2811_v58 = vor.u32 8388608, %v6851_v40  ;;  %v6869_v33 = vshrl.u32 %v2815_v57, 5  ;;  %v2820_v55 = vshll.u32 %v4944_v46, %v2817_v49 }
 0x2e9   : >> { %v2587_v3 = vmul.f32 -0.001358992, %v2586_v43  ;;  %v2594_v24 = vmul.f32 -0.00019511016, %v2586_v43  ;;  %vm2725_vm10 = vc.u32 %v6855_v37, %v6836_v15  ;;  %v2726_v30 = vadd.s32 1, %v2722_v53 }
 0x2ea   : >> { %v2821_v14 = vshrl.u32 %v4945_v48, %v6864_v10  ;;  %v2823_v32 = vshll.u32 %v4945_v48, %v2817_v49  ;;  %v2824_v11 = vshrl.u32 %v4946_v50, %v6864_v10  ;;  %v2826_v63 = vshll.u32 %v4946_v50, %v2817_v49  ;;  %s2792_s9 = scalar_lea.vmem [#allocation24], %s6982_s6 }
 0x2eb   : >> { %v2588_v31 = vadd.f32 0.041655596, %v2587_v3  ;;  %v2595_v44 = vadd.f32 0.008332121, %v2594_v24  ;;  %v2727_v8 = vsel %vm2725_vm10, %v2726_v30, %v2722_v53  ;;  %vm2603_vm11 = vcmp.lt.s32.totalorder %v6866_v59, 2 }
 0x2ec   : >> { %v2728_v18 = vadd.s32 %v2727_v8, %v2723_v51  ;;  %v2827_v12 = vshrl.u32 %v4947_v52, %v6864_v10  ;;  %vm2601_vm12 = vweird.f32 %v6432_v20  ;;  %v2829_v25 = vshll.u32 %v4947_v52, %v2817_v49 }
 0x2ed   : >> { %v2589_v60 = vmul.f32 %v2588_v31, %v2586_v43  ;;  %v2596_v39 = vmul.f32 %v2595_v44, %v2586_v43  ;;  %v2830_v23 = vshrl.u32 %v4948_v54, %v6864_v10  ;;  %v2832_v6 = vshll.u32 %v4948_v54, %v2817_v49 }
 0x2ee   : >> { %v2729_v26 = vadd.s32 536870912, %v2728_v18  ;;  %v2833_v9 = vshrl.u32 %v4949_v62, %v6864_v10  ;;  %vm2604_vm13 = vcmp.eq.s32.totalorder %v6866_v59, 0  ;;  %vm2607_vm14 = vcmp.eq.s32.totalorder %v6866_v59, 2 }
 0x2ef   : >> { %v2590_v41 = vadd.f32 -0.4999988, %v2589_v60  ;;  %v2597_v35 = vadd.f32 -0.16666654, %v2596_v39  ;;  %v6898_v17 = vor.u32 %v2821_v14, %v2820_v55  ;;  %v6900_v34 = vor.u32 %v2824_v11, %v2823_v32 }
 0x2f0   : >> { %v6895_v27 = vshrl.u32 %v2729_v26, 30  ;;  %v2831_v42 = vor.u32 %v2830_v23, %v2829_v25  ;;  %vm2835_vm15 = vcmp.lt.s32.totalorder %v6869_v33, 1  ;;  %v2618_v22 = vadd.f32 %v2617_v4, %v2614_v38 }
 0x2f1   : >> { %v2591_v19 = vmul.f32 %v2590_v41, %v2586_v43  ;;  %v2598_v29 = vmul.f32 %v2597_v35, %v2586_v43  ;;  %v2828_v61 = vor.u32 %v2827_v12, %v2826_v63  ;;  %v2834_v43 = vor.u32 %v2833_v9, %v2832_v6 }
 0x2f2   : >> { %v2731_v36 = vshll.u32 %v6895_v27, 30  ;;  %vm2838_vm0 = vcmp.lt.s32.totalorder %v6869_v33, 4  ;;  %vm2837_vm1 = vcmp.lt.s32.totalorder %v6869_v33, 3  ;;  %vm2836_vm2 = vcmp.lt.s32.totalorder %v6869_v33, 2  ;;  %v2786_v33 = vld [vmem:[%s2785_s30] sm:$0x1] }
 0x2f3   : >> { %v2592_v47 = vadd.f32 1.0, %v2591_v19  ;;  %v2599_v21 = vadd.f32 1.0, %v2598_v29  ;;  %v2843_v49 = vsel %vm2835_vm15, %v6898_v17, %v6900_v34  ;;  %v2844_v3 = vsel %vm2838_vm0, %v2831_v42, 920167782  ;;  %s2961_s30 = scalar_lea.vmem [#allocation23], %s7141_s27  ;;  %s7286_s27 = sld [smem:[%s5358_s0 + %s6656_s8]] }
 0x2f4   : >> { %v6907_v53 = vsub.s32 %v2728_v18, %v2731_v36  ;;  %v6919_v24 = vshll.u32 %v2811_v58, 8  ;;  %v2622_v31 = vadd.f32 %v2621_v45, %v2618_v22  ;;  %v2845_v44 = vsel %vm2837_vm1, %v2828_v61, %v2844_v3 }
 0x2f5   : >> { %v2600_v40 = vmul.f32 %v2599_v21, %v6841_v7  ;;  %v2608_v57 = vxor.u32 2147483648, %v2592_v47  ;;  %v2847_v8 = vsel %vm2835_vm15, %v6900_v34, %v2828_v61  ;;  %v2848_v58 = vsel %vm2838_vm0, %v2834_v43, 1326507024 }
 0x2f6   : >> { %vm2733_vm3 = vcmp.lt.s32.totalorder %v6907_v53, 0  ;;  %v2734_v30 = vsub.s32 0, %v6907_v53  ;;  %v2846_v18 = vsel %vm2836_vm2, %v2843_v49, %v2845_v44  ;;  %v2972_v55 = vstv %s2971_s16  ;;  %s3144_s16 = ssub.f32 %s5471_s15, %s6978_s2 }
 0x2f7   : >> { %v2605_v7 = vxor.u32 2147483648, %v2600_v40  ;;  %v2609_v51 = vsel %vm2607_vm14, %v2608_v57, %v2600_v40  ;;  %v2849_v11 = vsel %vm2837_vm1, %v2831_v42, %v2848_v58  ;;  %v2852_v63 = vand.u32 65535, %v6919_v24  ;;  %s7163_s2 = sld [smem:[%s5348_s21 + %s6656_s8]] }
 0x2f8   : >> { %v2735_v39 = vsel %vm2733_vm3, %v2734_v30, %v6907_v53  ;;  %v2850_v35 = vsel %vm2836_vm2, %v2847_v8, %v2849_v11  ;;  %v2853_v26 = vshrl.u32 %v6919_v24, 16  ;;  %v2877_v12 = vshrl.u32 %v2846_v18, 16 }
 0x2f9   : >> { %v2606_v60 = vsel %vm2604_vm13, %v2592_v47, %v2605_v7  ;;  %v2736_v32 = vclz %v2735_v39  ;;  %v2854_v6 = vand.u32 65535, %v2850_v35  ;;  %v2855_v59 = vshrl.u32 %v2850_v35, 16 }
 0x2fa   : >> { %v2610_v14 = vsel %vm2603_vm11, %v2606_v60, %v2609_v51  ;;  %v2876_v9 = vand.u32 65535, %v2846_v18  ;;  %v2973_v19 = vmul.f32 %v2972_v55, %v5389_v0  ;;  %v2724_v29 = vadd.s32 %v6836_v15, %v6855_v37 }
 0x2fb   : >> { %v2611_v41 = vsel %vm2601_vm12, nan, %v2610_v14  ;;  %v4469_v23 = vadd.s32 4294967294, %v2736_v32  ;;  %v2819_v20 = vshrl.u32 %v4944_v46, %v6864_v10  ;;  %v6953_v38 = vmul.u32 %v2877_v12, %v2852_v63 }
 0x2fc   : >> { %v2623_v25 = vadd.f32 %v2622_v31, %v2611_v41  ;;  %v2856_v42 = vmul.u32 %v2854_v6, %v2852_v63  ;;  %v2857_v47 = vmul.u32 %v2855_v59, %v2852_v63  ;;  %v2858_v21 = vmul.u32 %v2854_v6, %v2853_v26 }
 0x2fd   : >> { %vm4470_vm4 = vcmp.lt.s32.totalorder %v4469_v23, 0  ;;  %v2754_v15 = vsub.s32 4, %v6895_v27  ;;  %vm2632_vm5 = vcmp.lt.s32.totalorder %v6676_v5, 0  ;;  %v2840_v37 = vsel %vm2838_vm0, %v2828_v61, 2102212464 }
 0x2fe   : >> { %2624 = vst [vmem:[%s5814_s29 + $0x4] sm:$0x1] %v2623_v25  ;;  %v2739_v4 = vsel %vm4470_vm4, 0, %v4469_v23  ;;  %v2859_v10 = vmul.u32 %v2855_v59, %v2853_v26  ;;  %v2860_v40 = vshll.u32 %v2857_v47, 16  ;;  %v2880_v57 = vmul.u32 %v2876_v9, %v2853_v26 }
 0x2ff   : >> { %v2740_v36 = vsub.s32 32, %v2739_v4  ;;  %v2741_v22 = vshll.u32 %v6907_v53, %v2739_v4  ;;  %v2744_v43 = vsub.s32 4294967266, %v2739_v4  ;;  %v2862_v3 = vshll.u32 %v2858_v21, 16 }
 0x300   : >> { %v6965_v7 = vadd.f32 %v2973_v19, %v5394_v1  ;;  %vm2864_vm6 = vc.u32 %v2856_v42, %v2860_v40  ;;  %v2866_v61 = vadd.s32 %v2860_v40, %v2856_v42  ;;  %v2878_v53 = vmul.u32 %v2876_v9, %v2852_v63 }
 0x301   : >> { %v2742_v45 = vshrl.u32 %v2724_v29, %v2740_v36  ;;  %v2745_v49 = vadd.s32 127, %v2744_v43  ;;  %v2882_v51 = vshll.u32 %v6953_v38, 16  ;;  %v2865_v44 = vsel %vm2864_vm6, 1, %v4950_v56 }
 0x302   : >> { %v2881_v8 = vmul.u32 %v2877_v12, %v2853_v26  ;;  %v2861_v58 = vshrl.u32 %v2857_v47, 16  ;;  %v2867_v60 = vadd.s32 %v2865_v44, %v2859_v10  ;;  %vm2868_vm7 = vc.u32 %v2866_v61, %v2862_v3  ;;  %v2793_v61 = vld [vmem:[%s2792_s9] sm:$0x1]  ;;  %s7128_s9 = sld [smem:[%s5338_s18 + %s6656_s8]] }
 0x303   : >> { %v2743_v30 = vor.u32 %v2742_v45, %v2741_v22  ;;  %v2746_v31 = vshll.u32 %v2745_v49, 23  ;;  %v2884_v39 = vshll.u32 %v2880_v57, 16  ;;  %v2839_v14 = vsel %vm2835_vm15, %v2819_v20, %v6898_v17 }
 0x304   : >> { %v2869_v32 = vsel %vm2868_vm7, 1, %v4950_v56  ;;  %v2841_v11 = vsel %vm2837_vm1, %v6900_v34, %v2840_v37  ;;  %vm2886_vm8 = vc.u32 %v2878_v53, %v2882_v51  ;;  %v2888_v41 = vadd.s32 %v2882_v51, %v2878_v53 }
 0x305   : >> { %v2747_v18 = vor.u32 4788187, %v2746_v31  ;;  %v2750_v55 = vcvt.s32.f32 %v2743_v30  ;;  %v2871_v63 = vadd.s32 %v2869_v32, %v2867_v60  ;;  %v2863_v26 = vshrl.u32 %v2858_v21, 16 }
 0x306   : >> { %v2887_v12 = vsel %vm2886_vm8, 1, %v4950_v56  ;;  %v2978_v25 = vand.u32 2139095040, %v6965_v7  ;;  %v2883_v6 = vshrl.u32 %v6953_v38, 16  ;;  %vm2890_vm9 = vc.u32 %v2888_v41, %v2884_v39 }
 0x307   : >> { %v2748_v35 = vand.u32 2147483647, %v2747_v18  ;;  %v2872_v23 = vadd.s32 %v2871_v63, %v2861_v58  ;;  %v2889_v59 = vadd.s32 %v2887_v12, %v2881_v8  ;;  %v2755_v34 = vsel %vm2632_vm5, %v2754_v15, %v6895_v27  ;;  %v2789_v15 = vld [vmem:[%s2788_s14] sm:$0x1]  ;;  %s3316_s14 = ssub.f32 %s5471_s15, %s7159_s5 }
 0x308   : >> { %v2891_v9 = vsel %vm2890_vm9, 1, %v4950_v56  ;;  %v2979_v19 = vshrl.u32 %v2978_v25, 23  ;;  %vm7000_vm10 = vcmp.le.f32.partialorder %v2630_v28, 0.7853982  ;;  %v2842_v20 = vsel %vm2836_vm2, %v2839_v14, %v2841_v11  ;;  %s2958_s6 = scalar_lea.vmem [#allocation23], %s7128_s9  ;;  %s7254_s9 = sadd.s32 7, %s5460_s26 }
 0x309   : >> { %v2751_v17 = vmul.f32 %v2750_v55, %v2748_v35  ;;  %v2885_v38 = vshrl.u32 %v2880_v57, 16  ;;  %v2893_v4 = vadd.s32 %v2891_v9, %v2889_v59  ;;  %v2873_v47 = vadd.s32 %v2872_v23, %v2863_v26  ;;  %s7269_s26 = sld [smem:[%s5355_s7 + %s7254_s9]] }
 0x30a   : >> { %v2892_v27 = vadd.s32 %v2888_v41, %v2884_v39  ;;  %v4474_v21 = vadd.s32 4294967169, %v2979_v19  ;;  %v2757_v36 = vsel %vm7000_vm10, 0, %v2755_v34  ;;  %v2975_v28 = vand.u32 2147483647, %v6965_v7  ;;  %s7298_s5 = sld [smem:[%s5365_s3 + %s6656_s8]] }
 0x30b   : >> { %v2752_v42 = vxor.u32 2147483648, %v2751_v17  ;;  %v2894_v22 = vadd.s32 %v2893_v4, %v2883_v6  ;;  %v2896_v57 = vmul.u32 %v6919_v24, %v2842_v20  ;;  %v7019_v49 = vand.u32 3, %v2757_v36 }
 0x30c   : >> { %v2985_v37 = vadd.s32 1, %v4474_v21  ;;  %vm2898_vm11 = vc.u32 %v2873_v47, %v2892_v27  ;;  %v2790_v3 = vadd.f32 %v2789_v15, %v2786_v33  ;;  %v2982_v51 = vand.u32 8388607, %v2975_v28 }
 0x30d   : >> { %v2753_v43 = vsel %vm2632_vm5, %v2752_v42, %v2751_v17  ;;  %v2895_v40 = vadd.s32 %v2894_v22, %v2885_v38  ;;  %v3145_v58 = vstv %s3144_s16  ;;  %vm2779_vm13 = vcmp.eq.s32.totalorder %v7019_v49, 2  ;;  %s2965_s16 = scalar_lea.vmem [#allocation24], %s7163_s2 }
 0x30e   : >> { %v2756_v10 = vsel %vm7000_vm10, %v6676_v5, %v2753_v43  ;;  %vm2986_vm12 = vcmp.gt.s32.totalorder %v2985_v37, 0  ;;  %v7027_v14 = vadd.f32 %v2793_v61, %v2790_v3  ;;  %v7029_v32 = vadd.s32 %v2892_v27, %v2873_v47 }
 0x30f   : >> { %v2758_v45 = vmul.f32 %v2756_v10, %v2756_v10  ;;  %v2899_v53 = vadd.s32 1, %v2895_v40  ;;  %v2987_v30 = vsel %vm2986_vm12, %v2985_v37, 0  ;;  %v2983_v11 = vor.u32 8388608, %v2982_v51  ;;  %s3489_s2 = ssub.f32 %s5471_s15, %s7269_s26 }
 0x310   : >> { %v2989_v8 = vand.u32 31, %v2987_v30  ;;  %v3146_v63 = vmul.f32 %v3145_v58, %v5389_v0  ;;  %vm2776_vm14 = vcmp.eq.s32.totalorder %v7019_v49, 0  ;;  %vm2775_vm15 = vcmp.lt.s32.totalorder %v7019_v49, 2  ;;  %s7407_s26 = sld [smem:[%s5345_s28 + %s6968_s22]] }
 0x311   : >> { %v2759_v31 = vmul.f32 -0.001358992, %v2758_v45  ;;  %v2766_v44 = vmul.f32 -0.00019511016, %v2758_v45  ;;  %v2900_v60 = vsel %vm2898_vm11, %v2899_v53, %v2895_v40  ;;  %vm2773_vm0 = vweird.f32 %v6676_v5 }
 0x312   : >> { %v2901_v18 = vadd.s32 %v2900_v60, %v2896_v57  ;;  %v7024_v55 = vsub.s32 32, %v2989_v8  ;;  %v2995_v12 = vshll.u32 %v4945_v48, %v2989_v8  ;;  %v2998_v23 = vshll.u32 %v4946_v50, %v2989_v8 }
 0x313   : >> { %v2760_v39 = vadd.f32 0.041655596, %v2759_v31  ;;  %v2767_v24 = vadd.f32 0.008332121, %v2766_v44  ;;  %v3001_v6 = vshll.u32 %v4947_v52, %v2989_v8  ;;  %v7046_v29 = vshrl.u32 %v2987_v30, 5 }
 0x314   : >> { %v2902_v26 = vadd.s32 536870912, %v2901_v18  ;;  %v2996_v25 = vshrl.u32 %v4946_v50, %v7024_v55  ;;  %v3002_v59 = vshrl.u32 %v4948_v54, %v7024_v55  ;;  %v2999_v19 = vshrl.u32 %v4947_v52, %v7024_v55 }
 0x315   : >> { %v2761_v41 = vmul.f32 %v2760_v39, %v2758_v45  ;;  %v2768_v35 = vmul.f32 %v2767_v24, %v2758_v45  ;;  %v2992_v20 = vshll.u32 %v4944_v46, %v2989_v8  ;;  %v2993_v38 = vshrl.u32 %v4945_v48, %v7024_v55 }
 0x316   : >> { %v7041_v9 = vshrl.u32 %v2902_v26, 30  ;;  %v3004_v4 = vshll.u32 %v4948_v54, %v2989_v8  ;;  %v7054_v21 = vadd.f32 %v3146_v63, %v5394_v1  ;;  %v2997_v36 = vor.u32 %v2996_v25, %v2995_v12 }
 0x317   : >> { %v2762_v17 = vadd.f32 -0.4999988, %v2761_v41  ;;  %v2769_v34 = vadd.f32 -0.16666654, %v2768_v35  ;;  %v3003_v22 = vor.u32 %v3002_v59, %v3001_v6  ;;  %v3005_v43 = vshrl.u32 %v4949_v62, %v7024_v55 }
 0x318   : >> { %v2904_v27 = vshll.u32 %v7041_v9, 30  ;;  %v7058_v33 = vshll.u32 %v2983_v11, 8  ;;  %v3000_v57 = vor.u32 %v2999_v19, %v2998_v23  ;;  %v2994_v3 = vor.u32 %v2993_v38, %v2992_v20 }
 0x319   : >> { %v2763_v42 = vmul.f32 %v2762_v17, %v2758_v45  ;;  %v2770_v47 = vmul.f32 %v2769_v34, %v2758_v45  ;;  %v3006_v61 = vor.u32 %v3005_v43, %v3004_v4  ;;  %vm3007_vm1 = vcmp.lt.s32.totalorder %v7046_v29, 1 }
 0x31a   : >> { %v2905_v40 = vsub.s32 %v2901_v18, %v2904_v27  ;;  %vm3010_vm2 = vcmp.lt.s32.totalorder %v7046_v29, 4  ;;  %vm3008_vm4 = vcmp.lt.s32.totalorder %v7046_v29, 2  ;;  %vm3009_vm5 = vcmp.lt.s32.totalorder %v7046_v29, 3 }
 0x31b   : >> { %v2764_v15 = vadd.f32 1.0, %v2763_v42  ;;  %v2771_v37 = vadd.f32 1.0, %v2770_v47  ;;  %v3016_v30 = vsel %vm3010_vm2, %v3003_v22, 920167782  ;;  %v3151_v31 = vand.u32 2139095040, %v7054_v21 }
 0x31c   : >> { %vm2906_vm3 = vcmp.lt.s32.totalorder %v2905_v40, 0  ;;  %v2907_v51 = vsub.s32 0, %v2905_v40  ;;  %v3020_v39 = vsel %vm3010_vm2, %v3006_v61, 1326507024  ;;  %v3024_v24 = vand.u32 65535, %v7058_v33 }
 0x31d   : >> { %v2772_v45 = vmul.f32 %v2771_v37, %v2756_v10  ;;  %v2780_v53 = vxor.u32 2147483648, %v2764_v15  ;;  %v3019_v10 = vsel %vm3007_vm1, %v2997_v36, %v3000_v57  ;;  %v3025_v18 = vshrl.u32 %v7058_v33, 16 }
 0x31e   : >> { %v2908_v58 = vsel %vm2906_vm3, %v2907_v51, %v2905_v40  ;;  %v3015_v63 = vsel %vm3007_vm1, %v2994_v3, %v2997_v36  ;;  %v3017_v41 = vsel %vm3009_vm5, %v3000_v57, %v3016_v30  ;;  %v3021_v35 = vsel %vm3009_vm5, %v3003_v22, %v3020_v39 }
 0x31f   : >> { %v2777_v44 = vxor.u32 2147483648, %v2772_v45  ;;  %v2781_v8 = vsel %vm2779_vm13, %v2780_v53, %v2772_v45  ;;  %v2909_v60 = vclz %v2908_v58  ;;  %v3022_v25 = vsel %vm3008_vm4, %v3019_v10, %v3021_v35 }
 0x320   : >> { %v3152_v23 = vshrl.u32 %v3151_v31, 23  ;;  %v2991_v59 = vshrl.u32 %v4944_v46, %v7024_v55  ;;  %v3026_v17 = vand.u32 65535, %v3022_v25  ;;  %v3027_v34 = vshrl.u32 %v3022_v25, 16 }
 0x321   : >> { %v2778_v11 = vsel %vm2776_vm14, %v2764_v15, %v2777_v44  ;;  %v4472_v12 = vadd.s32 4294967294, %v2909_v60  ;;  %v3012_v49 = vsel %vm3010_vm2, %v3000_v57, 2102212464  ;;  %v3018_v20 = vsel %vm3008_vm4, %v3015_v63, %v3017_v41 }
 0x322   : >> { %v2782_v26 = vsel %vm2775_vm15, %v2778_v11, %v2781_v8  ;;  %v3029_v4 = vmul.u32 %v3027_v34, %v3024_v24  ;;  %v3030_v42 = vmul.u32 %v3026_v17, %v3025_v18  ;;  %v3048_v47 = vand.u32 65535, %v3018_v20 }
 0x323   : >> { %v2783_v6 = vsel %vm2773_vm0, nan, %v2782_v26  ;;  %vm4473_vm6 = vcmp.lt.s32.totalorder %v4472_v12, 0  ;;  %v3028_v55 = vmul.u32 %v3026_v17, %v3024_v24  ;;  %vm2805_vm7 = vcmp.lt.s32.totalorder %v6750_v2, 0 }
 0x324   : >> { %v2795_v19 = vadd.f32 %v7027_v14, %v2783_v6  ;;  %v2912_v38 = vsel %vm4473_vm6, 0, %v4472_v12  ;;  %v2927_v14 = vsub.s32 4, %v7041_v9  ;;  %v4477_v43 = vadd.s32 4294967169, %v3152_v23 }
 0x325   : >> { %v2913_v5 = vsub.s32 32, %v2912_v38  ;;  %v2914_v27 = vshll.u32 %v2905_v40, %v2912_v38  ;;  %v2917_v22 = vsub.s32 4294967266, %v2912_v38  ;;  %v3031_v57 = vmul.u32 %v3027_v34, %v3025_v18 }
 0x326   : >> { %2796 = vst [vmem:[%s5895_s1 + $0x4] sm:$0x1] %v2795_v19  ;;  %v3032_v61 = vshll.u32 %v3029_v4, 16  ;;  %v3011_v45 = vsel %vm3007_vm1, %v2991_v59, %v2994_v3  ;;  %v3013_v53 = vsel %vm3009_vm5, %v2997_v36, %v3012_v49  ;;  %v3034_v51 = vshll.u32 %v3030_v42, 16 }
 0x327   : >> { %v2915_v15 = vshrl.u32 %v7029_v32, %v2913_v5  ;;  %v2918_v37 = vadd.s32 127, %v2917_v22  ;;  %v3049_v40 = vshrl.u32 %v3018_v20, 16  ;;  %vm7106_vm8 = vcmp.le.f32.partialorder %v2803_v13, 0.7853982 }
 0x328   : >> { %vm3036_vm9 = vc.u32 %v3028_v55, %v3032_v61  ;;  %v3050_v32 = vmul.u32 %v3048_v47, %v3024_v24  ;;  %v3038_v58 = vadd.s32 %v3032_v61, %v3028_v55  ;;  %v3052_v3 = vmul.u32 %v3048_v47, %v3025_v18 }
 0x329   : >> { %v2916_v31 = vor.u32 %v2915_v15, %v2914_v27  ;;  %v2919_v44 = vshll.u32 %v2918_v37, 23  ;;  %v3037_v8 = vsel %vm3036_vm9, 1, %v4950_v56  ;;  %v3051_v10 = vmul.u32 %v3049_v40, %v3024_v24 }
 0x32a   : >> { %v3033_v36 = vshrl.u32 %v3029_v4, 16  ;;  %v3039_v11 = vadd.s32 %v3037_v8, %v3031_v57  ;;  %vm3040_vm10 = vc.u32 %v3038_v58, %v3034_v51  ;;  %v3053_v63 = vmul.u32 %v3049_v40, %v3025_v18 }
 0x32b   : >> { %v2920_v60 = vor.u32 4788187, %v2919_v44  ;;  %v2923_v39 = vcvt.s32.f32 %v2916_v31  ;;  %v3054_v41 = vshll.u32 %v3051_v10, 16  ;;  %v3056_v13 = vshll.u32 %v3052_v3, 16 }
 0x32c   : >> { %v3035_v26 = vshrl.u32 %v3030_v42, 16  ;;  %v3041_v12 = vsel %vm3040_vm10, 1, %v4950_v56  ;;  %v3148_v25 = vand.u32 2147483647, %v7054_v21  ;;  %v3158_v59 = vadd.s32 1, %v4477_v43 }
 0x32d   : >> { %v2921_v35 = vand.u32 2147483647, %v2920_v60  ;;  %v3043_v23 = vadd.s32 %v3041_v12, %v3039_v11  ;;  %vm3058_vm11 = vc.u32 %v3050_v32, %v3054_v41  ;;  %v3060_v6 = vadd.s32 %v3054_v41, %v3050_v32 }
 0x32e   : >> { %v2928_v17 = vsel %vm2805_vm7, %v2927_v14, %v7041_v9  ;;  %v3014_v18 = vsel %vm3008_vm4, %v3011_v45, %v3013_v53  ;;  %v3059_v34 = vsel %vm3058_vm11, 1, %v4950_v56  ;;  %v3055_v49 = vshrl.u32 %v3051_v10, 16 }
 0x32f   : >> { %v2924_v24 = vmul.f32 %v2923_v39, %v2921_v35  ;;  %v3044_v19 = vadd.s32 %v3043_v23, %v3033_v36  ;;  %v3061_v20 = vadd.s32 %v3059_v34, %v3053_v63  ;;  %vm3062_vm12 = vc.u32 %v3060_v6, %v3056_v13 }
 0x330   : >> { %v3063_v4 = vsel %vm3062_vm12, 1, %v4950_v56  ;;  %v7120_v42 = vadd.s32 %v3060_v6, %v3056_v13  ;;  %vm3159_vm13 = vcmp.gt.s32.totalorder %v3158_v59, 0  ;;  %v3057_v29 = vshrl.u32 %v3052_v3, 16 }
 0x331   : >> { %v2925_v38 = vxor.u32 2147483648, %v2924_v24  ;;  %v7122_v9 = vadd.s32 %v3044_v19, %v3035_v26  ;;  %v3065_v47 = vadd.s32 %v3063_v4, %v3061_v20  ;;  %v3160_v5 = vsel %vm3159_vm13, %v3158_v59, 0  ;;  %v2959_v4 = vld [vmem:[%s2958_s6] sm:$0x1]  ;;  %s7318_s6 = sld [smem:[%s5368_s12 + %s6656_s8]]  ;;  %s3130_s8 = scalar_lea.vmem [#allocation23], %s7286_s27 }
 0x332   : >> { %v3155_v22 = vand.u32 8388607, %v3148_v25  ;;  %v3162_v55 = vand.u32 31, %v3160_v5  ;;  %v2930_v43 = vsel %vm7106_vm8, 0, %v2928_v17  ;;  %v3068_v37 = vmul.u32 %v7058_v33, %v3014_v18  ;;  %s7426_s27 = sld [smem:[%s5348_s21 + %s6968_s22]] }
 0x333   : >> { %v2926_v27 = vsel %vm2805_vm7, %v2925_v38, %v2924_v24  ;;  %v3066_v15 = vadd.s32 %v3065_v47, %v3055_v49  ;;  %vm3070_vm14 = vc.u32 %v7122_v9, %v7120_v42  ;;  %v7171_v36 = vshrl.u32 %v3160_v5, 5 }
 0x334   : >> { %v7135_v14 = vsel %vm7106_vm8, %v6750_v2, %v2926_v27  ;;  %v7148_v61 = vsub.s32 32, %v3162_v55  ;;  %v3165_v45 = vshll.u32 %v4944_v46, %v3162_v55  ;;  %v3168_v51 = vshll.u32 %v4945_v48, %v3162_v55 }
 0x335   : >> { %v2931_v57 = vmul.f32 %v7135_v14, %v7135_v14  ;;  %v3067_v53 = vadd.s32 %v3066_v15, %v3057_v29  ;;  %v3171_v40 = vshll.u32 %v4946_v50, %v3162_v55  ;;  %v3174_v30 = vshll.u32 %v4947_v52, %v3162_v55  ;;  %v2962_v29 = vld [vmem:[%s2961_s30] sm:$0x1]  ;;  %s3133_s30 = scalar_lea.vmem [#allocation23], %s7298_s5  ;;  %s7433_s5 = sld [smem:[%s5375_s13 + %s7254_s9]] }
 0x336   : >> { %v3166_v33 = vshrl.u32 %v4945_v48, %v7148_v61  ;;  %v3177_v32 = vshll.u32 %v4948_v54, %v3162_v55  ;;  %v3169_v58 = vshrl.u32 %v4946_v50, %v7148_v61  ;;  %v3172_v10 = vshrl.u32 %v4947_v52, %v7148_v61 }
 0x337   : >> { %v2932_v31 = vmul.f32 -0.001358992, %v2931_v57  ;;  %v2939_v44 = vmul.f32 -0.00019511016, %v2931_v57  ;;  %v3071_v8 = vadd.s32 1, %v3067_v53  ;;  %v3175_v3 = vshrl.u32 %v4948_v54, %v7148_v61 }
 0x338   : >> { %v3178_v11 = vshrl.u32 %v4949_v62, %v7148_v61  ;;  %v7175_v63 = vand.u32 3, %v2930_v43  ;;  %v3156_v13 = vor.u32 8388608, %v3155_v22  ;;  %v7180_v23 = vor.u32 %v3166_v33, %v3165_v45 }
 0x339   : >> { %v2933_v60 = vadd.f32 0.041655596, %v2932_v31  ;;  %v2940_v39 = vadd.f32 0.008332121, %v2939_v44  ;;  %v3072_v41 = vsel %vm3070_vm14, %v3071_v8, %v3067_v53  ;;  %v7182_v6 = vor.u32 %v3169_v58, %v3168_v51 }
 0x33a   : >> { %v3073_v12 = vadd.s32 %v3072_v41, %v3068_v37  ;;  %v7184_v59 = vor.u32 %v3172_v10, %v3171_v40  ;;  %v3176_v24 = vor.u32 %v3175_v3, %v3174_v30  ;;  %v3179_v17 = vor.u32 %v3178_v11, %v3177_v32  ;;  %v2966_v30 = vld [vmem:[%s2965_s16] sm:$0x1]  ;;  %s7402_s16 = sld [smem:[%s5338_s18 + %s6968_s22]] }
 0x33b   : >> { %v2934_v35 = vmul.f32 %v2933_v60, %v2931_v57  ;;  %v2941_v26 = vmul.f32 %v2940_v39, %v2931_v57  ;;  %vm3180_vm15 = vcmp.lt.s32.totalorder %v7171_v36, 1  ;;  %vm2948_vm0 = vcmp.lt.s32.totalorder %v7175_v63, 2 }
 0x33c   : >> { %v3074_v19 = vadd.s32 536870912, %v3073_v12  ;;  %vm2949_vm1 = vcmp.eq.s32.totalorder %v7175_v63, 0  ;;  %vm3183_vm2 = vcmp.lt.s32.totalorder %v7171_v36, 4  ;;  %v7190_v49 = vshll.u32 %v3156_v13, 8 }
 0x33d   : >> { %v2935_v18 = vadd.f32 -0.4999988, %v2934_v35  ;;  %v2942_v34 = vadd.f32 -0.16666654, %v2941_v26  ;;  %vm3182_vm3 = vcmp.lt.s32.totalorder %v7171_v36, 3  ;;  %vm3181_vm4 = vcmp.lt.s32.totalorder %v7171_v36, 2 }
 0x33e   : >> { %v7194_v47 = vshrl.u32 %v3074_v19, 30  ;;  %v3188_v5 = vsel %vm3180_vm15, %v7180_v23, %v7182_v6  ;;  %v3189_v27 = vsel %vm3183_vm2, %v3176_v24, 920167782  ;;  %v3193_v22 = vsel %vm3183_vm2, %v3179_v17, 1326507024 }
 0x33f   : >> { %v2936_v20 = vmul.f32 %v2935_v18, %v2931_v57  ;;  %v2943_v38 = vmul.f32 %v2942_v34, %v2931_v57  ;;  %v3192_v37 = vsel %vm3180_vm15, %v7182_v6, %v7184_v59  ;;  %vm2952_vm5 = vcmp.eq.s32.totalorder %v7175_v63, 2 }
 0x340   : >> { %v3076_v15 = vshll.u32 %v7194_v47, 30  ;;  %v2963_v57 = vadd.f32 %v2962_v29, %v2959_v4  ;;  %v3190_v45 = vsel %vm3182_vm3, %v7184_v59, %v3189_v27  ;;  %v3194_v53 = vsel %vm3182_vm3, %v3176_v24, %v3193_v22 }
 0x341   : >> { %v2937_v55 = vadd.f32 1.0, %v2936_v20  ;;  %v2944_v43 = vadd.f32 1.0, %v2943_v38  ;;  %v3317_v44 = vstv %s3316_s14  ;;  %v3191_v33 = vsel %vm3181_vm4, %v3188_v5, %v3190_v45  ;;  %s3137_s14 = scalar_lea.vmem [#allocation24], %s7318_s6  ;;  %s3306_s6 = scalar_lea.vmem [#allocation23], %s7407_s26 }
 0x342   : >> { %v3077_v31 = vsub.s32 %v3073_v12, %v3076_v15  ;;  %v3195_v32 = vsel %vm3181_vm4, %v3192_v37, %v3194_v53  ;;  %v3197_v8 = vand.u32 65535, %v7190_v49  ;;  %v3198_v58 = vshrl.u32 %v7190_v49, 16 }
 0x343   : >> { %v2945_v51 = vmul.f32 %v2944_v43, %v7135_v14  ;;  %v2953_v40 = vxor.u32 2147483648, %v2937_v55  ;;  %vm2946_vm7 = vweird.f32 %v6750_v2  ;;  %v2967_v14 = vadd.f32 %v2966_v30, %v2963_v57 }
 0x344   : >> { %vm3078_vm6 = vcmp.lt.s32.totalorder %v3077_v31, 0  ;;  %v3079_v60 = vsub.s32 0, %v3077_v31  ;;  %v3199_v39 = vand.u32 65535, %v3195_v32  ;;  %v3200_v11 = vshrl.u32 %v3195_v32, 16 }
 0x345   : >> { %v2950_v10 = vxor.u32 2147483648, %v2945_v51  ;;  %v2954_v3 = vsel %vm2952_vm5, %v2953_v40, %v2945_v51  ;;  %v3222_v35 = vshrl.u32 %v3191_v33, 16  ;;  %v3318_v26 = vmul.f32 %v3317_v44, %v5389_v0 }
 0x346   : >> { %v3080_v13 = vsel %vm3078_vm6, %v3079_v60, %v3077_v31  ;;  %v3201_v17 = vmul.u32 %v3199_v39, %v3197_v8  ;;  %v3202_v18 = vmul.u32 %v3200_v11, %v3197_v8  ;;  %v3203_v19 = vmul.u32 %v3199_v39, %v3198_v58 }
 0x347   : >> { %v2951_v41 = vsel %vm2949_vm1, %v2937_v55, %v2950_v10  ;;  %v3081_v24 = vclz %v3080_v13  ;;  %v3221_v2 = vand.u32 65535, %v3191_v33  ;;  %v3204_v29 = vmul.u32 %v3200_v11, %v3198_v58 }
 0x348   : >> { %v2955_v12 = vsel %vm2948_vm0, %v2951_v41, %v2954_v3  ;;  %v3205_v4 = vshll.u32 %v3202_v18, 16  ;;  %v3207_v5 = vshll.u32 %v3203_v19, 16  ;;  %v7234_v27 = vadd.f32 %v3318_v26, %v5394_v1 }
 0x349   : >> { %v2956_v34 = vsel %vm2946_vm7, nan, %v2955_v12  ;;  %v4475_v38 = vadd.s32 4294967294, %v3081_v24  ;;  %v3069_v22 = vadd.s32 %v7120_v42, %v7122_v9  ;;  %v3224_v63 = vmul.u32 %v3222_v35, %v3197_v8 }
 0x34a   : >> { %v2968_v20 = vadd.f32 %v2967_v14, %v2956_v34  ;;  %vm3209_vm9 = vc.u32 %v3201_v17, %v3205_v4  ;;  %v3211_v15 = vadd.s32 %v3205_v4, %v3201_v17  ;;  %v3225_v37 = vmul.u32 %v3221_v2, %v3198_v58 }
 0x34b   : >> { %vm4476_vm8 = vcmp.lt.s32.totalorder %v4475_v38, 0  ;;  %v3210_v43 = vsel %vm3209_vm9, 1, %v4950_v56  ;;  %vm2977_vm10 = vcmp.lt.s32.totalorder %v6965_v7, 0  ;;  %v3164_v51 = vshrl.u32 %v4944_v46, %v7148_v61 }
 0x34c   : >> { %2969 = vst [vmem:[%s5814_s29 + $0x5] sm:$0x1] %v2968_v20  ;;  %v3084_v55 = vsel %vm4476_vm8, 0, %v4475_v38  ;;  %v3212_v40 = vadd.s32 %v3210_v43, %v3204_v29  ;;  %vm3213_vm11 = vc.u32 %v3211_v15, %v3207_v5  ;;  %v3223_v30 = vmul.u32 %v3221_v2, %v3197_v8 }
 0x34d   : >> { %v3085_v57 = vsub.s32 32, %v3084_v55  ;;  %v3086_v45 = vshll.u32 %v3077_v31, %v3084_v55  ;;  %v3089_v53 = vsub.s32 4294967266, %v3084_v55  ;;  %v3323_v42 = vand.u32 2139095040, %v7234_v27 }
 0x34e   : >> { %v3206_v33 = vshrl.u32 %v3202_v18, 16  ;;  %v3214_v32 = vsel %vm3213_vm11, 1, %v4950_v56  ;;  %v3226_v3 = vmul.u32 %v3222_v35, %v3198_v58  ;;  %v3227_v60 = vshll.u32 %v3224_v63, 16 }
 0x34f   : >> { %v3087_v9 = vshrl.u32 %v3069_v22, %v3085_v57  ;;  %v3090_v44 = vadd.s32 127, %v3089_v53  ;;  %v3216_v10 = vadd.s32 %v3214_v32, %v3212_v40  ;;  %v3229_v14 = vshll.u32 %v3225_v37, 16 }
 0x350   : >> { %v3099_v11 = vsub.s32 4, %v7194_v47  ;;  %v3185_v61 = vsel %vm3183_vm2, %v7184_v59, 2102212464  ;;  %v3208_v8 = vshrl.u32 %v3203_v19, 16  ;;  %vm3231_vm12 = vc.u32 %v3223_v30, %v3227_v60 }
 0x351   : >> { %v3088_v39 = vor.u32 %v3087_v9, %v3086_v45  ;;  %v3091_v31 = vshll.u32 %v3090_v44, 23  ;;  %v3233_v41 = vadd.s32 %v3227_v60, %v3223_v30  ;;  %v3324_v13 = vshrl.u32 %v3323_v42, 23 }
 0x352   : >> { %v3217_v24 = vadd.s32 %v3216_v10, %v3206_v33  ;;  %v3232_v58 = vsel %vm3231_vm12, 1, %v4950_v56  ;;  %v3184_v35 = vsel %vm3180_vm15, %v3164_v51, %v7180_v23  ;;  %v3228_v17 = vshrl.u32 %v3224_v63, 16 }
 0x353   : >> { %v3092_v26 = vor.u32 4788187, %v3091_v31  ;;  %v3095_v12 = vcvt.s32.f32 %v3088_v39  ;;  %v3234_v18 = vadd.s32 %v3232_v58, %v3226_v3  ;;  %vm3235_vm13 = vc.u32 %v3233_v41, %v3229_v14 }
 0x354   : >> { %v3186_v34 = vsel %vm3182_vm3, %v7182_v6, %v3185_v61  ;;  %v3236_v19 = vsel %vm3235_vm13, 1, %v4950_v56  ;;  %v4480_v2 = vadd.s32 4294967169, %v3324_v13  ;;  %v3100_v20 = vsel %vm2977_vm10, %v3099_v11, %v7194_v47 }
 0x355   : >> { %v3093_v59 = vand.u32 2147483647, %v3092_v26  ;;  %v3230_v23 = vshrl.u32 %v3225_v37, 16  ;;  %v3238_v38 = vadd.s32 %v3236_v19, %v3234_v18  ;;  %v7263_v29 = vadd.s32 %v3217_v24, %v3208_v8 }
 0x356   : >> { %v7265_v5 = vadd.s32 %v3233_v41, %v3229_v14  ;;  %v3330_v22 = vadd.s32 1, %v4480_v2  ;;  %v3187_v6 = vsel %vm3181_vm4, %v3184_v35, %v3186_v34  ;;  %v3320_v47 = vand.u32 2147483647, %v7234_v27 }
 0x357   : >> { %v3096_v4 = vmul.f32 %v3095_v12, %v3093_v59  ;;  %v3239_v63 = vadd.s32 %v3238_v38, %v3228_v17  ;;  %vm7276_vm14 = vcmp.le.f32.partialorder %v2975_v28, 0.7853982  ;;  %v3241_v45 = vmul.u32 %v7190_v49, %v3187_v6 }
 0x358   : >> { %vm3331_vm15 = vcmp.gt.s32.totalorder %v3330_v22, 0  ;;  %v3102_v15 = vsel %vm7276_vm14, 0, %v3100_v20  ;;  %vm3243_vm0 = vc.u32 %v7263_v29, %v7265_v5  ;;  %v3327_v40 = vand.u32 8388607, %v3320_v47 }
 0x359   : >> { %v3097_v43 = vxor.u32 2147483648, %v3096_v4  ;;  %v3240_v37 = vadd.s32 %v3239_v63, %v3230_v23  ;;  %v3332_v57 = vsel %vm3331_vm15, %v3330_v22, 0  ;;  %v7304_v30 = vand.u32 3, %v3102_v15  ;;  %v3134_v15 = vld [vmem:[%s3133_s30] sm:$0x1]  ;;  %s3661_s30 = ssub.f32 %s5471_s15, %s7433_s5 }
 0x35a   : >> { %v3334_v28 = vand.u32 31, %v3332_v57  ;;  %v7306_v42 = vshrl.u32 %v3332_v57, 5  ;;  %v3328_v12 = vor.u32 8388608, %v3327_v40  ;;  %v3490_v20 = vstv %s3489_s2  ;;  %s3303_s2 = scalar_lea.vmem [#allocation23], %s7402_s16  ;;  %s7579_s15 = sld [smem:[%s5358_s0 + %s6968_s22]] }
 0x35b   : >> { %v3098_v36 = vsel %vm2977_vm10, %v3097_v43, %v3096_v4  ;;  %v3244_v51 = vadd.s32 1, %v3240_v37  ;;  %vm3118_vm4 = vweird.f32 %v6965_v7  ;;  %vm3120_vm5 = vcmp.lt.s32.totalorder %v7304_v30, 2  ;;  %v3131_v43 = vld [vmem:[%s3130_s8] sm:$0x1]  ;;  %s3310_s8 = scalar_lea.vmem [#allocation24], %s7426_s27  ;;  %s7613_s16 = sld [smem:[%s5368_s12 + %s6968_s22]] }
 0x35c   : >> { %v7294_v53 = vsel %vm7276_vm14, %v6965_v7, %v3098_v36  ;;  %v7308_v9 = vsub.s32 32, %v3334_v28  ;;  %v3337_v33 = vshll.u32 %v4944_v46, %v3334_v28  ;;  %v3340_v32 = vshll.u32 %v4945_v48, %v3334_v28  ;;  %s7717_s5 = sld [smem:[%s5338_s18 + %s7254_s9]] }
 0x35d   : >> { %v3103_v49 = vmul.f32 %v7294_v53, %v7294_v53  ;;  %v3245_v44 = vsel %vm3243_vm0, %v3244_v51, %v3240_v37  ;;  %v3346_v10 = vshll.u32 %v4947_v52, %v3334_v28  ;;  %v3343_v39 = vshll.u32 %v4946_v50, %v3334_v28 }
 0x35e   : >> { %v3246_v14 = vadd.s32 %v3245_v44, %v3241_v45  ;;  %v3338_v31 = vshrl.u32 %v4945_v48, %v7308_v9  ;;  %v3341_v11 = vshrl.u32 %v4946_v50, %v7308_v9  ;;  %v3344_v61 = vshrl.u32 %v4947_v52, %v7308_v9 }
 0x35f   : >> { %v3104_v3 = vmul.f32 -0.001358992, %v3103_v49  ;;  %v3111_v60 = vmul.f32 -0.00019511016, %v3103_v49  ;;  %v3347_v8 = vshrl.u32 %v4948_v54, %v7308_v9  ;;  %v3349_v35 = vshll.u32 %v4948_v54, %v3334_v28 }
 0x360   : >> { %v3247_v26 = vadd.s32 536870912, %v3246_v14  ;;  %v7328_v24 = vor.u32 %v3338_v31, %v3337_v33  ;;  %v3350_v17 = vshrl.u32 %v4949_v62, %v7308_v9  ;;  %v7335_v19 = vor.u32 %v3341_v11, %v3340_v32 }
 0x361   : >> { %v3105_v41 = vadd.f32 0.041655596, %v3104_v3  ;;  %v3112_v13 = vadd.f32 0.008332121, %v3111_v60  ;;  %v3348_v58 = vor.u32 %v3347_v8, %v3346_v10  ;;  %v7337_v2 = vor.u32 %v3344_v61, %v3343_v39  ;;  %v3138_v60 = vld [vmem:[%s3137_s14] sm:$0x1]  ;;  %s7589_s14 = sld [smem:[%s5365_s3 + %s6968_s22]] }
 0x362   : >> { %v7333_v34 = vshrl.u32 %v3247_v26, 30  ;;  %vm3352_vm1 = vcmp.lt.s32.totalorder %v7306_v42, 1  ;;  %vm3355_vm2 = vcmp.lt.s32.totalorder %v7306_v42, 4  ;;  %vm3354_vm3 = vcmp.lt.s32.totalorder %v7306_v42, 3  ;;  %s3475_s22 = scalar_lea.vmem [#allocation23], %s7579_s15  ;;  %s3482_s27 = scalar_lea.vmem [#allocation24], %s7613_s16 }
 0x363   : >> { %v3106_v18 = vmul.f32 %v3105_v41, %v3103_v49  ;;  %v3113_v59 = vmul.f32 %v3112_v13, %v3103_v49  ;;  %v3351_v22 = vor.u32 %v3350_v17, %v3349_v35  ;;  %vm3353_vm6 = vcmp.lt.s32.totalorder %v7306_v42, 2  ;;  %s3826_s16 = sld [smem:[%s5368_s12 + %s7254_s9]] }
 0x364   : >> { %v3249_v4 = vshll.u32 %v7333_v34, 30  ;;  %v3361_v6 = vsel %vm3355_vm2, %v3348_v58, 920167782  ;;  %v3360_v57 = vsel %vm3352_vm1, %v7328_v24, %v7335_v19  ;;  %vm3121_vm7 = vcmp.eq.s32.totalorder %v7304_v30, 0 }
 0x365   : >> { %v3107_v23 = vadd.f32 -0.4999988, %v3106_v18  ;;  %v3114_v38 = vadd.f32 -0.16666654, %v3113_v59  ;;  %v3362_v36 = vsel %vm3354_vm3, %v7337_v2, %v3361_v6  ;;  %v7360_v45 = vshll.u32 %v3328_v12, 8 }
 0x366   : >> { %v7350_v37 = vsub.s32 %v3246_v14, %v3249_v4  ;;  %v3491_v28 = vmul.f32 %v3490_v20, %v5389_v0  ;;  %vm3124_vm9 = vcmp.eq.s32.totalorder %v7304_v30, 2  ;;  %v3135_v44 = vadd.f32 %v3134_v15, %v3131_v43 }
 0x367   : >> { %v3108_v63 = vmul.f32 %v3107_v23, %v3103_v49  ;;  %v3115_v55 = vmul.f32 %v3114_v38, %v3103_v49  ;;  %v3363_v33 = vsel %vm3353_vm6, %v3360_v57, %v3362_v36  ;;  %v3364_v32 = vsel %vm3352_vm1, %v7335_v19, %v7337_v2  ;;  %s3478_s26 = scalar_lea.vmem [#allocation23], %s7589_s14  ;;  %s3822_s14 = sld [smem:[%s5365_s3 + %s7254_s9]] }
 0x368   : >> { %vm3251_vm8 = vcmp.lt.s32.totalorder %v7350_v37, 0  ;;  %v3252_v49 = vsub.s32 0, %v7350_v37  ;;  %v3365_v39 = vsel %vm3355_vm2, %v3351_v22, 1326507024  ;;  %v3369_v61 = vand.u32 65535, %v7360_v45 }
 0x369   : >> { %v3109_v51 = vadd.f32 1.0, %v3108_v63  ;;  %v3116_v40 = vadd.f32 1.0, %v3115_v55  ;;  %v3366_v11 = vsel %vm3354_vm3, %v3348_v58, %v3365_v39  ;;  %v7381_v8 = vadd.f32 %v3491_v28, %v5394_v1 }
 0x36a   : >> { %v3253_v14 = vsel %vm3251_vm8, %v3252_v49, %v7350_v37  ;;  %v3394_v26 = vshrl.u32 %v3363_v33, 16  ;;  %v3139_v12 = vadd.f32 %v3138_v60, %v3135_v44  ;;  %v3370_v17 = vshrl.u32 %v7360_v45, 16 }
 0x36b   : >> { %v3117_v10 = vmul.f32 %v3116_v40, %v7294_v53  ;;  %v3125_v3 = vxor.u32 2147483648, %v3109_v51  ;;  %v3254_v31 = vclz %v3253_v14  ;;  %v3367_v53 = vsel %vm3353_vm6, %v3364_v32, %v3366_v11 }
 0x36c   : >> { %v3372_v18 = vshrl.u32 %v3367_v53, 16  ;;  %v3336_v58 = vshrl.u32 %v4944_v46, %v7308_v9  ;;  %v3371_v20 = vand.u32 65535, %v3367_v53  ;;  %v3393_v23 = vand.u32 65535, %v3363_v33 }
 0x36d   : >> { %v3122_v41 = vxor.u32 2147483648, %v3117_v10  ;;  %v3126_v13 = vsel %vm3124_vm9, %v3125_v3, %v3117_v10  ;;  %v4478_v35 = vadd.s32 4294967294, %v3254_v31  ;;  %v3242_v4 = vadd.s32 %v7265_v5, %v7263_v29 }
 0x36e   : >> { %v3496_v22 = vand.u32 2139095040, %v7381_v8  ;;  %v3374_v55 = vmul.u32 %v3372_v18, %v3369_v61  ;;  %v7397_v9 = vmul.u32 %v3394_v26, %v3369_v61  ;;  %v3272_v29 = vsub.s32 4, %v7333_v34 }
 0x36f   : >> { %v3123_v59 = vsel %vm3121_vm7, %v3109_v51, %v3122_v41  ;;  %vm4479_vm10 = vcmp.lt.s32.totalorder %v4478_v35, 0  ;;  %v3356_v7 = vsel %vm3352_vm1, %v3336_v58, %v7328_v24  ;;  %v3373_v5 = vmul.u32 %v3371_v20, %v3369_v61 }
 0x370   : >> { %v3127_v38 = vsel %vm3120_vm5, %v3123_v59, %v3126_v13  ;;  %v3257_v63 = vsel %vm4479_vm10, 0, %v4478_v35  ;;  %v3397_v36 = vmul.u32 %v3393_v23, %v3370_v17  ;;  %vm3150_vm11 = vcmp.lt.s32.totalorder %v7054_v21, 0 }
 0x371   : >> { %v3128_v6 = vsel %vm3118_vm4, nan, %v3127_v38  ;;  %v3258_v15 = vsub.s32 32, %v3257_v63  ;;  %v3259_v57 = vshll.u32 %v7350_v37, %v3257_v63  ;;  %v3262_v30 = vsub.s32 4294967266, %v3257_v63 }
 0x372   : >> { %v3140_v43 = vadd.f32 %v3139_v12, %v3128_v6  ;;  %v3357_v51 = vsel %vm3355_vm2, %v7337_v2, 2102212464  ;;  %v3375_v40 = vmul.u32 %v3371_v20, %v3370_v17  ;;  %v3376_v49 = vmul.u32 %v3372_v18, %v3370_v17 }
 0x373   : >> { %v3260_v28 = vshrl.u32 %v3242_v4, %v3258_v15  ;;  %v3263_v37 = vadd.s32 127, %v3262_v30  ;;  %v3377_v44 = vshll.u32 %v3374_v55, 16  ;;  %v3395_v33 = vmul.u32 %v3393_v23, %v3369_v61  ;;  %v3307_v15 = vld [vmem:[%s3306_s6] sm:$0x1]  ;;  %s7731_s6 = sld [smem:[%s5348_s21 + %s7254_s9]] }
 0x374   : >> { %3141 = vst [vmem:[%s5895_s1 + $0x5] sm:$0x1] %v3140_v43  ;;  %v3399_v32 = vshll.u32 %v7397_v9, 16  ;;  %vm7420_vm12 = vcmp.le.f32.partialorder %v3148_v25, 0.7853982  ;;  %v3379_v60 = vshll.u32 %v3375_v40, 16  ;;  %v3398_v14 = vmul.u32 %v3394_v26, %v3370_v17 }
 0x375   : >> { %v3261_v10 = vor.u32 %v3260_v28, %v3259_v57  ;;  %v3264_v3 = vshll.u32 %v3263_v37, 23  ;;  %v3378_v39 = vshrl.u32 %v3374_v55, 16  ;;  %vm3381_vm13 = vc.u32 %v3373_v5, %v3377_v44 }
 0x376   : >> { %v3383_v2 = vadd.s32 %v3377_v44, %v3373_v5  ;;  %v3401_v31 = vshll.u32 %v3397_v36, 16  ;;  %v3380_v41 = vshrl.u32 %v3375_v40, 16  ;;  %v3382_v25 = vsel %vm3381_vm13, 1, %v4950_v56  ;;  %v3311_v40 = vld [vmem:[%s3310_s8] sm:$0x1]  ;;  %s3648_s8 = scalar_lea.vmem [#allocation23], %s7717_s5 }
 0x377   : >> { %v3265_v11 = vor.u32 4788187, %v3264_v3  ;;  %v3268_v61 = vcvt.s32.f32 %v3261_v10  ;;  %v3384_v13 = vadd.s32 %v3382_v25, %v3376_v49  ;;  %vm3403_vm15 = vc.u32 %v3395_v33, %v3399_v32 }
 0x378   : >> { %vm3385_vm14 = vc.u32 %v3383_v2, %v3379_v60  ;;  %v3405_v53 = vadd.s32 %v3399_v32, %v3395_v33  ;;  %v3404_v35 = vsel %vm3403_vm15, 1, %v4950_v56  ;;  %v3497_v17 = vshrl.u32 %v3496_v22, 23 }
 0x379   : >> { %v3266_v12 = vand.u32 2147483647, %v3265_v11  ;;  %v3386_v26 = vsel %vm3385_vm14, 1, %v4950_v56  ;;  %v3400_v59 = vshrl.u32 %v7397_v9, 16  ;;  %v3406_v58 = vadd.s32 %v3404_v35, %v3398_v14  ;;  %v3304_v9 = vld [vmem:[%s3303_s2] sm:$0x1]  ;;  %s3650_s2 = sld [smem:[%s5345_s28 + %s7254_s9]] }
 0x37a   : >> { %v3388_v18 = vadd.s32 %v3386_v26, %v3384_v13  ;;  %vm3407_vm0 = vc.u32 %v3405_v53, %v3401_v31  ;;  %v3358_v23 = vsel %vm3354_vm3, %v7335_v19, %v3357_v51  ;;  %v4483_v4 = vadd.s32 4294967169, %v3497_v17  ;;  %s3655_s15 = scalar_lea.vmem [#allocation24], %s7731_s6 }
 0x37b   : >> { %v3269_v20 = vmul.f32 %v3268_v61, %v3266_v12  ;;  %v3408_v38 = vsel %vm3407_vm0, 1, %v4950_v56  ;;  %v3273_v22 = vsel %vm3150_vm11, %v3272_v29, %v7333_v34  ;;  %v3402_v63 = vshrl.u32 %v3397_v36, 16 }
 0x37c   : >> { %v3389_v6 = vadd.s32 %v3388_v18, %v3378_v39  ;;  %v3410_v55 = vadd.s32 %v3408_v38, %v3406_v58  ;;  %v7445_v57 = vadd.s32 %v3405_v53, %v3401_v31  ;;  %v3503_v30 = vadd.s32 1, %v4483_v4 }
 0x37d   : >> { %v3270_v43 = vxor.u32 2147483648, %v3269_v20  ;;  %v3359_v19 = vsel %vm3353_vm6, %v3356_v7, %v3358_v23  ;;  %v3275_v29 = vsel %vm7420_vm12, 0, %v3273_v22  ;;  %v3308_v37 = vadd.f32 %v3307_v15, %v3304_v9 }
 0x37e   : >> { %v7449_v5 = vadd.s32 %v3389_v6, %v3380_v41  ;;  %v3411_v28 = vadd.s32 %v3410_v55, %v3400_v59  ;;  %vm3504_vm1 = vcmp.gt.s32.totalorder %v3503_v30, 0  ;;  %v3493_v7 = vand.u32 2147483647, %v7381_v8 }
 0x37f   : >> { %v3271_v34 = vsel %vm3150_vm11, %v3270_v43, %v3269_v20  ;;  %v3413_v49 = vmul.u32 %v7360_v45, %v3359_v19  ;;  %v3505_v44 = vsel %vm3504_vm1, %v3503_v30, 0  ;;  %v7467_v33 = vand.u32 3, %v3275_v29 }
 0x380   : >> { %v7458_v36 = vsel %vm7420_vm12, %v7054_v21, %v3271_v34  ;;  %v3412_v42 = vadd.s32 %v3411_v28, %v3402_v63  ;;  %vm3415_vm2 = vc.u32 %v7449_v5, %v7445_v57  ;;  %v3507_v24 = vand.u32 31, %v3505_v44 }
 0x381   : >> { %v3276_v51 = vmul.f32 %v7458_v36, %v7458_v36  ;;  %v7471_v60 = vadd.f32 %v3311_v40, %v3308_v37  ;;  %v3500_v45 = vand.u32 8388607, %v3493_v7  ;;  %vm3297_vm3 = vcmp.eq.s32.totalorder %v7467_v33, 2 }
 0x382   : >> { %v3416_v32 = vadd.s32 1, %v3412_v42  ;;  %v7473_v39 = vsub.s32 32, %v3507_v24  ;;  %v7478_v61 = vshrl.u32 %v3505_v44, 5  ;;  %v3510_v41 = vshll.u32 %v4944_v46, %v3507_v24 }
 0x383   : >> { %v3277_v10 = vmul.f32 -0.001358992, %v3276_v51  ;;  %v3284_v3 = vmul.f32 -0.00019511016, %v3276_v51  ;;  %v3513_v25 = vshll.u32 %v4945_v48, %v3507_v24  ;;  %v3662_v13 = vstv %s3661_s30  ;;  %s3651_s30 = scalar_lea.vmem [#allocation23], %s3650_s2 }
 0x384   : >> { %v3417_v14 = vsel %vm3415_vm2, %v3416_v32, %v3412_v42  ;;  %v3511_v35 = vshrl.u32 %v4945_v48, %v7473_v39  ;;  %vm3294_vm4 = vcmp.eq.s32.totalorder %v7467_v33, 0  ;;  %v3514_v17 = vshrl.u32 %v4946_v50, %v7473_v39 }
 0x385   : >> { %v3278_v2 = vadd.f32 0.041655596, %v3277_v10  ;;  %v3285_v31 = vadd.f32 0.008332121, %v3284_v3  ;;  %v3418_v11 = vadd.s32 %v3417_v14, %v3413_v49  ;;  %v3516_v18 = vshll.u32 %v4946_v50, %v3507_v24 }
 0x386   : >> { %v3517_v59 = vshrl.u32 %v4947_v52, %v7473_v39  ;;  %v3519_v58 = vshll.u32 %v4947_v52, %v3507_v24  ;;  %vm3293_vm5 = vcmp.lt.s32.totalorder %v7467_v33, 2  ;;  %v3520_v4 = vshrl.u32 %v4948_v54, %v7473_v39 }
 0x387   : >> { %v3279_v53 = vmul.f32 %v3278_v2, %v3276_v51  ;;  %v3286_v12 = vmul.f32 %v3285_v31, %v3276_v51  ;;  %v3419_v26 = vadd.s32 536870912, %v3418_v11  ;;  %vm3291_vm6 = vweird.f32 %v7054_v21 }
 0x388   : >> { %v3501_v22 = vor.u32 8388608, %v3500_v45  ;;  %v3522_v6 = vshll.u32 %v4948_v54, %v3507_v24  ;;  %v3523_v63 = vshrl.u32 %v4949_v62, %v7473_v39  ;;  %v3663_v55 = vmul.f32 %v3662_v13, %v5389_v0  ;;  %v4631_v0 = vld [vmem:[#allocation2 + $0x3] ss:$0 sm:$0xff] (%p1054_p5) }
 0x389   : >> { %v3280_v20 = vadd.f32 -0.4999988, %v3279_v53  ;;  %v3287_v23 = vadd.f32 -0.16666654, %v3286_v12  ;;  %v7492_v38 = vshrl.u32 %v3419_v26, 30  ;;  %v3512_v30 = vor.u32 %v3511_v35, %v3510_v41 }
 0x38a   : >> { %v7502_v19 = vor.u32 %v3514_v17, %v3513_v25  ;;  %v7504_v28 = vor.u32 %v3517_v59, %v3516_v18  ;;  %v3521_v34 = vor.u32 %v3520_v4, %v3519_v58  ;;  %v3524_v29 = vor.u32 %v3523_v63, %v3522_v6 }
 0x38b   : >> { %v3281_v43 = vmul.f32 %v3280_v20, %v3276_v51  ;;  %v3288_v9 = vmul.f32 %v3287_v23, %v3276_v51  ;;  %v3421_v15 = vshll.u32 %v7492_v38, 30  ;;  %vm3525_vm7 = vcmp.lt.s32.totalorder %v7478_v61, 1 }
 0x38c   : >> { %vm3526_vm8 = vcmp.lt.s32.totalorder %v7478_v61, 2  ;;  %vm3527_vm9 = vcmp.lt.s32.totalorder %v7478_v61, 3  ;;  %vm3528_vm10 = vcmp.lt.s32.totalorder %v7478_v61, 4  ;;  %v7510_v51 = vshll.u32 %v3501_v22, 8 }
 0x38d   : >> { %v3282_v37 = vadd.f32 1.0, %v3281_v43  ;;  %v3289_v42 = vadd.f32 1.0, %v3288_v9  ;;  %v3422_v40 = vsub.s32 %v3418_v11, %v3421_v15  ;;  %v3533_v24 = vsel %vm3525_vm7, %v3512_v30, %v7502_v19 }
 0x38e   : >> { %v3534_v10 = vsel %vm3528_vm10, %v3521_v34, 920167782  ;;  %v3537_v3 = vsel %vm3525_vm7, %v7502_v19, %v7504_v28  ;;  %v3538_v14 = vsel %vm3528_vm10, %v3524_v29, 1326507024  ;;  %v7527_v11 = vadd.f32 %v3663_v55, %v5394_v1 }
 0x38f   : >> { %v3290_v49 = vmul.f32 %v3289_v42, %v7458_v36  ;;  %v3298_v44 = vxor.u32 2147483648, %v3282_v37  ;;  %vm3423_vm11 = vcmp.lt.s32.totalorder %v3422_v40, 0  ;;  %v3424_v32 = vsub.s32 0, %v3422_v40 }
 0x390   : >> { %v3535_v41 = vsel %vm3527_vm9, %v7504_v28, %v3534_v10  ;;  %v3539_v25 = vsel %vm3527_vm9, %v3521_v34, %v3538_v14  ;;  %v3542_v13 = vand.u32 65535, %v7510_v51  ;;  %v3543_v35 = vshrl.u32 %v7510_v51, 16 }
 0x391   : >> { %v3295_v2 = vxor.u32 2147483648, %v3290_v49  ;;  %v3299_v36 = vsel %vm3297_vm3, %v3298_v44, %v3290_v49  ;;  %v3425_v31 = vsel %vm3423_vm11, %v3424_v32, %v3422_v40  ;;  %v3536_v12 = vsel %vm3526_vm8, %v3533_v24, %v3535_v41 }
 0x392   : >> { %v3426_v45 = vclz %v3425_v31  ;;  %v3540_v26 = vsel %vm3526_vm8, %v3537_v3, %v3539_v25  ;;  %v3414_v23 = vadd.s32 %v7445_v57, %v7449_v5  ;;  %v3668_v4 = vand.u32 2139095040, %v7527_v11 }
 0x393   : >> { %v3296_v53 = vsel %vm3294_vm4, %v3282_v37, %v3295_v2  ;;  %v3544_v59 = vand.u32 65535, %v3540_v26  ;;  %v3545_v58 = vshrl.u32 %v3540_v26, 16  ;;  %v3509_v6 = vshrl.u32 %v4944_v46, %v7473_v39 }
 0x394   : >> { %v3300_v17 = vsel %vm3293_vm5, %v3296_v53, %v3299_v36  ;;  %v4481_v18 = vadd.s32 4294967294, %v3426_v45  ;;  %v3566_v33 = vand.u32 65535, %v3536_v12  ;;  %v3567_v9 = vshrl.u32 %v3536_v12, 16 }
 0x395   : >> { %v3301_v20 = vsel %vm3291_vm6, nan, %v3300_v17  ;;  %v3547_v55 = vmul.u32 %v3545_v58, %v3542_v13  ;;  %v3548_v43 = vmul.u32 %v3544_v59, %v3543_v35  ;;  %v3546_v29 = vmul.u32 %v3544_v59, %v3542_v13 }
 0x396   : >> { %v3313_v22 = vadd.f32 %v7471_v60, %v3301_v20  ;;  %vm4482_vm12 = vcmp.lt.s32.totalorder %v4481_v18, 0  ;;  %v3444_v57 = vsub.s32 4, %v7492_v38  ;;  %v3549_v42 = vmul.u32 %v3545_v58, %v3543_v35 }
 0x397   : >> { %v3429_v63 = vsel %vm4482_vm12, 0, %v4481_v18  ;;  %v3550_v60 = vshll.u32 %v3547_v55, 16  ;;  %vm3322_vm13 = vcmp.lt.s32.totalorder %v7234_v27, 0  ;;  %v3529_v39 = vsel %vm3525_vm7, %v3509_v6, %v3512_v30 }
 0x398   : >> { %3314 = vst [vmem:[%s5814_s29 + $0x6] sm:$0x1] %v3313_v22  ;;  %v3430_v15 = vsub.s32 32, %v3429_v63  ;;  %v3431_v21 = vshll.u32 %v3422_v40, %v3429_v63  ;;  %v3434_v34 = vsub.s32 4294967266, %v3429_v63  ;;  %v3552_v49 = vshll.u32 %v3548_v43, 16 }
 0x399   : >> { %v3569_v44 = vmul.u32 %v3567_v9, %v3542_v13  ;;  %v3669_v32 = vshrl.u32 %v3668_v4, 23  ;;  %vm7559_vm14 = vcmp.le.f32.partialorder %v3320_v47, 0.7853982  ;;  %vm3554_vm15 = vc.u32 %v3546_v29, %v3550_v60 }
 0x39a   : >> { %v3432_v5 = vshrl.u32 %v3414_v23, %v3430_v15  ;;  %v3435_v37 = vadd.s32 127, %v3434_v34  ;;  %v3568_v3 = vmul.u32 %v3566_v33, %v3542_v13  ;;  %v3555_v14 = vsel %vm3554_vm15, 1, %v4950_v56 }
 0x39b   : >> { %v3556_v2 = vadd.s32 %v3550_v60, %v3546_v29  ;;  %v3570_v36 = vmul.u32 %v3566_v33, %v3543_v35  ;;  %v3571_v31 = vmul.u32 %v3567_v9, %v3543_v35  ;;  %v3557_v41 = vadd.s32 %v3555_v14, %v3549_v42 }
 0x39c   : >> { %v3433_v24 = vor.u32 %v3432_v5, %v3431_v21  ;;  %v3436_v10 = vshll.u32 %v3435_v37, 23  ;;  %v3572_v25 = vshll.u32 %v3569_v44, 16  ;;  %v3530_v47 = vsel %vm3528_vm10, %v7504_v28, 2102212464 }
 0x39d   : >> { %v3551_v53 = vshrl.u32 %v3547_v55, 16  ;;  %vm3558_vm0 = vc.u32 %v3556_v2, %v3552_v49  ;;  %v3574_v12 = vshll.u32 %v3570_v36, 16  ;;  %v3553_v18 = vshrl.u32 %v3548_v43, 16 }
 0x39e   : >> { %v3437_v45 = vor.u32 4788187, %v3436_v10  ;;  %v3440_v30 = vcvt.s32.f32 %v3433_v24  ;;  %v3559_v17 = vsel %vm3558_vm0, 1, %v4950_v56  ;;  %vm3576_vm1 = vc.u32 %v3568_v3, %v3572_v25 }
 0x39f   : >> { %v3578_v13 = vadd.s32 %v3572_v25, %v3568_v3  ;;  %v3561_v59 = vadd.s32 %v3559_v17, %v3557_v41  ;;  %v3577_v35 = vsel %vm3576_vm1, 1, %v4950_v56  ;;  %v4486_v58 = vadd.s32 4294967169, %v3669_v32 }
 0x3a0   : >> { %v3438_v26 = vand.u32 2147483647, %v3437_v45  ;;  %v3573_v23 = vshrl.u32 %v3569_v44, 16  ;;  %v3579_v4 = vadd.s32 %v3577_v35, %v3571_v31  ;;  %v3531_v28 = vsel %vm3527_vm9, %v7502_v19, %v3530_v47 }
 0x3a1   : >> { %vm3580_vm2 = vc.u32 %v3578_v13, %v3574_v12  ;;  %v3562_v22 = vadd.s32 %v3561_v59, %v3551_v53  ;;  %v3675_v33 = vadd.s32 1, %v4486_v58  ;;  %v3575_v55 = vshrl.u32 %v3570_v36, 16 }
 0x3a2   : >> { %v3441_v20 = vmul.f32 %v3440_v30, %v3438_v26  ;;  %v3581_v6 = vsel %vm3580_vm2, 1, %v4950_v56  ;;  %v3665_v9 = vand.u32 2147483647, %v7527_v11  ;;  %v3445_v15 = vsel %vm3322_vm13, %v3444_v57, %v7492_v38 }
 0x3a3   : >> { %v3583_v43 = vadd.s32 %v3581_v6, %v3579_v4  ;;  %v7581_v21 = vadd.s32 %v3562_v22, %v3553_v18  ;;  %v7583_v34 = vadd.s32 %v3578_v13, %v3574_v12  ;;  %vm3676_vm3 = vcmp.gt.s32.totalorder %v3675_v33, 0 }
 0x3a4   : >> { %v3442_v63 = vxor.u32 2147483648, %v3441_v20  ;;  %v3532_v29 = vsel %vm3526_vm8, %v3529_v39, %v3531_v28  ;;  %v3677_v37 = vsel %vm3676_vm3, %v3675_v33, 0  ;;  %v3447_v57 = vsel %vm7559_vm14, 0, %v3445_v15 }
 0x3a5   : >> { %v3584_v5 = vadd.s32 %v3583_v43, %v3573_v23  ;;  %v3679_v49 = vand.u32 31, %v3677_v37  ;;  %v3586_v61 = vmul.u32 %v7510_v51, %v3532_v29  ;;  %vm3588_vm4 = vc.u32 %v7581_v21, %v7583_v34 }
 0x3a6   : >> { %v3443_v19 = vsel %vm3322_vm13, %v3442_v63, %v3441_v20  ;;  %v3672_v39 = vand.u32 8388607, %v3665_v9  ;;  %v7609_v40 = vand.u32 3, %v3447_v57  ;;  %v7615_v3 = vshrl.u32 %v3677_v37, 5  ;;  %v3479_v20 = vld [vmem:[%s3478_s26] sm:$0x1] }
 0x3a7   : >> { %v7596_v38 = vsel %vm7559_vm14, %v7234_v27, %v3443_v19  ;;  %v3585_v60 = vadd.s32 %v3584_v5, %v3575_v55  ;;  %v7607_v10 = vsub.s32 32, %v3679_v49  ;;  %v3682_v14 = vshll.u32 %v4944_v46, %v3679_v49  ;;  %s3823_s26 = scalar_lea.vmem [#allocation23], %s3822_s14 }
 0x3a8   : >> { %v3448_v42 = vmul.f32 %v7596_v38, %v7596_v38  ;;  %v3685_v51 = vshll.u32 %v4945_v48, %v3679_v49  ;;  %v3688_v45 = vshll.u32 %v4946_v50, %v3679_v49  ;;  %v3691_v47 = vshll.u32 %v4947_v52, %v3679_v49 }
 0x3a9   : >> { %v3589_v24 = vadd.s32 1, %v3585_v60  ;;  %v3683_v41 = vshrl.u32 %v4945_v48, %v7607_v10  ;;  %v3686_v25 = vshrl.u32 %v4946_v50, %v7607_v10  ;;  %v3673_v26 = vor.u32 8388608, %v3672_v39 }
 0x3aa   : >> { %v3449_v44 = vmul.f32 -0.001358992, %v3448_v42  ;;  %v3456_v32 = vmul.f32 -0.00019511016, %v3448_v42  ;;  %v3689_v17 = vshrl.u32 %v4947_v52, %v7607_v10  ;;  %v3692_v59 = vshrl.u32 %v4948_v54, %v7607_v10  ;;  %v3476_v52 = vld [vmem:[%s3475_s22] sm:$0x1] }
 0x3ab   : >> { %v3590_v31 = vsel %vm3588_vm4, %v3589_v24, %v3585_v60  ;;  %v7627_v18 = vor.u32 %v3683_v41, %v3682_v14  ;;  %vm3700_vm5 = vcmp.lt.s32.totalorder %v7615_v3, 4  ;;  %vm3465_vm6 = vcmp.lt.s32.totalorder %v7609_v40, 2  ;;  %v3483_v60 = vld [vmem:[%s3482_s27] sm:$0x1] }
 0x3ac   : >> { %v3450_v2 = vadd.f32 0.041655596, %v3449_v44  ;;  %v3457_v36 = vadd.f32 0.008332121, %v3456_v32  ;;  %v3591_v30 = vadd.s32 %v3590_v31, %v3586_v61  ;;  %v7633_v35 = vor.u32 %v3686_v25, %v3685_v51 }
 0x3ad   : >> { %v3694_v58 = vshll.u32 %v4948_v54, %v3679_v49  ;;  %vm3463_vm7 = vweird.f32 %v7234_v27  ;;  %v7641_v4 = vor.u32 %v3689_v17, %v3688_v45  ;;  %v3693_v28 = vor.u32 %v3692_v59, %v3691_v47 }
 0x3ae   : >> { %v3451_v53 = vmul.f32 %v3450_v2, %v3448_v42  ;;  %v3458_v12 = vmul.f32 %v3457_v36, %v3448_v42  ;;  %v3592_v13 = vadd.s32 536870912, %v3591_v30  ;;  %v3695_v22 = vshrl.u32 %v4949_v62, %v7607_v10 }
 0x3af   : >> { %vm3697_vm8 = vcmp.lt.s32.totalorder %v7615_v3, 1  ;;  %vm3699_vm9 = vcmp.lt.s32.totalorder %v7615_v3, 3  ;;  %vm3469_vm10 = vcmp.eq.s32.totalorder %v7609_v40, 2  ;;  %v7649_v55 = vshll.u32 %v3673_v26, 8 }
 0x3b0   : >> { %v3452_v48 = vadd.f32 -0.4999988, %v3451_v53  ;;  %v3459_v50 = vadd.f32 -0.16666654, %v3458_v12  ;;  %v7639_v23 = vshrl.u32 %v3592_v13, 30  ;;  %v3696_v63 = vor.u32 %v3695_v22, %v3694_v58 }
 0x3b1   : >> { %v3480_v19 = vadd.f32 %v3479_v20, %v3476_v52  ;;  %v3706_v62 = vsel %vm3700_vm5, %v3693_v28, 920167782  ;;  %vm3698_vm11 = vcmp.lt.s32.totalorder %v7615_v3, 2  ;;  %v3705_v5 = vsel %vm3697_vm8, %v7627_v18, %v7633_v35 }
 0x3b2   : >> { %v3453_v6 = vmul.f32 %v3452_v48, %v3448_v42  ;;  %v3460_v33 = vmul.f32 %v3459_v50, %v3448_v42  ;;  %v3594_v54 = vshll.u32 %v7639_v23, 30  ;;  %v3707_v37 = vsel %vm3699_vm9, %v7641_v4, %v3706_v62 }
 0x3b3   : >> { %vm3466_vm12 = vcmp.eq.s32.totalorder %v7609_v40, 0  ;;  %v3709_v49 = vsel %vm3697_vm8, %v7633_v35, %v7641_v4  ;;  %v3710_v39 = vsel %vm3700_vm5, %v3696_v63, 1326507024  ;;  %v3714_v44 = vand.u32 65535, %v7649_v55 }
 0x3b4   : >> { %v3454_v43 = vadd.f32 1.0, %v3453_v6  ;;  %v3461_v15 = vadd.f32 1.0, %v3460_v33  ;;  %v3595_v29 = vsub.s32 %v3591_v30, %v3594_v54  ;;  %v3708_v24 = vsel %vm3698_vm11, %v3705_v5, %v3707_v37 }
 0x3b5   : >> { %v3711_v14 = vsel %vm3699_vm9, %v3693_v28, %v3710_v39  ;;  %v3484_v51 = vadd.f32 %v3483_v60, %v3480_v19  ;;  %v3715_v31 = vshrl.u32 %v7649_v55, 16  ;;  %v3739_v53 = vshrl.u32 %v3708_v24, 16 }
 0x3b6   : >> { %v3462_v57 = vmul.f32 %v3461_v15, %v7596_v38  ;;  %v3470_v42 = vxor.u32 2147483648, %v3454_v43  ;;  %vm3596_vm13 = vcmp.lt.s32.totalorder %v3595_v29, 0  ;;  %v3597_v61 = vsub.s32 0, %v3595_v29 }
 0x3b7   : >> { %v3712_v36 = vsel %vm3698_vm11, %v3709_v49, %v3711_v14  ;;  %v3738_v50 = vand.u32 65535, %v3708_v24  ;;  %v3587_v58 = vadd.s32 %v7583_v34, %v7581_v21  ;;  %v3741_v22 = vmul.u32 %v3739_v53, %v3714_v44 }
 0x3b8   : >> { %v3467_v32 = vxor.u32 2147483648, %v3462_v57  ;;  %v3471_v38 = vsel %vm3469_vm10, %v3470_v42, %v3462_v57  ;;  %v3598_v2 = vsel %vm3596_vm13, %v3597_v61, %v3595_v29  ;;  %v3716_v41 = vand.u32 65535, %v3712_v36 }
 0x3b9   : >> { %v3599_v30 = vclz %v3598_v2  ;;  %v3717_v25 = vshrl.u32 %v3712_v36, 16  ;;  %v3740_v63 = vmul.u32 %v3738_v50, %v3714_v44  ;;  %v3743_v5 = vmul.u32 %v3739_v53, %v3715_v31 }
 0x3ba   : >> { %v3468_v45 = vsel %vm3466_vm12, %v3454_v43, %v3467_v32  ;;  %v3718_v59 = vmul.u32 %v3716_v41, %v3714_v44  ;;  %v3720_v48 = vmul.u32 %v3716_v41, %v3715_v31  ;;  %v3742_v43 = vmul.u32 %v3738_v50, %v3715_v31 }
 0x3bb   : >> { %v3472_v47 = vsel %vm3465_vm6, %v3468_v45, %v3471_v38  ;;  %v4484_v26 = vadd.s32 4294967294, %v3599_v30  ;;  %v3719_v17 = vmul.u32 %v3717_v25, %v3714_v44  ;;  %v3721_v28 = vmul.u32 %v3717_v25, %v3715_v31 }
 0x3bc   : >> { %v3473_v12 = vsel %vm3463_vm7, nan, %v3472_v47  ;;  %v3724_v40 = vshll.u32 %v3720_v48, 16  ;;  %v3744_v37 = vshll.u32 %v3741_v22, 16  ;;  %v3681_v60 = vshrl.u32 %v4944_v46, %v7607_v10 }
 0x3bd   : >> { %v3485_v13 = vadd.f32 %v3484_v51, %v3473_v12  ;;  %vm4485_vm14 = vcmp.lt.s32.totalorder %v4484_v26, 0  ;;  %v3722_v52 = vshll.u32 %v3719_v17, 16  ;;  %v3723_v21 = vshrl.u32 %v3719_v17, 16 }
 0x3be   : >> { %v3602_v20 = vsel %vm4485_vm14, 0, %v4484_v26  ;;  %v3702_v49 = vsel %vm3700_vm5, %v7641_v4, 2102212464  ;;  %v3746_v39 = vshll.u32 %v3742_v43, 16  ;;  %vm3748_vm1 = vc.u32 %v3740_v63, %v3744_v37 }
 0x3bf   : >> { %3486 = vst [vmem:[%s5895_s1 + $0x6] sm:$0x1] %v3485_v13  ;;  %v3603_v6 = vsub.s32 32, %v3602_v20  ;;  %v3604_v33 = vshll.u32 %v3595_v29, %v3602_v20  ;;  %v3607_v27 = vsub.s32 4294967266, %v3602_v20  ;;  %vm3726_vm15 = vc.u32 %v3718_v59, %v3722_v52 }
 0x3c0   : >> { %v3728_v54 = vadd.s32 %v3722_v52, %v3718_v59  ;;  %v3727_v62 = vsel %vm3726_vm15, 1, %v4950_v56  ;;  %v3749_v38 = vsel %vm3748_vm1, 1, %v4950_v56  ;;  %v3750_v24 = vadd.s32 %v3744_v37, %v3740_v63 }
 0x3c1   : >> { %v3605_v15 = vshrl.u32 %v3587_v58, %v3603_v6  ;;  %v3608_v19 = vadd.s32 127, %v3607_v27  ;;  %v3729_v34 = vadd.s32 %v3727_v62, %v3721_v28  ;;  %v3725_v14 = vshrl.u32 %v3720_v48, 16  ;;  %v3649_v62 = vld [vmem:[%s3648_s8] sm:$0x1] }
 0x3c2   : >> { %vm3730_vm0 = vc.u32 %v3728_v54, %v3724_v40  ;;  %v3751_v2 = vadd.s32 %v3749_v38, %v3743_v5  ;;  %v3745_v31 = vshrl.u32 %v3741_v22, 16  ;;  %vm3752_vm2 = vc.u32 %v3750_v24, %v3746_v39  ;;  %v3652_v5 = vld [vmem:[%s3651_s30] sm:$0x1] }
 0x3c3   : >> { %v3606_v57 = vor.u32 %v3605_v15, %v3604_v33  ;;  %v3609_v42 = vshll.u32 %v3608_v19, 23  ;;  %v3731_v29 = vsel %vm3730_vm0, 1, %v4950_v56  ;;  %v3701_v46 = vsel %vm3697_vm8, %v3681_v60, %v7627_v18 }
 0x3c4   : >> { %v3733_v61 = vadd.s32 %v3731_v29, %v3729_v34  ;;  %v3703_v10 = vsel %vm3699_vm9, %v7633_v35, %v3702_v49  ;;  %v3753_v4 = vsel %vm3752_vm2, 1, %v4950_v56  ;;  %v3747_v30 = vshrl.u32 %v3742_v43, 16  ;;  %v3656_v49 = vld [vmem:[%s3655_s15] sm:$0x1] }
 0x3c5   : >> { %v3610_v44 = vor.u32 4788187, %v3609_v42  ;;  %v3613_v32 = vcvt.s32.f32 %v3606_v57  ;;  %v3755_v41 = vadd.s32 %v3753_v4, %v3751_v2  ;;  %vm3495_vm3 = vcmp.lt.s32.totalorder %v7381_v8, 0 }
 0x3c6   : >> { %v3734_v51 = vadd.s32 %v3733_v61, %v3723_v21  ;;  %v3754_v47 = vadd.s32 %v3750_v24, %v3746_v39  ;;  %vm7707_vm4 = vcmp.le.f32.partialorder %v3493_v7, 0.7853982  ;;  %v3704_v35 = vsel %vm3698_vm11, %v3701_v46, %v3703_v10 }
 0x3c7   : >> { %v3611_v36 = vand.u32 2147483647, %v3610_v44  ;;  %v3756_v56 = vadd.s32 %v3755_v41, %v3745_v31  ;;  %v3617_v17 = vsub.s32 4, %v7639_v23  ;;  %v3758_v13 = vmul.u32 %v7649_v55, %v3704_v35 }
 0x3c8   : >> { %v3735_v25 = vadd.s32 %v3734_v51, %v3725_v14  ;;  %v3653_v57 = vadd.f32 %v3652_v5, %v3649_v62  ;;  %vm3636_vm10 = vweird.f32 %v7381_v8  ;;  %vm3667_vm12 = vcmp.lt.s32.totalorder %v7527_v11, 0 }
 0x3c9   : >> { %v3614_v45 = vmul.f32 %v3613_v32, %v3611_v36  ;;  %v3757_v26 = vadd.s32 %v3756_v56, %v3747_v30  ;;  %v3618_v52 = vsel %vm3495_vm3, %v3617_v17, %v7639_v23  ;;  %vm7742_vm13 = vcmp.le.f32.partialorder %v3665_v9, 0.7853982  ;;  %v4634_v56 = vld [vmem:[#allocation2 + $0x6] ss:$0 sm:$0xff] (%p1054_p5) }
 0x3ca   : >> { %vm3760_vm5 = vc.u32 %v3735_v25, %v3754_v47  ;;  %v3620_v55 = vsel %vm7707_vm4, 0, %v3618_v52  ;;  %v3657_v38 = vadd.f32 %v3656_v49, %v3653_v57  ;;  %v3759_v36 = vadd.s32 %v3754_v47, %v3735_v25 }
 0x3cb   : >> { %v3615_v18 = vxor.u32 2147483648, %v3614_v45  ;;  %v3761_v59 = vadd.s32 1, %v3757_v26  ;;  %v3637_v43 = vand.u32 3, %v3620_v55  ;;  %vm3808_vm1 = vweird.f32 %v7527_v11 }
 0x3cc   : > { %vm3914_vm2 = vcmask (%p1054_p5), 1041409  }
 0x3cd   : >> { %v3616_v12 = vsel %vm3495_vm3, %v3615_v18, %v3614_v45  ;;  %v3762_v58 = vsel %vm3760_vm5, %v3761_v59, %v3757_v26  ;;  %vm3642_vm6 = vcmp.eq.s32.totalorder %v3637_v43, 2  ;;  %vm3639_vm8 = vcmp.eq.s32.totalorder %v3637_v43, 0 }
 0x3ce   : >> { %v3619_v7 = vsel %vm7707_vm4, %v7381_v8, %v3616_v12  ;;  %v3763_v20 = vadd.s32 %v3762_v58, %v3758_v13  ;;  %vm3638_vm9 = vcmp.lt.s32.totalorder %v3637_v43, 2  ;;  %vm3916_vm3 = vcmask (%p1054_p5), 1042434  }
 0x3cf   : >> { %v3621_v3 = vmul.f32 %v3619_v7, %v3619_v7  ;;  %vm3918_vm4 = vcmask (%p1054_p5), 1043459   ;;  %vm3920_vm5 = vcmask (%p1054_p5), 1044484  }
 0x3d0   : >> { %v3764_v22 = vadd.s32 536870912, %v3763_v20 }
 0x3d1   : >> { %v3622_v48 = vmul.f32 -0.001358992, %v3621_v3  ;;  %v3629_v50 = vmul.f32 -0.00019511016, %v3621_v3 }
 0x3d2   : >> { %v3765_v27 = vshrl.u32 %v3764_v22, 30 }
 0x3d3   : >> { %v3623_v28 = vadd.f32 0.041655596, %v3622_v48  ;;  %v3630_v40 = vadd.f32 0.008332121, %v3629_v50 }
 0x3d4   : >> { %v3766_v15 = vshll.u32 %v3765_v27, 30  ;;  %v3789_v17 = vsub.s32 4, %v3765_v27 }
 0x3d5   : >> { %v3624_v6 = vmul.f32 %v3623_v28, %v3621_v3  ;;  %v3631_v33 = vmul.f32 %v3630_v40, %v3621_v3 }
 0x3d6   : >> { %v3767_v21 = vsub.s32 %v3763_v20, %v3766_v15  ;;  %v3790_v48 = vsel %vm3667_vm12, %v3789_v17, %v3765_v27  ;;  %v4635_v17 = vld [vmem:[#allocation2 + $0x7] ss:$0 sm:$0xff] (%p1054_p5) }
 0x3d7   : >> { %v3625_v54 = vadd.f32 -0.4999988, %v3624_v6  ;;  %v3632_v63 = vadd.f32 -0.16666654, %v3631_v33  ;;  %v3792_v9 = vsel %vm7742_vm13, 0, %v3790_v48 }
 0x3d8   : >> { %vm3768_vm7 = vcmp.lt.s32.totalorder %v3767_v21, 0  ;;  %v3769_v42 = vsub.s32 0, %v3767_v21  ;;  %v3809_v22 = vand.u32 3, %v3792_v9 }
 0x3d9   : >> { %v3626_v19 = vmul.f32 %v3625_v54, %v3621_v3  ;;  %v3633_v23 = vmul.f32 %v3632_v63, %v3621_v3  ;;  %v3824_v54 = vld [vmem:[%s3823_s26] sm:$0x1] }
 0x3da   : >> { %v3770_v61 = vsel %vm3768_vm7, %v3769_v42, %v3767_v21  ;;  %vm3814_vm14 = vcmp.eq.s32.totalorder %v3809_v22, 2  ;;  %vm3811_vm15 = vcmp.eq.s32.totalorder %v3809_v22, 0  ;;  %vm3810_vm0 = vcmp.lt.s32.totalorder %v3809_v22, 2 }
 0x3db   : >> { %v3627_v34 = vadd.f32 1.0, %v3626_v19  ;;  %v3634_v37 = vadd.f32 1.0, %v3633_v23  ;;  %v3771_v32 = vclz %v3770_v61  ;;  %v3904_v22 = vlaneseq (%p1054_p5) }
 0x3dc   : > { %vm3924_vm7 = vcmask (%p1054_p5), 1046534  }
 0x3dd   : >> { %v3635_v60 = vmul.f32 %v3634_v37, %v3619_v7  ;;  %v3643_v29 = vxor.u32 2147483648, %v3627_v34  ;;  %v4487_v14 = vadd.s32 4294967294, %v3771_v32  ;;  %v4629_v32 = vld [vmem:[#allocation2 + $0x2] ss:$0 sm:$0xff] (%p1054_p5) }
 0x3df   : >> { %v3640_v39 = vxor.u32 2147483648, %v3635_v60  ;;  %v3644_v44 = vsel %vm3642_vm6, %v3643_v29, %v3635_v60  ;;  %vm4488_vm11 = vcmp.lt.s32.totalorder %v4487_v14, 0  ;;  %v4628_v60 = vld [vmem:[#allocation2] ss:$0 sm:$0xff] (%p1054_p5)  ;;  %vm3922_vm6 = vcmask (%p1054_p5), 1045509  }
 0x3e0   : >> { %v3774_v46 = vsel %vm4488_vm11, 0, %v4487_v14 }
 0x3e1   : >> { %v3641_v24 = vsel %vm3639_vm8, %v3627_v34, %v3640_v39  ;;  %v3775_v10 = vsub.s32 32, %v3774_v46  ;;  %v3776_v4 = vshll.u32 %v3767_v21, %v3774_v46  ;;  %v3779_v45 = vsub.s32 4294967266, %v3774_v46  ;;  %v4632_v46 = vld [vmem:[#allocation2 + $0x4] ss:$0 sm:$0xff] (%p1054_p5) }
 0x3e2   : >> { %v3645_v51 = vsel %vm3638_vm9, %v3641_v24, %v3644_v44  ;;  %vm3926_vm8 = vcmask (%p1054_p5), 1047559   ;;  %vm3929_vm9 = vcmask (%p1054_p5), 64512  }
 0x3e3   : >> { %v3646_v2 = vsel %vm3636_vm10, nan, %v3645_v51  ;;  %v3777_v30 = vshrl.u32 %v3759_v36, %v3775_v10  ;;  %v3780_v41 = vadd.s32 127, %v3779_v45 }
 0x3e4   : >> { %v3658_v31 = vadd.f32 %v3657_v38, %v3646_v2  ;;  %v4630_v38 = vld [vmem:[#allocation2 + $0x1] ss:$0 sm:$0xff] (%p1054_p5) }
 0x3e5   : >> { %v3778_v8 = vor.u32 %v3777_v30, %v3776_v4  ;;  %v3781_v53 = vshll.u32 %v3780_v41, 23  ;;  %v4633_v41 = vld [vmem:[#allocation2 + $0x5] ss:$0 sm:$0xff] (%p1054_p5) }
 0x3e6   : >> { %3659 = vst [vmem:[%s5814_s29 + $0x7] sm:$0x1] %v3658_v31  ;;  %s3819_s29 = sld [smem:[%s5358_s0 + %s7254_s9]]  ;;  %s3827_s9 = scalar_lea.vmem [#allocation24], %s3826_s16 }
 0x3e7   : >> { %v3782_v18 = vor.u32 4788187, %v3781_v53  ;;  %v3785_v35 = vcvt.s32.f32 %v3778_v8  ;;  %v3828_v23 = vld [vmem:[%s3827_s9] sm:$0x1] }
 0x3e9   : >> { %v3783_v25 = vand.u32 2147483647, %v3782_v18 }
 0x3eb   : >> { %v3786_v47 = vmul.f32 %v3785_v35, %v3783_v25 }
 0x3ec   : >> { %s3820_s22 = scalar_lea.vmem [#allocation23], %s3819_s29 }
 0x3ed   : >> { %v3787_v12 = vxor.u32 2147483648, %v3786_v47  ;;  %v3821_v33 = vld [vmem:[%s3820_s22] sm:$0x1]  ;;  %v3840_v49 = vld [vmem:[#allocation3] sm:$0xff] (%p1054_p5)  ;;  %v3842_v61 = vld [vmem:[#allocation3 + $0x10] sm:$0xff] (%p1054_p5) }
 0x3ee   : >> { %v3825_v27 = vadd.f32 %v3824_v54, %v3821_v33  ;;  %v3872_v44 = vmul.f32 (%p1054_p5), %v4628_v60, %v3840_v49  ;;  %v3841_v14 = vld [vmem:[#allocation3 + $0x8] sm:$0xff] (%p1054_p5)  ;;  %v3843_v16 = vld [vmem:[#allocation3 + $0x18] sm:$0xff] (%p1054_p5)  ;;  %v3844_v10 = vld [vmem:[#allocation3 + $0x20] sm:$0xff] (%p1054_p5)  ;;  %v3905_v54 = vand.u32 (%p1054_p5), 127, %v3904_v22 }
 0x3ef   : >> { %v3788_v26 = vsel %vm3667_vm12, %v3787_v12, %v3786_v47  ;;  %v3873_v36 = vmul.f32 (%p1054_p5), %v4630_v38, %v3841_v14  ;;  %v3875_v45 = vmul.f32 (%p1054_p5), %v4631_v0, %v3843_v16  ;;  %v3876_v30 = vmul.f32 (%p1054_p5), %v4632_v46, %v3844_v10  ;;  %v3845_v8 = vld [vmem:[#allocation3 + $0x28] sm:$0xff] (%p1054_p5) }
 0x3f0   : >> { %v3791_v7 = vsel %vm7742_vm13, %v7527_v11, %v3788_v26  ;;  %v3829_v21 = vadd.f32 %v3828_v23, %v3825_v27  ;;  %3880 = vadd.xlane.f32.xlu0 (%p1054_p5), %v3872_v44  ;;  %v3874_v11 = vmul.f32 (%p1054_p5), %v4629_v32, %v3842_v61  ;;  %v3877_v35 = vmul.f32 (%p1054_p5), %v4633_v41, %v3845_v8  ;;  %v3846_v26 = vld [vmem:[#allocation3 + $0x30] sm:$0xff] (%p1054_p5) }
 0x3f1   : >> { %v3793_v13 = vmul.f32 %v3791_v7, %v3791_v7 }
 0x3f2   : > { %3884 = vadd.xlane.f32.xlu2 (%p1054_p5), %v3874_v11 }
 0x3f3   : >> { %v3794_v3 = vmul.f32 -0.001358992, %v3793_v13  ;;  %v3801_v59 = vmul.f32 -0.00019511016, %v3793_v13 }
 0x3f5   : >> { %v3795_v50 = vadd.f32 0.041655596, %v3794_v3  ;;  %v3802_v58 = vadd.f32 0.008332121, %v3801_v59  ;;  %v3878_v3 = vmul.f32 (%p1054_p5), %v4634_v56, %v3846_v26 }
 0x3f7   : >> { %v3796_v52 = vmul.f32 %v3795_v50, %v3793_v13  ;;  %v3803_v20 = vmul.f32 %v3802_v58, %v3793_v13 }
 0x3f8   : > { %3882 = vadd.xlane.f32.xlu0 (%p1054_p5), %v3873_v36 }
 0x3f9   : >> { %v3797_v28 = vadd.f32 -0.4999988, %v3796_v52  ;;  %v3804_v40 = vadd.f32 -0.16666654, %v3803_v20 }
 0x3fb   : >> { %v3798_v55 = vmul.f32 %v3797_v28, %v3793_v13  ;;  %v3805_v6 = vmul.f32 %v3804_v40, %v3793_v13 }
 0x3fd   : >> { %v3799_v63 = vadd.f32 1.0, %v3798_v55  ;;  %v3806_v43 = vadd.f32 1.0, %v3805_v6 }
 0x3ff   : >> { %v3807_v15 = vmul.f32 %v3806_v43, %v3791_v7  ;;  %v3815_v19 = vxor.u32 2147483648, %v3799_v63  ;;  %v3847_v7 = vld [vmem:[#allocation3 + $0x38] sm:$0xff] (%p1054_p5) }
 0x400   : > { %3886 = vadd.xlane.f32.xlu0 (%p1054_p5), %v3875_v45  ;;  %v3879_v59 = vmul.f32 (%p1054_p5), %v4635_v17, %v3847_v7 }
 0x401   : >> { %v3812_v62 = vxor.u32 2147483648, %v3807_v15  ;;  %v3816_v5 = vsel %vm3814_vm14, %v3815_v19, %v3807_v15 }
 0x403   : >> { %v3813_v34 = vsel %vm3811_vm15, %v3799_v63, %v3812_v62 }
 0x404   : >> { %v3817_v37 = vsel %vm3810_vm0, %v3813_v34, %v3816_v5  ;;  %1056 = sbr.rel (!%p1054_p5) target bundleno = 355 (0x163), region = 348 }
 0x405   : >> { %v3818_v57 = vsel %vm3808_vm1, nan, %v3817_v37 }
 0x406   : >> { %v3830_v42 = vadd.f32 %v3829_v21, %v3818_v57 }
 0x408   : >> { %3831 = vst [vmem:[%s5895_s1 + $0x7] sm:$0x1] %v3830_v42 }
 0x409   : > { %s4491_s18 = sshll.u32 (%p5196_p2), %s5179_s25, 3  ;;  %s7913_s7 = sld [smem:[#allocation53_spill]] (%p5196_p2) }
 0x40f   : > { %v3931_v29 = vld [vmem:[#allocation4] sm:$0xff]  ;;  %v3932_v24 = vld [vmem:[#allocation4 + $0x8] sm:$0xff]  ;;  %v3933_v51 = vld [vmem:[#allocation4 + $0x10] sm:$0xff]  ;;  %s3997_s0 = scalar_lea.vmem (%p5196_p2), %s7913_s7, %s4491_s18 }
 0x410   : > { %v3939_v39 = vmul.f32 %v4628_v60, %v3931_v29  ;;  %v3940_v2 = vmul.f32 %v4630_v38, %v3932_v24  ;;  %v3941_v31 = vmul.f32 %v4629_v32, %v3933_v51  ;;  %v3934_v1 = vld [vmem:[#allocation4 + $0x18] sm:$0xff]  ;;  %v3935_v53 = vld [vmem:[#allocation4 + $0x20] sm:$0xff]  ;;  %v3936_v18 = vld [vmem:[#allocation4 + $0x28] sm:$0xff] }
 0x411   : > { %v3942_v4 = vmul.f32 %v4631_v0, %v3934_v1  ;;  %v3943_v25 = vmul.f32 %v4632_v46, %v3935_v53  ;;  %v3944_v47 = vmul.f32 %v4633_v41, %v3936_v18  ;;  %v3937_v12 = vld [vmem:[#allocation4 + $0x30] sm:$0xff]  ;;  %v3938_v48 = vld [vmem:[#allocation4 + $0x38] sm:$0xff] }
 0x412   : > { %3947 = vadd.xlane.f32.xlu1 %v3939_v39  ;;  %3951 = vadd.xlane.f32.xlu2 %v3941_v31  ;;  %v3945_v13 = vmul.f32 %v4634_v56, %v3937_v12  ;;  %v3946_v50 = vmul.f32 %v4635_v17, %v3938_v48 }
 0x413   : > { %3955 = vadd.xlane.f32.xlu0 %v3943_v25 }
 0x41a   : > { %3949 = vadd.xlane.f32.xlu1 %v3940_v2  ;;  %3888 = vadd.xlane.f32.xlu2 %v3876_v30 }
 0x41b   : > { %3892 = vadd.xlane.f32.xlu0 %v3878_v3 }
 0x422   : > { %3953 = vadd.xlane.f32.xlu1 %v3942_v4  ;;  %3957 = vadd.xlane.f32.xlu2 %v3944_v47 }
 0x423   : > { %3961 = vadd.xlane.f32.xlu0 %v3946_v50 }
 0x42a   : > { %3890 = vadd.xlane.f32.xlu1 %v3877_v35  ;;  %3894 = vadd.xlane.f32.xlu2 %v3879_v59 }
 0x432   : > { %3959 = vadd.xlane.f32.xlu1 %v3945_v13 }
 0x463   : > { %v3881_v9 = vpop.xlane.xlu0 %3880 }
 0x464   : > { %v3906_v43 = vperm.slane %v3881_v9, %v3905_v54 }
 0x465   : > { %v3885_v52 = vpop.xlane.xlu2 %3884 }
 0x466   : > { %v3908_v15 = vperm.slane %v3885_v52, %v3905_v54 }
 0x46b   : > { %v3883_v28 = vpop.xlane.xlu0 %3882 }
 0x46c   : > { %v3907_v63 = vperm.slane %v3883_v28, %v3905_v54 }
 0x46e   : > { %v3915_v23 = vsel %vm3914_vm2, %v3907_v63, %v3906_v43 }
 0x46f   : > { %v3917_v37 = vsel %vm3916_vm3, %v3908_v15, %v3915_v23 }
 0x473   : > { %v3887_v6 = vpop.xlane.xlu0 %3886 }
 0x474   : > { %v3909_v62 = vperm.slane %v3887_v6, %v3905_v54 }
 0x476   : > { %v3919_v42 = vsel %vm3918_vm4, %v3909_v62, %v3917_v37 }
 0x485   : > { %v3948_v58 = vpop.xlane.xlu1 %3947  ;;  %v3952_v40 = vpop.xlane.xlu2 %3951 }
 0x486   : > { %v3956_v27 = vpop.xlane.xlu0 %3955  ;;  %v3971_v21 = vperm.slane %v3948_v58, %v3905_v54  ;;  %v3973_v29 = vperm.slane %v3952_v40, %v3905_v54 }
 0x487   : > { %v3975_v38 = vperm.slane %v3956_v27, %v3905_v54 }
 0x48d   : > { %v3950_v20 = vpop.xlane.xlu1 %3949  ;;  %v3889_v33 = vpop.xlane.xlu2 %3888 }
 0x48e   : > { %v3972_v34 = vperm.slane %v3950_v20, %v3905_v54  ;;  %v3910_v57 = vperm.slane %v3889_v33, %v3905_v54  ;;  %v3893_v49 = vpop.xlane.xlu0 %3892 }
 0x48f   : > { %v3912_v32 = vperm.slane %v3893_v49, %v3905_v54 }
 0x490   : > { %v3979_v61 = vsel %vm3914_vm2, %v3972_v34, %v3971_v21  ;;  %v3921_v44 = vsel %vm3920_vm5, %v3910_v57, %v3919_v42 }
 0x491   : > { %v3980_v36 = vsel %vm3916_vm3, %v3973_v29, %v3979_v61 }
 0x495   : > { %v3954_v55 = vpop.xlane.xlu1 %3953  ;;  %v3958_v5 = vpop.xlane.xlu2 %3957 }
 0x496   : > { %v3974_v39 = vperm.slane %v3954_v55, %v3905_v54  ;;  %v3976_v0 = vperm.slane %v3958_v5, %v3905_v54  ;;  %v3962_v10 = vpop.xlane.xlu0 %3961 }
 0x497   : > { %v3978_v45 = vperm.slane %v3962_v10, %v3905_v54 }
 0x498   : > { %v3981_v31 = vsel %vm3918_vm4, %v3974_v39, %v3980_v36 }
 0x499   : > { %v3982_v16 = vsel %vm3920_vm5, %v3975_v38, %v3981_v31 }
 0x49a   : > { %v3983_v4 = vsel %vm3922_vm6, %v3976_v0, %v3982_v16 }
 0x49d   : > { %v3891_v19 = vpop.xlane.xlu1 %3890  ;;  %v3895_v24 = vpop.xlane.xlu2 %3894 }
 0x49e   : > { %v3911_v60 = vperm.slane %v3891_v19, %v3905_v54  ;;  %v3913_v2 = vperm.slane %v3895_v24, %v3905_v54 }
 0x4a0   : > { %v3923_v11 = vsel %vm3922_vm6, %v3911_v60, %v3921_v44 }
 0x4a1   : > { %v3925_v51 = vsel %vm3924_vm7, %v3912_v32, %v3923_v11 }
 0x4a2   : > { %v3927_v1 = vsel %vm3926_vm8, %v3913_v2, %v3925_v51 }
 0x4a3   : > { %3930 = vst.msk [vmem:[%s5452_s24] sm:$0xff] %vm3929_vm9, %v3927_v1 }
 0x4a5   : > { %v3960_v14 = vpop.xlane.xlu1 %3959 }
 0x4a6   : > { %v3977_v46 = vperm.slane %v3960_v14, %v3905_v54  ;;  %3995 = sbr.rel (!%p5196_p2) target bundleno = 1203 (0x4b3), region = 143 }
 0x4a8   : > { %v3984_v30 = vsel %vm3924_vm7, %v3977_v46, %v3983_v4 }
 0x4a9   : > { %v3985_v41 = vsel %vm3926_vm8, %v3978_v45, %v3984_v30 }
 0x4aa   : > { %4489 = vst.msk [vmem:[%s5452_s24 + $0x8] sm:$0xff] %vm3929_vm9, %v3985_v41  ;;  %v4028_v8 = vld [vmem:[%s5452_s24] sm:$0xff] (%p5196_p2) }
 0x4ab   : > { %4029 = vst [vmem:[%s3997_s0] sm:$0xff] %v4028_v8 }
 0x4b1   : > { %v4030_v53 = vld [vmem:[%s5452_s24 + $0x8] sm:$0xff] }
 0x4b2   : > { %4031 = vst [vmem:[%s3997_s0 + $0x10] sm:$0xff] %v4030_v53 }
 0x4b3 PF: > { %s7914_s21 = sld [smem:[#allocation35_spill]]  ;;  %s7916_s18 = smov %s4919_s19 }
 0x4b4   : > { %s7915_s3 = sld [smem:[#allocation36_spill]]  ;;  %s7917_s19 = smov %s4923_s20 }
 0x4b9   : > { %p42_p7 = scmp.ge.s32.totalorder %s7914_s21, 4  }
 0x4ba   : > { %s7918_s20 = smov %s7915_s3 }
 0x4bb   :  { %44 = sbr.rel (!%p42_p7) target bundleno = 32 (0x20), region = 359 }
 0x4c0   :  { %4047 = vsyncpa [#allocation6], 1 }
 0x4c1   :  { %4049 = vsyncpa [#allocation6 + $0x1], 1 }
 0x4c2   :  { %4050 = vsyncpa [#allocation25], 1 }
 0x4c3   :  { %4051 = vsyncpa [#allocation7], 1 }
 0x4c4   :  { %4053 = vsyncpa [#allocation7 + $0x1], 1 }
 0x4c5   :  { %4054 = vsyncpa [#allocation9], 1 }
 0x4c6   :  { %4056 = vsyncpa [#allocation9 + $0x1], 1 }
 0x4c7   :  { %4057 = vsyncpa [#allocation12], 1 }
 0x4c8   :  { %4059 = vsyncpa [#allocation12 + $0x1], 1 }
 0x4c9   :  { %4060 = vsyncpa [#allocation15], 1 }
 0x4ca   :  { %4062 = vsyncpa [#allocation15 + $0x1], 1 }
 0x4cb   :  { %4063 = vsyncpa [#allocation18], 1 }
 0x4cc   :  { %4065 = vsyncpa [#allocation18 + $0x1], 1 }
 0x4cd   :  { %4066 = vsyncpa [#allocation21], 1 }
 0x4ce   :  { %4068 = vsyncpa [#allocation21 + $0x1], 1 }

</bundles_post_ra>
